<compile_context>
chip_gen: v7x
topology: tpu7x:2x2x1
jax: 0.10.0
libtpu: 0.0.40
codegen_flags: <defaults>
</compile_context>

<pallas_src>
import math
import functools

import jax
import jax.numpy as jnp
from jax.experimental import pallas as pl
from jax.experimental.pallas import tpu as pltpu

LANE = 128


# ----------------------------- kernel helpers -----------------------------

def _layernorm(x, w, b, eps=1e-6):
    # PyTorch LayerNorm: biased variance over last axis, eps=1e-6.
    mu = jnp.mean(x, axis=-1, keepdims=True)
    var = jnp.mean((x - mu) ** 2, axis=-1, keepdims=True)
    return (x - mu) * jax.lax.rsqrt(var + eps) * w + b


def _gelu(x):
    # TODO(synk): torch.nn.functional.gelu defaults to the exact erf-based GELU;
    # tanh-approx GELU is used here because erf lowering is not guaranteed on
    # Mosaic (max abs diff ~1e-3 at these magnitudes).
    return jax.nn.gelu(x, approximate=True)


# ------------------------------- the kernel -------------------------------

def transformer_block_kernel(num_heads, s_valid, mlp_chunk,
                             x_ref, pe_ref,
                             ln1w_ref, ln1b_ref,
                             wqkv_ref, bqkv_ref,
                             wo_ref, bo_ref,
                             ln2w_ref, ln2b_ref,
                             w1_ref, b1_ref, w2_ref, b2_ref,
                             o_ref):
    bt, s, hdim = x_ref.shape          # batch-tile, (padded) seq, hidden (static)
    nh = num_heads
    hd = hdim // nh
    rows = bt * s
    cdt = wqkv_ref.dtype               # matmul operand dtype (bf16)

    # Positional encoding + residual stream kept in f32.
    x3 = x_ref[...].astype(jnp.float32) + pe_ref[...].astype(jnp.float32)[None]
    x = x3.reshape(rows, hdim)         # flatten (bt, s) -> rows for tall MXU M

    # ------------------ attention sub-block (pre-LN + residual) -----------
    h_res = x
    xn = _layernorm(x, ln1w_ref[0], ln1b_ref[0])

    # Fused QKV projection: one (rows, H) @ (H, 3H) matmul, f32 accumulation.
    qkv = jnp.dot(xn.astype(cdt), wqkv_ref[...],
                  preferred_element_type=jnp.float32) + bqkv_ref[0]

    def to_heads(t):                   # (rows, H) -> (bt*nh, s, hd); one permute,
        t = t.reshape(bt, s, nh, hd)   # minor (lane) dim untouched.
        t = jnp.swapaxes(t, 1, 2)      # (bt, nh, s, hd)
        return t.reshape(bt * nh, s, hd)

    qh = to_heads(qkv[:, :hdim]).astype(cdt)
    kh = to_heads(qkv[:, hdim:2 * hdim]).astype(cdt)
    vh = to_heads(qkv[:, 2 * hdim:]).astype(cdt)

    scale = 1.0 / math.sqrt(hd)
    # Implicit k^T via dot_general contraction dims (no explicit transpose).
    scores = jnp.einsum('bqd,bkd->bqk', qh, kh,
                        preferred_element_type=jnp.float32) * scale

    if s_valid < s:
        # Mask padded key columns (host padded S up to a lane multiple).
        key_ids = jax.lax.broadcasted_iota(jnp.int32, (1, 1, s), 2)
        scores = jnp.where(key_ids < s_valid, scores, -1e30)

    # Numerically-stable softmax over keys; reciprocal on the EUP slot.
    scores = scores - jnp.max(scores, axis=-1, keepdims=True)
    p = jnp.exp(scores)
    denom = jnp.sum(p, axis=-1, keepdims=True)
    p = p * pl.reciprocal(denom, approx=True)

    ctx = jnp.einsum('bqk,bkd->bqd', p.astype(cdt), vh,
                     preferred_element_type=jnp.float32)

    # Inverse of to_heads: (bt*nh, s, hd) -> (rows, H), single permute.
    ctx = ctx.reshape(bt, nh, s, hd)
    ctx = jnp.swapaxes(ctx, 1, 2)      # (bt, s, nh, hd)
    ctx = ctx.reshape(rows, hdim)

    attn_out = jnp.dot(ctx.astype(cdt), wo_ref[...],
                       preferred_element_type=jnp.float32) + bo_ref[0]
    x = attn_out + h_res

    # ---------------------- MLP sub-block (pre-LN + residual) -------------
    h_res = x
    xn = _layernorm(x, ln2w_ref[0], ln2b_ref[0])
    xn_c = xn.astype(cdt)
    b1 = b1_ref[0]
    mdim = w1_ref.shape[1]

    # Chunk over mlp_dim to bound the (rows, M) f32 intermediate / GELU temps.
    acc = jnp.zeros((rows, hdim), jnp.float32)
    for c0 in range(0, mdim, mlp_chunk):
        c1 = min(c0 + mlp_chunk, mdim)
        y = jnp.dot(xn_c, w1_ref[:, c0:c1],
                    preferred_element_type=jnp.float32) + b1[c0:c1]
        y = _gelu(y)
        acc = acc + jnp.dot(y.astype(cdt), w2_ref[c0:c1, :],
                            preferred_element_type=jnp.float32)
    x = acc + b2_ref[0] + h_res

    o_ref[...] = x.reshape(bt, s, hdim).astype(o_ref.dtype)


# ------------------------- generation-aware tiling --------------------------

def _tpu_generation():
    """Heuristic per-generation tiling config from device_kind."""
    kind = ""
    try:
        kind = jax.devices()[0].device_kind.lower()
    except Exception:
        pass
    if "v7" in kind:
        # 2 TensorCores / 64 MiB VMEM per TC.
        return {"num_tc": 2, "vmem_limit": 48 * 1024 * 1024, "rows_target": 256}
    if "v5" in kind or "v6" in kind:
        # 1 TensorCore / 128 MiB VMEM: bigger tiles + higher scoped limit.
        return {"num_tc": 1, "vmem_limit": 96 * 1024 * 1024, "rows_target": 512}
    # Unknown generation: previous known-good conservative config.
    return {"num_tc": 1, "vmem_limit": 48 * 1024 * 1024, "rows_target": 256}


def _padded_seq(s):
    # Pad production-sized sequences to a lane multiple (e.g. 197 -> 256) so
    # scores / p / p@V stay lane-dense; tiny toy sequences are left alone.
    if s % LANE == 0 or s <= 64:
        return s
    return ((s + LANE - 1) // LANE) * LANE


def _pick_batch_tile(batch, seq, rows_target, num_tc):
    bt = max(1, min(batch, max(1, rows_target // max(seq, 1))))
    if num_tc > 1 and batch >= num_tc:
        # Keep >= num_tc grid steps so both TensorCores get work.
        bt = min(bt, max(1, batch // num_tc))

    def ok(v):
        if batch % v:
            return False
        # On multi-TC parts prefer a step count that is a multiple of num_tc.
        if num_tc > 1 and batch >= num_tc and (batch // v) % num_tc:
            return False
        return True

    for v in range(bt, 0, -1):
        if ok(v):
            return v
    for v in range(bt, 0, -1):          # fallback: any divisor of batch
        if batch % v == 0:
            return v
    return 1


# ------------------------------ host wrapper -------------------------------

def transformer_forward(x, params, num_heads):
    B, S, H = x.shape
    M = params["w1"].shape[1]
    cfg = _tpu_generation()

    # Optional lane-padding of the sequence dimension (masked in-kernel).
    S_pad = _padded_seq(S)
    pe = params["pe"]
    if S_pad != S:
        x = jnp.pad(x, ((0, 0), (0, S_pad - S), (0, 0)))
        pe = jnp.pad(pe, ((0, S_pad - S), (0, 0)))

    # Host-side prep: fuse QKV and cast weights to bf16 (f32 accumulation
    # happens inside the kernel; biases / LN params stay f32).
    # TODO(synk): optional fp8 weight storage on v7x (per-tensor scales).
    wqkv = jnp.concatenate([params["wq"], params["wk"], params["wv"]],
                           axis=1).astype(jnp.bfloat16)
    bqkv = jnp.concatenate([params["bq"], params["bk"], params["bv"]], axis=1)
    wo = params["wo"].astype(jnp.bfloat16)
    w1 = params["w1"].astype(jnp.bfloat16)
    w2 = params["w2"].astype(jnp.bfloat16)

    bt = _pick_batch_tile(B, S_pad, cfg["rows_target"], cfg["num_tc"])
    mlp_chunk = min(512, M)

    kernel = functools.partial(transformer_block_kernel, num_heads, S, mlp_chunk)

    operands = (x, pe,
                params["ln1_w"], params["ln1_b"],
                wqkv, bqkv,
                wo, params["bo"],
                params["ln2_w"], params["ln2_b"],
                w1, params["b1"], w2, params["b2"])

    def build(single_buffer_weights):
        def const_spec(shape):
            n = len(shape)
            if single_buffer_weights:
                # Grid-invariant blocks: one VMEM buffer, loaded once.
                return pl.BlockSpec(shape, lambda b, _n=n: (0,) * _n,
                                    pipeline_mode=pl.Buffered(1))
            return pl.BlockSpec(shape, lambda b, _n=n: (0,) * _n)

        return pl.pallas_call(
            kernel,
            out_shape=jax.ShapeDtypeStruct((B, S_pad, H), x.dtype),
            grid=(B // bt,),
            in_specs=[
                pl.BlockSpec((bt, S_pad, H), lambda b: (b, 0, 0)),  # x
                const_spec((S_pad, H)),                             # positional enc
                const_spec((1, H)), const_spec((1, H)),             # attention_norm
                const_spec((H, 3 * H)), const_spec((1, 3 * H)),     # fused Wqkv, bqkv
                const_spec((H, H)), const_spec((1, H)),             # Wo, bo
                const_spec((1, H)), const_spec((1, H)),             # ffn_norm
                const_spec((H, M)), const_spec((1, M)),             # fc1
                const_spec((M, H)), const_spec((1, H)),             # fc2
            ],
            out_specs=pl.BlockSpec((bt, S_pad, H), lambda b: (b, 0, 0)),
            compiler_params=pltpu.CompilerParams(
                dimension_semantics=("parallel",),
                vmem_limit_bytes=cfg["vmem_limit"]),
        )

    try:
        out = build(True)(*operands)
    except Exception:
        # Fallback: if this JAX build rejects Buffered(1) on the main pipeline,
        # run with default double-buffering (correctness identical).
        out = build(False)(*operands)

    if S_pad != S:
        out = out[:, :S, :]
    # vis=False -> Attention returns weights=None and Encoder collects nothing.
    return out, []


# -------------------------- parameter construction -------------------------

def make_positional_encoding(seq_length, hidden_size):
    position = jnp.arange(seq_length, dtype=jnp.float32)[:, None]
    div_term = jnp.exp(jnp.arange(0, hidden_size, 2, dtype=jnp.float32)
                       * (-math.log(10000.0) / hidden_size))
    pe = jnp.zeros((seq_length, hidden_size), dtype=jnp.float32)
    pe = pe.at[:, 0::2].set(jnp.sin(position * div_term))
    pe = pe.at[:, 1::2].set(jnp.cos(position * div_term))
    return pe


def init_params(key, seq_length, hidden_size, mlp_dim):
    ks = jax.random.split(key, 12)
    def lin(k, fan_in, fan_out, scale=0.05):
        return jax.random.normal(k, (fan_in, fan_out), jnp.float32) * scale
    H, M = hidden_size, mlp_dim
    return {
        "pe": make_positional_encoding(seq_length, H),
        "ln1_w": jnp.ones((1, H), jnp.float32),
        "ln1_b": jnp.zeros((1, H), jnp.float32),
        "wq": lin(ks[0], H, H), "bq": jax.random.normal(ks[1], (1, H)) * 0.01,
        "wk": lin(ks[2], H, H), "bk": jax.random.normal(ks[3], (1, H)) * 0.01,
        "wv": lin(ks[4], H, H), "bv": jax.random.normal(ks[5], (1, H)) * 0.01,
        "wo": lin(ks[6], H, H), "bo": jax.random.normal(ks[7], (1, H)) * 0.01,
        "ln2_w": jnp.ones((1, H), jnp.float32),
        "ln2_b": jnp.zeros((1, H), jnp.float32),
        "w1": lin(ks[8], H, M), "b1": jax.random.normal(ks[9], (1, M)) * 1e-6,
        "w2": lin(ks[10], M, H), "b2": jax.random.normal(ks[11], (1, H)) * 1e-6,
    }


# ------------------------------ JAX reference -------------------------------

def reference_forward(x, params, num_heads):
    B, S, H = x.shape
    hd = H // num_heads
    x = x + params["pe"][None]

    def ln(z, w, b):
        mu = jnp.mean(z, -1, keepdims=True)
        var = jnp.mean((z - mu) ** 2, -1, keepdims=True)
        return (z - mu) * jax.lax.rsqrt(var + 1e-6) * w + b

    h = x
    xn = ln(x, params["ln1_w"][0], params["ln1_b"][0])
    q = xn @ params["wq"] + params["bq"][0]
    k = xn @ params["wk"] + params["bk"][0]
    v = xn @ params["wv"] + params["bv"][0]
    q = q.reshape(B, S, num_heads, hd).transpose(0, 2, 1, 3)
    k = k.reshape(B, S, num_heads, hd).transpose(0, 2, 1, 3)
    v = v.reshape(B, S, num_heads, hd).transpose(0, 2, 1, 3)
    scores = jnp.einsum("bhqd,bhkd->bhqk", q, k) / math.sqrt(hd)
    p = jax.nn.softmax(scores, axis=-1)
    ctx = jnp.einsum("bhqk,bhkd->bhqd", p, v).transpose(0, 2, 1, 3).reshape(B, S, H)
    attn_out = ctx @ params["wo"] + params["bo"][0]
    x = attn_out + h

    h = x
    xn = ln(x, params["ln2_w"][0], params["ln2_b"][0])
    y = jax.nn.gelu(xn @ params["w1"] + params["b1"][0], approximate=True)
    y = y @ params["w2"] + params["b2"][0]
    return y + h


# ---------------------------------- main ------------------------------------

if __name__ == "__main__":
    B, S, H, M, NUM_HEADS = 2, 8, 32, 64, 4   # seq_length=8, hidden=32, mlp_dim=64

    key = jax.random.PRNGKey(0)
    k_x, k_p = jax.random.split(key)
    x = jax.random.normal(k_x, (B, S, H), jnp.float32)
    params = init_params(k_p, S, H, M)

    ref = reference_forward(x, params, NUM_HEADS)

    encoded, attn_weights = transformer_forward(x, params, NUM_HEADS)
    encoded = jax.block_until_ready(encoded)

    assert encoded.shape == (B, S, H)
    assert attn_weights == []   # vis=False
    max_err = float(jnp.max(jnp.abs(encoded - ref)))
    # bf16 matmul operands (f32 accumulation) -> slightly looser tolerance.
    assert jnp.allclose(encoded, ref, atol=2e-2, rtol=2e-2), max_err

    print("KERNEL_OK")
</pallas_src>

<mosaic_0001>
module attributes {stable_mosaic.version = 11 : i64} {
  func.func @transformer_block_kernel(%arg0: i32, %arg1: memref<2x8x32xf32, #tpu.memory_space<vmem>>, %arg2: memref<8x32xf32, #tpu.memory_space<vmem>>, %arg3: memref<1x32xf32, #tpu.memory_space<vmem>>, %arg4: memref<1x32xf32, #tpu.memory_space<vmem>>, %arg5: memref<32x96xbf16, #tpu.memory_space<vmem>>, %arg6: memref<1x96xf32, #tpu.memory_space<vmem>>, %arg7: memref<32x32xbf16, #tpu.memory_space<vmem>>, %arg8: memref<1x32xf32, #tpu.memory_space<vmem>>, %arg9: memref<1x32xf32, #tpu.memory_space<vmem>>, %arg10: memref<1x32xf32, #tpu.memory_space<vmem>>, %arg11: memref<32x64xbf16, #tpu.memory_space<vmem>>, %arg12: memref<1x64xf32, #tpu.memory_space<vmem>>, %arg13: memref<64x32xbf16, #tpu.memory_space<vmem>>, %arg14: memref<1x32xf32, #tpu.memory_space<vmem>>, %arg15: memref<2x8x32xf32, #tpu.memory_space<vmem>>) attributes {dimension_semantics = [#tpu.dimension_semantics<parallel>], iteration_bounds = array<i64: 1>, scalar_prefetch = 0 : i64, scratch_operands = 0 : i64, tpu.core_type = #tpu.core_type<tc>, window_params = [{transform_indices = @transform_0, window_bounds = array<i64: 2, 8, 32>}, {pipeline_mode = #tpu.pipeline_mode<synchronous>, transform_indices = @transform_1, window_bounds = array<i64: 8, 32>}, {pipeline_mode = #tpu.pipeline_mode<synchronous>, transform_indices = @transform_2, window_bounds = array<i64: 1, 32>}, {pipeline_mode = #tpu.pipeline_mode<synchronous>, transform_indices = @transform_3, window_bounds = array<i64: 1, 32>}, {pipeline_mode = #tpu.pipeline_mode<synchronous>, transform_indices = @transform_4, window_bounds = array<i64: 32, 96>}, {pipeline_mode = #tpu.pipeline_mode<synchronous>, transform_indices = @transform_5, window_bounds = array<i64: 1, 96>}, {pipeline_mode = #tpu.pipeline_mode<synchronous>, transform_indices = @transform_6, window_bounds = array<i64: 32, 32>}, {pipeline_mode = #tpu.pipeline_mode<synchronous>, transform_indices = @transform_7, window_bounds = array<i64: 1, 32>}, {pipeline_mode = #tpu.pipeline_mode<synchronous>, transform_indices = @transform_8, window_bounds = array<i64: 1, 32>}, {pipeline_mode = #tpu.pipeline_mode<synchronous>, transform_indices = @transform_9, window_bounds = array<i64: 1, 32>}, {pipeline_mode = #tpu.pipeline_mode<synchronous>, transform_indices = @transform_10, window_bounds = array<i64: 32, 64>}, {pipeline_mode = #tpu.pipeline_mode<synchronous>, transform_indices = @transform_11, window_bounds = array<i64: 1, 64>}, {pipeline_mode = #tpu.pipeline_mode<synchronous>, transform_indices = @transform_12, window_bounds = array<i64: 64, 32>}, {pipeline_mode = #tpu.pipeline_mode<synchronous>, transform_indices = @transform_13, window_bounds = array<i64: 1, 32>}, {transform_indices = @transform_14, window_bounds = array<i64: 2, 8, 32>}]} {
    %c0 = arith.constant 0 : index
    %c0_0 = arith.constant 0 : index
    %c0_1 = arith.constant 0 : index
    %0 = vector.load %arg1[%c0, %c0_0, %c0_1] : memref<2x8x32xf32, #tpu.memory_space<vmem>>, vector<2x8x32xf32>
    %c0_2 = arith.constant 0 : index
    %c0_3 = arith.constant 0 : index
    %1 = vector.load %arg2[%c0_2, %c0_3] : memref<8x32xf32, #tpu.memory_space<vmem>>, vector<8x32xf32>
    %2 = vector.shape_cast %1 : vector<8x32xf32> to vector<1x8x32xf32>
    %3 = vector.broadcast %2 : vector<1x8x32xf32> to vector<2x8x32xf32>
    %4 = arith.addf %0, %3 : vector<2x8x32xf32>
    %5 = vector.shape_cast %4 : vector<2x8x32xf32> to vector<16x32xf32>
    %c0_4 = arith.constant 0 : index
    %c0_5 = arith.constant 0 : index
    %6 = vector.load %arg3[%c0_4, %c0_5] : memref<1x32xf32, #tpu.memory_space<vmem>>, vector<1x32xf32>
    %7 = vector.shape_cast %6 : vector<1x32xf32> to vector<32xf32>
    %c0_6 = arith.constant 0 : index
    %c0_7 = arith.constant 0 : index
    %8 = vector.load %arg4[%c0_6, %c0_7] : memref<1x32xf32, #tpu.memory_space<vmem>>, vector<1x32xf32>
    %9 = vector.shape_cast %8 : vector<1x32xf32> to vector<32xf32>
    %cst = arith.constant dense<0.000000e+00> : vector<16xf32>
    %10 = vector.multi_reduction <add>, %5, %cst [1] : vector<16x32xf32> to vector<16xf32>
    %11 = vector.shape_cast %10 : vector<16xf32> to vector<16x1xf32>
    %cst_8 = arith.constant 3.200000e+01 : f32
    %12 = vector.broadcast %cst_8 : f32 to vector<16x1xf32>
    %13 = arith.divf %11, %12 : vector<16x1xf32>
    %14 = vector.broadcast %13 : vector<16x1xf32> to vector<16x32xf32>
    %15 = arith.subf %5, %14 : vector<16x32xf32>
    %16 = arith.mulf %15, %15 : vector<16x32xf32>
    %cst_9 = arith.constant dense<0.000000e+00> : vector<16xf32>
    %17 = vector.multi_reduction <add>, %16, %cst_9 [1] : vector<16x32xf32> to vector<16xf32>
    %18 = vector.shape_cast %17 : vector<16xf32> to vector<16x1xf32>
    %cst_10 = arith.constant 3.200000e+01 : f32
    %19 = vector.broadcast %cst_10 : f32 to vector<16x1xf32>
    %20 = arith.divf %18, %19 : vector<16x1xf32>
    %21 = vector.broadcast %13 : vector<16x1xf32> to vector<16x32xf32>
    %22 = arith.subf %5, %21 : vector<16x32xf32>
    %cst_11 = arith.constant 9.99999997E-7 : f32
    %23 = vector.broadcast %cst_11 : f32 to vector<16x1xf32>
    %24 = arith.addf %20, %23 : vector<16x1xf32>
    %25 = math.rsqrt %24 : vector<16x1xf32>
    %26 = vector.broadcast %25 : vector<16x1xf32> to vector<16x32xf32>
    %27 = arith.mulf %22, %26 : vector<16x32xf32>
    %28 = vector.shape_cast %7 : vector<32xf32> to vector<1x32xf32>
    %29 = vector.broadcast %28 : vector<1x32xf32> to vector<16x32xf32>
    %30 = arith.mulf %27, %29 : vector<16x32xf32>
    %31 = vector.shape_cast %9 : vector<32xf32> to vector<1x32xf32>
    %32 = vector.broadcast %31 : vector<1x32xf32> to vector<16x32xf32>
    %33 = arith.addf %30, %32 : vector<16x32xf32>
    %34 = arith.truncf %33 : vector<16x32xf32> to vector<16x32xbf16>
    %c0_12 = arith.constant 0 : index
    %c0_13 = arith.constant 0 : index
    %35 = vector.load %arg5[%c0_12, %c0_13] : memref<32x96xbf16, #tpu.memory_space<vmem>>, vector<32x96xbf16>
    %cst_14 = arith.constant dense<0.000000e+00> : vector<16x96xf32>
    %36 = tpu.matmul %34, %35, %cst_14 {dimension_numbers = #tpu.dot_dimension_numbers<[1], [0], [0], [1], [0, 0, 1, 1], [], []>} : vector<16x32xbf16>, vector<32x96xbf16>, vector<16x96xf32> -> vector<16x96xf32>
    %c0_15 = arith.constant 0 : index
    %c0_16 = arith.constant 0 : index
    %37 = vector.load %arg6[%c0_15, %c0_16] : memref<1x96xf32, #tpu.memory_space<vmem>>, vector<1x96xf32>
    %38 = vector.shape_cast %37 : vector<1x96xf32> to vector<96xf32>
    %39 = vector.shape_cast %38 : vector<96xf32> to vector<1x96xf32>
    %40 = vector.broadcast %39 : vector<1x96xf32> to vector<16x96xf32>
    %41 = arith.addf %36, %40 : vector<16x96xf32>
    %42 = vector.extract_strided_slice %41 {offsets = [0, 0], sizes = [16, 32], strides = [1, 1]} : vector<16x96xf32> to vector<16x32xf32>
    %43 = vector.shape_cast %42 : vector<16x32xf32> to vector<2x8x4x8xf32>
    %44 = tpu.transpose %43, [0, 2, 1, 3] : vector<2x8x4x8xf32> -> vector<2x4x8x8xf32>
    %45 = vector.shape_cast %44 : vector<2x4x8x8xf32> to vector<8x8x8xf32>
    %46 = arith.truncf %45 : vector<8x8x8xf32> to vector<8x8x8xbf16>
    %47 = vector.extract_strided_slice %41 {offsets = [0, 32], sizes = [16, 32], strides = [1, 1]} : vector<16x96xf32> to vector<16x32xf32>
    %48 = vector.shape_cast %47 : vector<16x32xf32> to vector<2x8x4x8xf32>
    %49 = tpu.transpose %48, [0, 2, 1, 3] : vector<2x8x4x8xf32> -> vector<2x4x8x8xf32>
    %50 = vector.shape_cast %49 : vector<2x4x8x8xf32> to vector<8x8x8xf32>
    %51 = arith.truncf %50 : vector<8x8x8xf32> to vector<8x8x8xbf16>
    %52 = vector.extract_strided_slice %41 {offsets = [0, 64], sizes = [16, 32], strides = [1, 1]} : vector<16x96xf32> to vector<16x32xf32>
    %53 = vector.shape_cast %52 : vector<16x32xf32> to vector<2x8x4x8xf32>
    %54 = tpu.transpose %53, [0, 2, 1, 3] : vector<2x8x4x8xf32> -> vector<2x4x8x8xf32>
    %55 = vector.shape_cast %54 : vector<2x4x8x8xf32> to vector<8x8x8xf32>
    %56 = arith.truncf %55 : vector<8x8x8xf32> to vector<8x8x8xbf16>
    "tpu.trace_start"() <{level = 10 : i32, message = "bqd,bkd->bqk"}> : () -> ()
    %cst_17 = arith.constant dense<0.000000e+00> : vector<8x8x8xf32>
    %57 = tpu.matmul %46, %51, %cst_17 {dimension_numbers = #tpu.dot_dimension_numbers<[2], [2], [1], [1], [0, 0, 0, 1, 1, 1], [0], [0]>} : vector<8x8x8xbf16>, vector<8x8x8xbf16>, vector<8x8x8xf32> -> vector<8x8x8xf32>
    "tpu.trace_stop"() : () -> ()
    %cst_18 = arith.constant 0.353553385 : f32
    %58 = vector.broadcast %cst_18 : f32 to vector<8x8x8xf32>
    %59 = arith.mulf %57, %58 : vector<8x8x8xf32>
    %cst_19 = arith.constant dense<0xFF800000> : vector<8x8xf32>
    %60 = vector.multi_reduction <maximumf>, %59, %cst_19 [2] : vector<8x8x8xf32> to vector<8x8xf32>
    %61 = vector.shape_cast %60 : vector<8x8xf32> to vector<8x8x1xf32>
    %62 = vector.broadcast %61 : vector<8x8x1xf32> to vector<8x8x8xf32>
    %63 = arith.subf %59, %62 : vector<8x8x8xf32>
    %64 = math.exp %63 : vector<8x8x8xf32>
    %cst_20 = arith.constant dense<0.000000e+00> : vector<8x8xf32>
    %65 = vector.multi_reduction <add>, %64, %cst_20 [2] : vector<8x8x8xf32> to vector<8x8xf32>
    %66 = vector.shape_cast %65 : vector<8x8xf32> to vector<8x8x1xf32>
    %67 = tpu.reciprocal %66 {approx = true} : vector<8x8x1xf32> -> vector<8x8x1xf32>
    %68 = vector.broadcast %67 : vector<8x8x1xf32> to vector<8x8x8xf32>
    %69 = arith.mulf %64, %68 : vector<8x8x8xf32>
    %70 = arith.truncf %69 : vector<8x8x8xf32> to vector<8x8x8xbf16>
    "tpu.trace_start"() <{level = 10 : i32, message = "bqk,bkd->bqd"}> : () -> ()
    %cst_21 = arith.constant dense<0.000000e+00> : vector<8x8x8xf32>
    %71 = tpu.matmul %70, %56, %cst_21 {dimension_numbers = #tpu.dot_dimension_numbers<[2], [1], [1], [2], [0, 0, 0, 1, 1, 2], [0], [0]>} : vector<8x8x8xbf16>, vector<8x8x8xbf16>, vector<8x8x8xf32> -> vector<8x8x8xf32>
    "tpu.trace_stop"() : () -> ()
    %72 = vector.shape_cast %71 : vector<8x8x8xf32> to vector<2x4x8x8xf32>
    %73 = tpu.transpose %72, [0, 2, 1, 3] : vector<2x4x8x8xf32> -> vector<2x8x4x8xf32>
    %74 = vector.shape_cast %73 : vector<2x8x4x8xf32> to vector<16x32xf32>
    %75 = arith.truncf %74 : vector<16x32xf32> to vector<16x32xbf16>
    %c0_22 = arith.constant 0 : index
    %c0_23 = arith.constant 0 : index
    %76 = vector.load %arg7[%c0_22, %c0_23] : memref<32x32xbf16, #tpu.memory_space<vmem>>, vector<32x32xbf16>
    %cst_24 = arith.constant dense<0.000000e+00> : vector<16x32xf32>
    %77 = tpu.matmul %75, %76, %cst_24 {dimension_numbers = #tpu.dot_dimension_numbers<[1], [0], [0], [1], [0, 0, 1, 1], [], []>} : vector<16x32xbf16>, vector<32x32xbf16>, vector<16x32xf32> -> vector<16x32xf32>
    %c0_25 = arith.constant 0 : index
    %c0_26 = arith.constant 0 : index
    %78 = vector.load %arg8[%c0_25, %c0_26] : memref<1x32xf32, #tpu.memory_space<vmem>>, vector<1x32xf32>
    %79 = vector.shape_cast %78 : vector<1x32xf32> to vector<32xf32>
    %80 = vector.shape_cast %79 : vector<32xf32> to vector<1x32xf32>
    %81 = vector.broadcast %80 : vector<1x32xf32> to vector<16x32xf32>
    %82 = arith.addf %77, %81 : vector<16x32xf32>
    %83 = arith.addf %82, %5 : vector<16x32xf32>
    %c0_27 = arith.constant 0 : index
    %c0_28 = arith.constant 0 : index
    %84 = vector.load %arg9[%c0_27, %c0_28] : memref<1x32xf32, #tpu.memory_space<vmem>>, vector<1x32xf32>
    %85 = vector.shape_cast %84 : vector<1x32xf32> to vector<32xf32>
    %c0_29 = arith.constant 0 : index
    %c0_30 = arith.constant 0 : index
    %86 = vector.load %arg10[%c0_29, %c0_30] : memref<1x32xf32, #tpu.memory_space<vmem>>, vector<1x32xf32>
    %87 = vector.shape_cast %86 : vector<1x32xf32> to vector<32xf32>
    %cst_31 = arith.constant dense<0.000000e+00> : vector<16xf32>
    %88 = vector.multi_reduction <add>, %83, %cst_31 [1] : vector<16x32xf32> to vector<16xf32>
    %89 = vector.shape_cast %88 : vector<16xf32> to vector<16x1xf32>
    %cst_32 = arith.constant 3.200000e+01 : f32
    %90 = vector.broadcast %cst_32 : f32 to vector<16x1xf32>
    %91 = arith.divf %89, %90 : vector<16x1xf32>
    %92 = vector.broadcast %91 : vector<16x1xf32> to vector<16x32xf32>
    %93 = arith.subf %83, %92 : vector<16x32xf32>
    %94 = arith.mulf %93, %93 : vector<16x32xf32>
    %cst_33 = arith.constant dense<0.000000e+00> : vector<16xf32>
    %95 = vector.multi_reduction <add>, %94, %cst_33 [1] : vector<16x32xf32> to vector<16xf32>
    %96 = vector.shape_cast %95 : vector<16xf32> to vector<16x1xf32>
    %cst_34 = arith.constant 3.200000e+01 : f32
    %97 = vector.broadcast %cst_34 : f32 to vector<16x1xf32>
    %98 = arith.divf %96, %97 : vector<16x1xf32>
    %99 = vector.broadcast %91 : vector<16x1xf32> to vector<16x32xf32>
    %100 = arith.subf %83, %99 : vector<16x32xf32>
    %cst_35 = arith.constant 9.99999997E-7 : f32
    %101 = vector.broadcast %cst_35 : f32 to vector<16x1xf32>
    %102 = arith.addf %98, %101 : vector<16x1xf32>
    %103 = math.rsqrt %102 : vector<16x1xf32>
    %104 = vector.broadcast %103 : vector<16x1xf32> to vector<16x32xf32>
    %105 = arith.mulf %100, %104 : vector<16x32xf32>
    %106 = vector.shape_cast %85 : vector<32xf32> to vector<1x32xf32>
    %107 = vector.broadcast %106 : vector<1x32xf32> to vector<16x32xf32>
    %108 = arith.mulf %105, %107 : vector<16x32xf32>
    %109 = vector.shape_cast %87 : vector<32xf32> to vector<1x32xf32>
    %110 = vector.broadcast %109 : vector<1x32xf32> to vector<16x32xf32>
    %111 = arith.addf %108, %110 : vector<16x32xf32>
    %112 = arith.truncf %111 : vector<16x32xf32> to vector<16x32xbf16>
    %c0_36 = arith.constant 0 : index
    %c0_37 = arith.constant 0 : index
    %113 = vector.load %arg12[%c0_36, %c0_37] : memref<1x64xf32, #tpu.memory_space<vmem>>, vector<1x64xf32>
    %114 = vector.shape_cast %113 : vector<1x64xf32> to vector<64xf32>
    %cst_38 = arith.constant 0.000000e+00 : f32
    %115 = vector.broadcast %cst_38 : f32 to vector<16x32xf32>
    %c0_39 = arith.constant 0 : index
    %c0_40 = arith.constant 0 : index
    %116 = vector.load %arg11[%c0_39, %c0_40] : memref<32x64xbf16, #tpu.memory_space<vmem>>, vector<32x64xbf16>
    %cst_41 = arith.constant dense<0.000000e+00> : vector<16x64xf32>
    %117 = tpu.matmul %112, %116, %cst_41 {dimension_numbers = #tpu.dot_dimension_numbers<[1], [0], [0], [1], [0, 0, 1, 1], [], []>} : vector<16x32xbf16>, vector<32x64xbf16>, vector<16x64xf32> -> vector<16x64xf32>
    %118 = vector.shape_cast %114 : vector<64xf32> to vector<1x64xf32>
    %119 = vector.broadcast %118 : vector<1x64xf32> to vector<16x64xf32>
    %120 = arith.addf %117, %119 : vector<16x64xf32>
    %121 = arith.mulf %120, %120 : vector<16x64xf32>
    %122 = arith.mulf %120, %121 : vector<16x64xf32>
    %cst_42 = arith.constant 4.471500e-02 : f32
    %123 = vector.broadcast %cst_42 : f32 to vector<16x64xf32>
    %124 = arith.mulf %123, %122 : vector<16x64xf32>
    %125 = arith.addf %120, %124 : vector<16x64xf32>
    %cst_43 = arith.constant 0.797884583 : f32
    %126 = vector.broadcast %cst_43 : f32 to vector<16x64xf32>
    %127 = arith.mulf %126, %125 : vector<16x64xf32>
    %128 = math.tanh %127 : vector<16x64xf32>
    %cst_44 = arith.constant 1.000000e+00 : f32
    %129 = vector.broadcast %cst_44 : f32 to vector<16x64xf32>
    %130 = arith.addf %129, %128 : vector<16x64xf32>
    %cst_45 = arith.constant 5.000000e-01 : f32
    %131 = vector.broadcast %cst_45 : f32 to vector<16x64xf32>
    %132 = arith.mulf %131, %130 : vector<16x64xf32>
    %133 = arith.mulf %120, %132 : vector<16x64xf32>
    %134 = arith.truncf %133 : vector<16x64xf32> to vector<16x64xbf16>
    %c0_46 = arith.constant 0 : index
    %c0_47 = arith.constant 0 : index
    %135 = vector.load %arg13[%c0_46, %c0_47] : memref<64x32xbf16, #tpu.memory_space<vmem>>, vector<64x32xbf16>
    %cst_48 = arith.constant dense<0.000000e+00> : vector<16x32xf32>
    %136 = tpu.matmul %134, %135, %cst_48 {dimension_numbers = #tpu.dot_dimension_numbers<[1], [0], [0], [1], [0, 0, 1, 1], [], []>} : vector<16x64xbf16>, vector<64x32xbf16>, vector<16x32xf32> -> vector<16x32xf32>
    %137 = arith.addf %115, %136 : vector<16x32xf32>
    %c0_49 = arith.constant 0 : index
    %c0_50 = arith.constant 0 : index
    %138 = vector.load %arg14[%c0_49, %c0_50] : memref<1x32xf32, #tpu.memory_space<vmem>>, vector<1x32xf32>
    %139 = vector.shape_cast %138 : vector<1x32xf32> to vector<32xf32>
    %140 = vector.shape_cast %139 : vector<32xf32> to vector<1x32xf32>
    %141 = vector.broadcast %140 : vector<1x32xf32> to vector<16x32xf32>
    %142 = arith.addf %137, %141 : vector<16x32xf32>
    %143 = arith.addf %142, %83 : vector<16x32xf32>
    %144 = vector.shape_cast %143 : vector<16x32xf32> to vector<2x8x32xf32>
    %c0_51 = arith.constant 0 : index
    %c0_52 = arith.constant 0 : index
    %c0_53 = arith.constant 0 : index
    %145 = vector.load %arg15[%c0_51, %c0_52, %c0_53] : memref<2x8x32xf32, #tpu.memory_space<vmem>>, vector<2x8x32xf32>
    tpu.vector_store %arg15[%c0_51, %c0_52, %c0_53], %144 {strides = array<i32>} : memref<2x8x32xf32, #tpu.memory_space<vmem>>, vector<2x8x32xf32>,
    return
  }
  func.func @transform_0(%arg0: i32) -> (i32, i32, i32) {
    %c0_i32 = arith.constant 0 : i32
    %c0_i32_0 = arith.constant 0 : i32
    %c0_i32_1 = arith.constant 0 : i32
    return %arg0, %c0_i32, %c0_i32_0 : i32, i32, i32
  }
  func.func @transform_1(%arg0: i32) -> (i32, i32) {
    %c0_i32 = arith.constant 0 : i32
    %c0_i32_0 = arith.constant 0 : i32
    %c0_i32_1 = arith.constant 0 : i32
    return %c0_i32, %c0_i32_0 : i32, i32
  }
  func.func @transform_2(%arg0: i32) -> (i32, i32) {
    %c0_i32 = arith.constant 0 : i32
    %c0_i32_0 = arith.constant 0 : i32
    %c0_i32_1 = arith.constant 0 : i32
    return %c0_i32, %c0_i32_0 : i32, i32
  }
  func.func @transform_3(%arg0: i32) -> (i32, i32) {
    %c0_i32 = arith.constant 0 : i32
    %c0_i32_0 = arith.constant 0 : i32
    %c0_i32_1 = arith.constant 0 : i32
    return %c0_i32, %c0_i32_0 : i32, i32
  }
  func.func @transform_4(%arg0: i32) -> (i32, i32) {
    %c0_i32 = arith.constant 0 : i32
    %c0_i32_0 = arith.constant 0 : i32
    %c0_i32_1 = arith.constant 0 : i32
    return %c0_i32, %c0_i32_0 : i32, i32
  }
  func.func @transform_5(%arg0: i32) -> (i32, i32) {
    %c0_i32 = arith.constant 0 : i32
    %c0_i32_0 = arith.constant 0 : i32
    %c0_i32_1 = arith.constant 0 : i32
    return %c0_i32, %c0_i32_0 : i32, i32
  }
  func.func @transform_6(%arg0: i32) -> (i32, i32) {
    %c0_i32 = arith.constant 0 : i32
    %c0_i32_0 = arith.constant 0 : i32
    %c0_i32_1 = arith.constant 0 : i32
    return %c0_i32, %c0_i32_0 : i32, i32
  }
  func.func @transform_7(%arg0: i32) -> (i32, i32) {
    %c0_i32 = arith.constant 0 : i32
    %c0_i32_0 = arith.constant 0 : i32
    %c0_i32_1 = arith.constant 0 : i32
    return %c0_i32, %c0_i32_0 : i32, i32
  }
  func.func @transform_8(%arg0: i32) -> (i32, i32) {
    %c0_i32 = arith.constant 0 : i32
    %c0_i32_0 = arith.constant 0 : i32
    %c0_i32_1 = arith.constant 0 : i32
    return %c0_i32, %c0_i32_0 : i32, i32
  }
  func.func @transform_9(%arg0: i32) -> (i32, i32) {
    %c0_i32 = arith.constant 0 : i32
    %c0_i32_0 = arith.constant 0 : i32
    %c0_i32_1 = arith.constant 0 : i32
    return %c0_i32, %c0_i32_0 : i32, i32
  }
  func.func @transform_10(%arg0: i32) -> (i32, i32) {
    %c0_i32 = arith.constant 0 : i32
    %c0_i32_0 = arith.constant 0 : i32
    %c0_i32_1 = arith.constant 0 : i32
    return %c0_i32, %c0_i32_0 : i32, i32
  }
  func.func @transform_11(%arg0: i32) -> (i32, i32) {
    %c0_i32 = arith.constant 0 : i32
    %c0_i32_0 = arith.constant 0 : i32
    %c0_i32_1 = arith.constant 0 : i32
    return %c0_i32, %c0_i32_0 : i32, i32
  }
  func.func @transform_12(%arg0: i32) -> (i32, i32) {
    %c0_i32 = arith.constant 0 : i32
    %c0_i32_0 = arith.constant 0 : i32
    %c0_i32_1 = arith.constant 0 : i32
    return %c0_i32, %c0_i32_0 : i32, i32
  }
  func.func @transform_13(%arg0: i32) -> (i32, i32) {
    %c0_i32 = arith.constant 0 : i32
    %c0_i32_0 = arith.constant 0 : i32
    %c0_i32_1 = arith.constant 0 : i32
    return %c0_i32, %c0_i32_0 : i32, i32
  }
  func.func @transform_14(%arg0: i32) -> (i32, i32, i32) {
    %c0_i32 = arith.constant 0 : i32
    %c0_i32_0 = arith.constant 0 : i32
    %c0_i32_1 = arith.constant 0 : i32
    return %arg0, %c0_i32, %c0_i32_0 : i32, i32, i32
  }
}

module attributes {stable_mosaic.version = 11 : i64} {
  func.func @transformer_block_kernel(%arg0: i32, %arg1: memref<2x8x32xf32, #tpu.memory_space<vmem>>, %arg2: memref<8x32xf32, #tpu.memory_space<vmem>>, %arg3: memref<1x32xf32, #tpu.memory_space<vmem>>, %arg4: memref<1x32xf32, #tpu.memory_space<vmem>>, %arg5: memref<32x96xbf16, #tpu.memory_space<vmem>>, %arg6: memref<1x96xf32, #tpu.memory_space<vmem>>, %arg7: memref<32x32xbf16, #tpu.memory_space<vmem>>, %arg8: memref<1x32xf32, #tpu.memory_space<vmem>>, %arg9: memref<1x32xf32, #tpu.memory_space<vmem>>, %arg10: memref<1x32xf32, #tpu.memory_space<vmem>>, %arg11: memref<32x64xbf16, #tpu.memory_space<vmem>>, %arg12: memref<1x64xf32, #tpu.memory_space<vmem>>, %arg13: memref<64x32xbf16, #tpu.memory_space<vmem>>, %arg14: memref<1x32xf32, #tpu.memory_space<vmem>>, %arg15: memref<2x8x32xf32, #tpu.memory_space<vmem>>) attributes {dimension_semantics = [#tpu.dimension_semantics<parallel>], iteration_bounds = array<i64: 1>, scalar_prefetch = 0 : i64, scratch_operands = 0 : i64, tpu.core_type = #tpu.core_type<tc>, window_params = [{transform_indices = @transform_0, window_bounds = array<i64: 2, 8, 32>}, {pipeline_mode = #tpu.pipeline_mode<synchronous>, transform_indices = @transform_1, window_bounds = array<i64: 8, 32>}, {pipeline_mode = #tpu.pipeline_mode<synchronous>, transform_indices = @transform_2, window_bounds = array<i64: 1, 32>}, {pipeline_mode = #tpu.pipeline_mode<synchronous>, transform_indices = @transform_3, window_bounds = array<i64: 1, 32>}, {pipeline_mode = #tpu.pipeline_mode<synchronous>, transform_indices = @transform_4, window_bounds = array<i64: 32, 96>}, {pipeline_mode = #tpu.pipeline_mode<synchronous>, transform_indices = @transform_5, window_bounds = array<i64: 1, 96>}, {pipeline_mode = #tpu.pipeline_mode<synchronous>, transform_indices = @transform_6, window_bounds = array<i64: 32, 32>}, {pipeline_mode = #tpu.pipeline_mode<synchronous>, transform_indices = @transform_7, window_bounds = array<i64: 1, 32>}, {pipeline_mode = #tpu.pipeline_mode<synchronous>, transform_indices = @transform_8, window_bounds = array<i64: 1, 32>}, {pipeline_mode = #tpu.pipeline_mode<synchronous>, transform_indices = @transform_9, window_bounds = array<i64: 1, 32>}, {pipeline_mode = #tpu.pipeline_mode<synchronous>, transform_indices = @transform_10, window_bounds = array<i64: 32, 64>}, {pipeline_mode = #tpu.pipeline_mode<synchronous>, transform_indices = @transform_11, window_bounds = array<i64: 1, 64>}, {pipeline_mode = #tpu.pipeline_mode<synchronous>, transform_indices = @transform_12, window_bounds = array<i64: 64, 32>}, {pipeline_mode = #tpu.pipeline_mode<synchronous>, transform_indices = @transform_13, window_bounds = array<i64: 1, 32>}, {transform_indices = @transform_14, window_bounds = array<i64: 2, 8, 32>}]} {
    %c0 = arith.constant 0 : index
    %c0_0 = arith.constant 0 : index
    %c0_1 = arith.constant 0 : index
    %0 = vector.load %arg1[%c0, %c0_0, %c0_1] : memref<2x8x32xf32, #tpu.memory_space<vmem>>, vector<2x8x32xf32>
    %c0_2 = arith.constant 0 : index
    %c0_3 = arith.constant 0 : index
    %1 = vector.load %arg2[%c0_2, %c0_3] : memref<8x32xf32, #tpu.memory_space<vmem>>, vector<8x32xf32>
    %2 = vector.shape_cast %1 : vector<8x32xf32> to vector<1x8x32xf32>
    %3 = vector.broadcast %2 : vector<1x8x32xf32> to vector<2x8x32xf32>
    %4 = arith.addf %0, %3 : vector<2x8x32xf32>
    %5 = vector.shape_cast %4 : vector<2x8x32xf32> to vector<16x32xf32>
    %c0_4 = arith.constant 0 : index
    %c0_5 = arith.constant 0 : index
    %6 = vector.load %arg3[%c0_4, %c0_5] : memref<1x32xf32, #tpu.memory_space<vmem>>, vector<1x32xf32>
    %7 = vector.shape_cast %6 : vector<1x32xf32> to vector<32xf32>
    %c0_6 = arith.constant 0 : index
    %c0_7 = arith.constant 0 : index
    %8 = vector.load %arg4[%c0_6, %c0_7] : memref<1x32xf32, #tpu.memory_space<vmem>>, vector<1x32xf32>
    %9 = vector.shape_cast %8 : vector<1x32xf32> to vector<32xf32>
    %cst = arith.constant dense<0.000000e+00> : vector<16xf32>
    %10 = vector.multi_reduction <add>, %5, %cst [1] : vector<16x32xf32> to vector<16xf32>
    %11 = vector.shape_cast %10 : vector<16xf32> to vector<16x1xf32>
    %cst_8 = arith.constant 3.200000e+01 : f32
    %12 = vector.broadcast %cst_8 : f32 to vector<16x1xf32>
    %13 = arith.divf %11, %12 : vector<16x1xf32>
    %14 = vector.broadcast %13 : vector<16x1xf32> to vector<16x32xf32>
    %15 = arith.subf %5, %14 : vector<16x32xf32>
    %16 = arith.mulf %15, %15 : vector<16x32xf32>
    %cst_9 = arith.constant dense<0.000000e+00> : vector<16xf32>
    %17 = vector.multi_reduction <add>, %16, %cst_9 [1] : vector<16x32xf32> to vector<16xf32>
    %18 = vector.shape_cast %17 : vector<16xf32> to vector<16x1xf32>
    %cst_10 = arith.constant 3.200000e+01 : f32
    %19 = vector.broadcast %cst_10 : f32 to vector<16x1xf32>
    %20 = arith.divf %18, %19 : vector<16x1xf32>
    %21 = vector.broadcast %13 : vector<16x1xf32> to vector<16x32xf32>
    %22 = arith.subf %5, %21 : vector<16x32xf32>
    %cst_11 = arith.constant 9.99999997E-7 : f32
    %23 = vector.broadcast %cst_11 : f32 to vector<16x1xf32>
    %24 = arith.addf %20, %23 : vector<16x1xf32>
    %25 = math.rsqrt %24 : vector<16x1xf32>
    %26 = vector.broadcast %25 : vector<16x1xf32> to vector<16x32xf32>
    %27 = arith.mulf %22, %26 : vector<16x32xf32>
    %28 = vector.shape_cast %7 : vector<32xf32> to vector<1x32xf32>
    %29 = vector.broadcast %28 : vector<1x32xf32> to vector<16x32xf32>
    %30 = arith.mulf %27, %29 : vector<16x32xf32>
    %31 = vector.shape_cast %9 : vector<32xf32> to vector<1x32xf32>
    %32 = vector.broadcast %31 : vector<1x32xf32> to vector<16x32xf32>
    %33 = arith.addf %30, %32 : vector<16x32xf32>
    %34 = arith.truncf %33 : vector<16x32xf32> to vector<16x32xbf16>
    %c0_12 = arith.constant 0 : index
    %c0_13 = arith.constant 0 : index
    %35 = vector.load %arg5[%c0_12, %c0_13] : memref<32x96xbf16, #tpu.memory_space<vmem>>, vector<32x96xbf16>
    %cst_14 = arith.constant dense<0.000000e+00> : vector<16x96xf32>
    %36 = tpu.matmul %34, %35, %cst_14 {dimension_numbers = #tpu.dot_dimension_numbers<[1], [0], [0], [1], [0, 0, 1, 1], [], []>} : vector<16x32xbf16>, vector<32x96xbf16>, vector<16x96xf32> -> vector<16x96xf32>
    %c0_15 = arith.constant 0 : index
    %c0_16 = arith.constant 0 : index
    %37 = vector.load %arg6[%c0_15, %c0_16] : memref<1x96xf32, #tpu.memory_space<vmem>>, vector<1x96xf32>
    %38 = vector.shape_cast %37 : vector<1x96xf32> to vector<96xf32>
    %39 = vector.shape_cast %38 : vector<96xf32> to vector<1x96xf32>
    %40 = vector.broadcast %39 : vector<1x96xf32> to vector<16x96xf32>
    %41 = arith.addf %36, %40 : vector<16x96xf32>
    %42 = vector.extract_strided_slice %41 {offsets = [0, 0], sizes = [16, 32], strides = [1, 1]} : vector<16x96xf32> to vector<16x32xf32>
    %43 = vector.shape_cast %42 : vector<16x32xf32> to vector<2x8x4x8xf32>
    %44 = tpu.transpose %43, [0, 2, 1, 3] : vector<2x8x4x8xf32> -> vector<2x4x8x8xf32>
    %45 = vector.shape_cast %44 : vector<2x4x8x8xf32> to vector<8x8x8xf32>
    %46 = arith.truncf %45 : vector<8x8x8xf32> to vector<8x8x8xbf16>
    %47 = vector.extract_strided_slice %41 {offsets = [0, 32], sizes = [16, 32], strides = [1, 1]} : vector<16x96xf32> to vector<16x32xf32>
    %48 = vector.shape_cast %47 : vector<16x32xf32> to vector<2x8x4x8xf32>
    %49 = tpu.transpose %48, [0, 2, 1, 3] : vector<2x8x4x8xf32> -> vector<2x4x8x8xf32>
    %50 = vector.shape_cast %49 : vector<2x4x8x8xf32> to vector<8x8x8xf32>
    %51 = arith.truncf %50 : vector<8x8x8xf32> to vector<8x8x8xbf16>
    %52 = vector.extract_strided_slice %41 {offsets = [0, 64], sizes = [16, 32], strides = [1, 1]} : vector<16x96xf32> to vector<16x32xf32>
    %53 = vector.shape_cast %52 : vector<16x32xf32> to vector<2x8x4x8xf32>
    %54 = tpu.transpose %53, [0, 2, 1, 3] : vector<2x8x4x8xf32> -> vector<2x4x8x8xf32>
    %55 = vector.shape_cast %54 : vector<2x4x8x8xf32> to vector<8x8x8xf32>
    %56 = arith.truncf %55 : vector<8x8x8xf32> to vector<8x8x8xbf16>
    "tpu.trace_start"() <{level = 10 : i32, message = "bqd,bkd->bqk"}> : () -> ()
    %cst_17 = arith.constant dense<0.000000e+00> : vector<8x8x8xf32>
    %57 = tpu.matmul %46, %51, %cst_17 {dimension_numbers = #tpu.dot_dimension_numbers<[2], [2], [1], [1], [0, 0, 0, 1, 1, 1], [0], [0]>} : vector<8x8x8xbf16>, vector<8x8x8xbf16>, vector<8x8x8xf32> -> vector<8x8x8xf32>
    "tpu.trace_stop"() : () -> ()
    %cst_18 = arith.constant 0.353553385 : f32
    %58 = vector.broadcast %cst_18 : f32 to vector<8x8x8xf32>
    %59 = arith.mulf %57, %58 : vector<8x8x8xf32>
    %cst_19 = arith.constant dense<0xFF800000> : vector<8x8xf32>
    %60 = vector.multi_reduction <maximumf>, %59, %cst_19 [2] : vector<8x8x8xf32> to vector<8x8xf32>
    %61 = vector.shape_cast %60 : vector<8x8xf32> to vector<8x8x1xf32>
    %62 = vector.broadcast %61 : vector<8x8x1xf32> to vector<8x8x8xf32>
    %63 = arith.subf %59, %62 : vector<8x8x8xf32>
    %64 = math.exp %63 : vector<8x8x8xf32>
    %cst_20 = arith.constant dense<0.000000e+00> : vector<8x8xf32>
    %65 = vector.multi_reduction <add>, %64, %cst_20 [2] : vector<8x8x8xf32> to vector<8x8xf32>
    %66 = vector.shape_cast %65 : vector<8x8xf32> to vector<8x8x1xf32>
    %67 = tpu.reciprocal %66 {approx = true} : vector<8x8x1xf32> -> vector<8x8x1xf32>
    %68 = vector.broadcast %67 : vector<8x8x1xf32> to vector<8x8x8xf32>
    %69 = arith.mulf %64, %68 : vector<8x8x8xf32>
    %70 = arith.truncf %69 : vector<8x8x8xf32> to vector<8x8x8xbf16>
    "tpu.trace_start"() <{level = 10 : i32, message = "bqk,bkd->bqd"}> : () -> ()
    %cst_21 = arith.constant dense<0.000000e+00> : vector<8x8x8xf32>
    %71 = tpu.matmul %70, %56, %cst_21 {dimension_numbers = #tpu.dot_dimension_numbers<[2], [1], [1], [2], [0, 0, 0, 1, 1, 2], [0], [0]>} : vector<8x8x8xbf16>, vector<8x8x8xbf16>, vector<8x8x8xf32> -> vector<8x8x8xf32>
    "tpu.trace_stop"() : () -> ()
    %72 = vector.shape_cast %71 : vector<8x8x8xf32> to vector<2x4x8x8xf32>
    %73 = tpu.transpose %72, [0, 2, 1, 3] : vector<2x4x8x8xf32> -> vector<2x8x4x8xf32>
    %74 = vector.shape_cast %73 : vector<2x8x4x8xf32> to vector<16x32xf32>
    %75 = arith.truncf %74 : vector<16x32xf32> to vector<16x32xbf16>
    %c0_22 = arith.constant 0 : index
    %c0_23 = arith.constant 0 : index
    %76 = vector.load %arg7[%c0_22, %c0_23] : memref<32x32xbf16, #tpu.memory_space<vmem>>, vector<32x32xbf16>
    %cst_24 = arith.constant dense<0.000000e+00> : vector<16x32xf32>
    %77 = tpu.matmul %75, %76, %cst_24 {dimension_numbers = #tpu.dot_dimension_numbers<[1], [0], [0], [1], [0, 0, 1, 1], [], []>} : vector<16x32xbf16>, vector<32x32xbf16>, vector<16x32xf32> -> vector<16x32xf32>
    %c0_25 = arith.constant 0 : index
    %c0_26 = arith.constant 0 : index
    %78 = vector.load %arg8[%c0_25, %c0_26] : memref<1x32xf32, #tpu.memory_space<vmem>>, vector<1x32xf32>
    %79 = vector.shape_cast %78 : vector<1x32xf32> to vector<32xf32>
    %80 = vector.shape_cast %79 : vector<32xf32> to vector<1x32xf32>
    %81 = vector.broadcast %80 : vector<1x32xf32> to vector<16x32xf32>
    %82 = arith.addf %77, %81 : vector<16x32xf32>
    %83 = arith.addf %82, %5 : vector<16x32xf32>
    %c0_27 = arith.constant 0 : index
    %c0_28 = arith.constant 0 : index
    %84 = vector.load %arg9[%c0_27, %c0_28] : memref<1x32xf32, #tpu.memory_space<vmem>>, vector<1x32xf32>
    %85 = vector.shape_cast %84 : vector<1x32xf32> to vector<32xf32>
    %c0_29 = arith.constant 0 : index
    %c0_30 = arith.constant 0 : index
    %86 = vector.load %arg10[%c0_29, %c0_30] : memref<1x32xf32, #tpu.memory_space<vmem>>, vector<1x32xf32>
    %87 = vector.shape_cast %86 : vector<1x32xf32> to vector<32xf32>
    %cst_31 = arith.constant dense<0.000000e+00> : vector<16xf32>
    %88 = vector.multi_reduction <add>, %83, %cst_31 [1] : vector<16x32xf32> to vector<16xf32>
    %89 = vector.shape_cast %88 : vector<16xf32> to vector<16x1xf32>
    %cst_32 = arith.constant 3.200000e+01 : f32
    %90 = vector.broadcast %cst_32 : f32 to vector<16x1xf32>
    %91 = arith.divf %89, %90 : vector<16x1xf32>
    %92 = vector.broadcast %91 : vector<16x1xf32> to vector<16x32xf32>
    %93 = arith.subf %83, %92 : vector<16x32xf32>
    %94 = arith.mulf %93, %93 : vector<16x32xf32>
    %cst_33 = arith.constant dense<0.000000e+00> : vector<16xf32>
    %95 = vector.multi_reduction <add>, %94, %cst_33 [1] : vector<16x32xf32> to vector<16xf32>
    %96 = vector.shape_cast %95 : vector<16xf32> to vector<16x1xf32>
    %cst_34 = arith.constant 3.200000e+01 : f32
    %97 = vector.broadcast %cst_34 : f32 to vector<16x1xf32>
    %98 = arith.divf %96, %97 : vector<16x1xf32>
    %99 = vector.broadcast %91 : vector<16x1xf32> to vector<16x32xf32>
    %100 = arith.subf %83, %99 : vector<16x32xf32>
    %cst_35 = arith.constant 9.99999997E-7 : f32
    %101 = vector.broadcast %cst_35 : f32 to vector<16x1xf32>
    %102 = arith.addf %98, %101 : vector<16x1xf32>
    %103 = math.rsqrt %102 : vector<16x1xf32>
    %104 = vector.broadcast %103 : vector<16x1xf32> to vector<16x32xf32>
    %105 = arith.mulf %100, %104 : vector<16x32xf32>
    %106 = vector.shape_cast %85 : vector<32xf32> to vector<1x32xf32>
    %107 = vector.broadcast %106 : vector<1x32xf32> to vector<16x32xf32>
    %108 = arith.mulf %105, %107 : vector<16x32xf32>
    %109 = vector.shape_cast %87 : vector<32xf32> to vector<1x32xf32>
    %110 = vector.broadcast %109 : vector<1x32xf32> to vector<16x32xf32>
    %111 = arith.addf %108, %110 : vector<16x32xf32>
    %112 = arith.truncf %111 : vector<16x32xf32> to vector<16x32xbf16>
    %c0_36 = arith.constant 0 : index
    %c0_37 = arith.constant 0 : index
    %113 = vector.load %arg12[%c0_36, %c0_37] : memref<1x64xf32, #tpu.memory_space<vmem>>, vector<1x64xf32>
    %114 = vector.shape_cast %113 : vector<1x64xf32> to vector<64xf32>
    %cst_38 = arith.constant 0.000000e+00 : f32
    %115 = vector.broadcast %cst_38 : f32 to vector<16x32xf32>
    %c0_39 = arith.constant 0 : index
    %c0_40 = arith.constant 0 : index
    %116 = vector.load %arg11[%c0_39, %c0_40] : memref<32x64xbf16, #tpu.memory_space<vmem>>, vector<32x64xbf16>
    %cst_41 = arith.constant dense<0.000000e+00> : vector<16x64xf32>
    %117 = tpu.matmul %112, %116, %cst_41 {dimension_numbers = #tpu.dot_dimension_numbers<[1], [0], [0], [1], [0, 0, 1, 1], [], []>} : vector<16x32xbf16>, vector<32x64xbf16>, vector<16x64xf32> -> vector<16x64xf32>
    %118 = vector.shape_cast %114 : vector<64xf32> to vector<1x64xf32>
    %119 = vector.broadcast %118 : vector<1x64xf32> to vector<16x64xf32>
    %120 = arith.addf %117, %119 : vector<16x64xf32>
    %121 = arith.mulf %120, %120 : vector<16x64xf32>
    %122 = arith.mulf %120, %121 : vector<16x64xf32>
    %cst_42 = arith.constant 4.471500e-02 : f32
    %123 = vector.broadcast %cst_42 : f32 to vector<16x64xf32>
    %124 = arith.mulf %123, %122 : vector<16x64xf32>
    %125 = arith.addf %120, %124 : vector<16x64xf32>
    %cst_43 = arith.constant 0.797884583 : f32
    %126 = vector.broadcast %cst_43 : f32 to vector<16x64xf32>
    %127 = arith.mulf %126, %125 : vector<16x64xf32>
    %128 = math.tanh %127 : vector<16x64xf32>
    %cst_44 = arith.constant 1.000000e+00 : f32
    %129 = vector.broadcast %cst_44 : f32 to vector<16x64xf32>
    %130 = arith.addf %129, %128 : vector<16x64xf32>
    %cst_45 = arith.constant 5.000000e-01 : f32
    %131 = vector.broadcast %cst_45 : f32 to vector<16x64xf32>
    %132 = arith.mulf %131, %130 : vector<16x64xf32>
    %133 = arith.mulf %120, %132 : vector<16x64xf32>
    %134 = arith.truncf %133 : vector<16x64xf32> to vector<16x64xbf16>
    %c0_46 = arith.constant 0 : index
    %c0_47 = arith.constant 0 : index
    %135 = vector.load %arg13[%c0_46, %c0_47] : memref<64x32xbf16, #tpu.memory_space<vmem>>, vector<64x32xbf16>
    %cst_48 = arith.constant dense<0.000000e+00> : vector<16x32xf32>
    %136 = tpu.matmul %134, %135, %cst_48 {dimension_numbers = #tpu.dot_dimension_numbers<[1], [0], [0], [1], [0, 0, 1, 1], [], []>} : vector<16x64xbf16>, vector<64x32xbf16>, vector<16x32xf32> -> vector<16x32xf32>
    %137 = arith.addf %115, %136 : vector<16x32xf32>
    %c0_49 = arith.constant 0 : index
    %c0_50 = arith.constant 0 : index
    %138 = vector.load %arg14[%c0_49, %c0_50] : memref<1x32xf32, #tpu.memory_space<vmem>>, vector<1x32xf32>
    %139 = vector.shape_cast %138 : vector<1x32xf32> to vector<32xf32>
    %140 = vector.shape_cast %139 : vector<32xf32> to vector<1x32xf32>
    %141 = vector.broadcast %140 : vector<1x32xf32> to vector<16x32xf32>
    %142 = arith.addf %137, %141 : vector<16x32xf32>
    %143 = arith.addf %142, %83 : vector<16x32xf32>
    %144 = vector.shape_cast %143 : vector<16x32xf32> to vector<2x8x32xf32>
    %c0_51 = arith.constant 0 : index
    %c0_52 = arith.constant 0 : index
    %c0_53 = arith.constant 0 : index
    %145 = vector.load %arg15[%c0_51, %c0_52, %c0_53] : memref<2x8x32xf32, #tpu.memory_space<vmem>>, vector<2x8x32xf32>
    tpu.vector_store %arg15[%c0_51, %c0_52, %c0_53], %144 {strides = array<i32>} : memref<2x8x32xf32, #tpu.memory_space<vmem>>, vector<2x8x32xf32>,
    return
  }
  func.func @transform_0(%arg0: i32) -> (i32, i32, i32) {
    %c0_i32 = arith.constant 0 : i32
    %c0_i32_0 = arith.constant 0 : i32
    %c0_i32_1 = arith.constant 0 : i32
    return %arg0, %c0_i32, %c0_i32_0 : i32, i32, i32
  }
  func.func @transform_1(%arg0: i32) -> (i32, i32) {
    %c0_i32 = arith.constant 0 : i32
    %c0_i32_0 = arith.constant 0 : i32
    %c0_i32_1 = arith.constant 0 : i32
    return %c0_i32, %c0_i32_0 : i32, i32
  }
  func.func @transform_2(%arg0: i32) -> (i32, i32) {
    %c0_i32 = arith.constant 0 : i32
    %c0_i32_0 = arith.constant 0 : i32
    %c0_i32_1 = arith.constant 0 : i32
    return %c0_i32, %c0_i32_0 : i32, i32
  }
  func.func @transform_3(%arg0: i32) -> (i32, i32) {
    %c0_i32 = arith.constant 0 : i32
    %c0_i32_0 = arith.constant 0 : i32
    %c0_i32_1 = arith.constant 0 : i32
    return %c0_i32, %c0_i32_0 : i32, i32
  }
  func.func @transform_4(%arg0: i32) -> (i32, i32) {
    %c0_i32 = arith.constant 0 : i32
    %c0_i32_0 = arith.constant 0 : i32
    %c0_i32_1 = arith.constant 0 : i32
    return %c0_i32, %c0_i32_0 : i32, i32
  }
  func.func @transform_5(%arg0: i32) -> (i32, i32) {
    %c0_i32 = arith.constant 0 : i32
    %c0_i32_0 = arith.constant 0 : i32
    %c0_i32_1 = arith.constant 0 : i32
    return %c0_i32, %c0_i32_0 : i32, i32
  }
  func.func @transform_6(%arg0: i32) -> (i32, i32) {
    %c0_i32 = arith.constant 0 : i32
    %c0_i32_0 = arith.constant 0 : i32
    %c0_i32_1 = arith.constant 0 : i32
    return %c0_i32, %c0_i32_0 : i32, i32
  }
  func.func @transform_7(%arg0: i32) -> (i32, i32) {
    %c0_i32 = arith.constant 0 : i32
    %c0_i32_0 = arith.constant 0 : i32
    %c0_i32_1 = arith.constant 0 : i32
    return %c0_i32, %c0_i32_0 : i32, i32
  }
  func.func @transform_8(%arg0: i32) -> (i32, i32) {
    %c0_i32 = arith.constant 0 : i32
    %c0_i32_0 = arith.constant 0 : i32
    %c0_i32_1 = arith.constant 0 : i32
    return %c0_i32, %c0_i32_0 : i32, i32
  }
  func.func @transform_9(%arg0: i32) -> (i32, i32) {
    %c0_i32 = arith.constant 0 : i32
    %c0_i32_0 = arith.constant 0 : i32
    %c0_i32_1 = arith.constant 0 : i32
    return %c0_i32, %c0_i32_0 : i32, i32
  }
  func.func @transform_10(%arg0: i32) -> (i32, i32) {
    %c0_i32 = arith.constant 0 : i32
    %c0_i32_0 = arith.constant 0 : i32
    %c0_i32_1 = arith.constant 0 : i32
    return %c0_i32, %c0_i32_0 : i32, i32
  }
  func.func @transform_11(%arg0: i32) -> (i32, i32) {
    %c0_i32 = arith.constant 0 : i32
    %c0_i32_0 = arith.constant 0 : i32
    %c0_i32_1 = arith.constant 0 : i32
    return %c0_i32, %c0_i32_0 : i32, i32
  }
  func.func @transform_12(%arg0: i32) -> (i32, i32) {
    %c0_i32 = arith.constant 0 : i32
    %c0_i32_0 = arith.constant 0 : i32
    %c0_i32_1 = arith.constant 0 : i32
    return %c0_i32, %c0_i32_0 : i32, i32
  }
  func.func @transform_13(%arg0: i32) -> (i32, i32) {
    %c0_i32 = arith.constant 0 : i32
    %c0_i32_0 = arith.constant 0 : i32
    %c0_i32_1 = arith.constant 0 : i32
    return %c0_i32, %c0_i32_0 : i32, i32
  }
  func.func @transform_14(%arg0: i32) -> (i32, i32, i32) {
    %c0_i32 = arith.constant 0 : i32
    %c0_i32_0 = arith.constant 0 : i32
    %c0_i32_1 = arith.constant 0 : i32
    return %arg0, %c0_i32, %c0_i32_0 : i32, i32, i32
  }
}

</mosaic_0001>

<bundles_post_ra>
// kernel: tpu_custom_call.1
= control target key start
LH: loop header
LB: loop body
LE: loop exit
PB: predicated region body
PF: predicated region fallthrough
CT: control target
= control target key end

     0   :  { %19 = vsyncpa [#allocation3], 0  ;;  %s3708_s0 = inlined_call_operand.vmem [shape: f32[2,8,32], index: 0, kind: input, shape index: {}]   ;;  %s3709_s1 = inlined_call_operand.hbm [shape: f32[8,32], index: 1, kind: input, shape index: {}]   ;;  %s3710_s2 = inlined_call_operand.vmem [shape: f32[1,32], index: 2, kind: input, shape index: {}]   ;;  %s3711_s3 = inlined_call_operand.vmem [shape: f32[1,32], index: 3, kind: input, shape index: {}]   ;;  %s3712_s4 = inlined_call_operand.vmem [shape: bf16[32,96], index: 4, kind: input, shape index: {}]   ;;  %s3713_s5 = inlined_call_operand.hbm [shape: f32[1,96], index: 5, kind: input, shape index: {}]   ;;  %s3714_s6 = inlined_call_operand.vmem [shape: bf16[32,32], index: 6, kind: input, shape index: {}]   ;;  %s3715_s7 = inlined_call_operand.hbm [shape: f32[1,32], index: 7, kind: input, shape index: {}]   ;;  %s3716_s8 = inlined_call_operand.hbm [shape: f32[1,32], index: 8, kind: input, shape index: {}]   ;;  %s3717_s9 = inlined_call_operand.hbm [shape: f32[1,32], index: 9, kind: input, shape index: {}]   ;;  %s3718_s10 = inlined_call_operand.vmem [shape: bf16[32,64], index: 10, kind: input, shape index: {}]   ;;  %s3719_s11 = inlined_call_operand.vmem [shape: f32[1,64], index: 11, kind: input, shape index: {}]   ;;  %s3720_s12 = inlined_call_operand.vmem [shape: bf16[64,32], index: 12, kind: input, shape index: {}]   ;;  %s3721_s13 = inlined_call_operand.vmem [shape: f32[1,32], index: 13, kind: input, shape index: {}]   ;;  %s3722_s14 = inlined_call_operand.hbm [shape: f32[2,8,32], index: 14, kind: output, shape index: {}]  }
   0x1   :  { %20 = vsyncpa [#allocation6], 0 }
   0x2   :  { %21 = vsyncpa [#allocation9], 0 }
   0x3   :  { %22 = vsyncpa [#allocation4], 0  ;;  %s3048_s29 = smov [#allocation5]   ;;  %s3049_s15 = smov [#allocation8]  }
   0x4   :  { %s47_s30 = sshll.u32 %s3048_s29, 4  ;;  %s69_s16 = sshll.u32 %s3049_s15, 4  ;;  %s48_s30 = int_to_ptr.vmem [resolvable:$true] %s47_s30  ;;  %s70_s16 = int_to_ptr.vmem [resolvable:$true] %s69_s16 }
   0x5   :  { %s2908_s19 = scalar_lea.hbm %s3713_s5, 16 }
   0x6   :  { %p2909_p0 = scmp.ne.s32.totalorder %s3713_s5, %s2908_s19  ;;  %p2912_p1 = scmp.lt.u32.totalorder %s2908_s19, %s3713_s5 }
   0x8   :  { %p2914_p2 = pnand %p2912_p1, %p2909_p0 }
   0xa   :  { %2917 = shalt.err (!%p2914_p2)
}
   0xb   :  { %s2918_s24 = scalar_lea.vmem %s48_s30, 16  ;;  %s2922_s25 = scalar_lea.vmem %s48_s30, 32 }
   0xc   :  { %p2919_p3 = scmp.ne.s32.totalorder %s48_s30, %s2918_s24  ;;  %p2923_p4 = scmp.lt.s32.totalorder %s48_s30, %s48_s30 }
   0xd   :  { %p2924_p5 = scmp.lt.s32.totalorder %s2922_s25, %s2918_s24 }
   0xf   :  { %p2925_p6 = por %p2924_p5, %p2923_p4 }
  0x11   :  { %p2926_p7 = pnand %p2925_p6, %p2919_p3 }
  0x13   :  { %2929 = shalt.err (!%p2926_p7)
}
  0x14   :  { %50 = dma.hbm_to_vmem [thread:$0]  %s3713_s5, 16, %s48_s30, [#allocation6]  }
  0x15   :  { %s2930_s15 = scalar_lea.hbm %s3716_s8, 16 }
  0x16   :  { %p2931_p8 = scmp.ne.s32.totalorder %s3716_s8, %s2930_s15  ;;  %p2934_p9 = scmp.lt.u32.totalorder %s2930_s15, %s3716_s8 }
  0x18   :  { %p2936_p10 = pnand %p2934_p9, %p2931_p8 }
  0x1a   :  { %2939 = shalt.err (!%p2936_p10)
}
  0x1b   :  { %s2940_s21 = scalar_lea.vmem %s70_s16, 16  ;;  %s2944_s22 = scalar_lea.vmem %s70_s16, 32 }
  0x1c   :  { %p2941_p11 = scmp.ne.s32.totalorder %s70_s16, %s2940_s21  ;;  %p2945_p12 = scmp.lt.s32.totalorder %s70_s16, %s70_s16 }
  0x1d   :  { %p2946_p13 = scmp.lt.s32.totalorder %s2944_s22, %s2940_s21 }
  0x1f   :  { %p2947_p0 = por %p2946_p13, %p2945_p12 }
  0x21   :  { %p2948_p1 = pnand %p2947_p0, %p2941_p11 }
  0x23   :  { %2951 = shalt.err (!%p2948_p1)
}
  0x24   :  { %72 = dma.hbm_to_vmem [thread:$0]  %s3716_s8, 16, %s70_s16, [#allocation9]  }
  0x25   :  { %s3050_s23 = smov [#allocation2]   ;;  %s3051_s25 = smov [#allocation7]  }
  0x26   :  { %s31_s24 = sshll.u32 %s3050_s23, 4  ;;  %s59_s26 = sshll.u32 %s3051_s25, 4  ;;  %s32_s24 = int_to_ptr.vmem [resolvable:$true] %s31_s24  ;;  %s60_s26 = int_to_ptr.vmem [resolvable:$true] %s59_s26 }
  0x27   :  { %s2952_s29 = scalar_lea.hbm %s3709_s1, 128 }
  0x28   :  { %p2953_p2 = scmp.ne.s32.totalorder %s3709_s1, %s2952_s29  ;;  %p2956_p3 = scmp.lt.u32.totalorder %s2952_s29, %s3709_s1 }
  0x2a   :  { %p2958_p4 = pnand %p2956_p3, %p2953_p2 }
  0x2c   :  { %2961 = shalt.err (!%p2958_p4)
}
  0x2d   :  { %s2962_s8 = scalar_lea.vmem %s32_s24, 128  ;;  %p2967_p6 = scmp.lt.s32.totalorder %s32_s24, %s32_s24 }
  0x2e   :  { %p2963_p5 = scmp.ne.s32.totalorder %s32_s24, %s2962_s8  ;;  %p2968_p7 = scmp.lt.s32.totalorder %s2962_s8, %s2962_s8 }
  0x30   :  { %p2969_p8 = por %p2968_p7, %p2967_p6 }
  0x32   :  { %p2970_p9 = pnand %p2969_p8, %p2963_p5 }
  0x34   :  { %2973 = shalt.err (!%p2970_p9)
}
  0x35   :  { %34 = dma.hbm_to_vmem [thread:$0]  %s3709_s1, 128, %s32_s24, [#allocation3]  }
  0x36   :  { %s2974_s5 = scalar_lea.hbm %s3715_s7, 16 }
  0x37   :  { %p2975_p10 = scmp.ne.s32.totalorder %s3715_s7, %s2974_s5  ;;  %p2978_p11 = scmp.lt.u32.totalorder %s2974_s5, %s3715_s7 }
  0x39   :  { %p2980_p12 = pnand %p2978_p11, %p2975_p10 }
  0x3b   :  { %2983 = shalt.err (!%p2980_p12)
}
  0x3c   :  { %s2984_s28 = scalar_lea.vmem %s60_s26, 16  ;;  %s2988_s29 = scalar_lea.vmem %s60_s26, 32 }
  0x3d   :  { %p2985_p13 = scmp.ne.s32.totalorder %s60_s26, %s2984_s28  ;;  %p2989_p0 = scmp.lt.s32.totalorder %s60_s26, %s60_s26 }
  0x3e   :  { %p2990_p1 = scmp.lt.s32.totalorder %s2988_s29, %s2984_s28 }
  0x40   :  { %p2991_p2 = por %p2990_p1, %p2989_p0 }
  0x42   :  { %p2992_p3 = pnand %p2991_p2, %p2985_p13 }
  0x44   :  { %2995 = shalt.err (!%p2992_p3)
}
  0x45   :  { %62 = dma.hbm_to_vmem [thread:$0]  %s3715_s7, 16, %s60_s26, [#allocation6]  }
  0x46   :  { %s3052_s15 = smov [#allocation10]   ;;  %s2996_s8 = scalar_lea.hbm %s3717_s9, 16 }
  0x47   :  { %s79_s17 = sshll.u32 %s3052_s15, 4  ;;  %p2997_p4 = scmp.ne.s32.totalorder %s3717_s9, %s2996_s8  ;;  %s80_s17 = int_to_ptr.vmem [resolvable:$true] %s79_s17 }
  0x48   :  { %p3000_p5 = scmp.lt.u32.totalorder %s2996_s8, %s3717_s9 }
  0x4a   :  { %p3002_p6 = pnand %p3000_p5, %p2997_p4 }
  0x4c   :  { %3005 = shalt.err (!%p3002_p6)
}
  0x4d   :  { %s3006_s5 = scalar_lea.vmem %s80_s17, 16  ;;  %s3010_s7 = scalar_lea.vmem %s80_s17, 32 }
  0x4e   :  { %p3007_p7 = scmp.ne.s32.totalorder %s80_s17, %s3006_s5  ;;  %p3011_p8 = scmp.lt.s32.totalorder %s80_s17, %s80_s17 }
  0x4f   :  { %p3012_p9 = scmp.lt.s32.totalorder %s3010_s7, %s3006_s5 }
  0x51   :  { %p3013_p10 = por %p3012_p9, %p3011_p8 }
  0x53   :  { %p3014_p11 = pnand %p3013_p10, %p3007_p7 }
  0x55   :  { %3017 = shalt.err (!%p3014_p11)
}
  0x56   :  { %82 = dma.hbm_to_vmem [thread:$0]  %s3717_s9, 16, %s80_s17, [#allocation9]  }
  0x57   :  { %3040 = dma.done.wait [#allocation3], 128  }
  0x58   :  { %3041 = vsyncadd [#allocation3], 4294967168 }
  0x59   :  { %3042 = dma.done.wait [#allocation6], 32  }
  0x5a   :  { %3043 = vsyncadd [#allocation6], 4294967264 }
  0x5b   :  { %3044 = dma.done.wait [#allocation9], 32  }
  0x5c   :  { %3045 = vsyncadd [#allocation9], 4294967264  ;;  %v107_v0 = vld [vmem:[%s3708_s0] sm:$0xff]  ;;  %vm114_vm0 = vcmask 261120   ;;  %v108_v2 = vld [vmem:[%s3708_s0 + $0x8] sm:$0xff]  ;;  %v3053_v18 = vmov 0.0   ;;  %v251_v52 = vlaneseq }
  0x5d   :  { %v109_v1 = vld [vmem:[#allocation2] sm:$0xff]  ;;  %2688 = vmatprep.subr.bf16.mxu0 %v3053_v18  ;;  %2696 = vmatprep.subr.bf16.mxu1 %v3053_v18  ;;  %v2855_v19 = vld [vmem:[%s3712_s4 + $0x8] sm:$0xff]   ;;  %vm3054_vm1 = vmmov 0   ;;  %s3056_s18 = smov 120   ;;  %s3058_s19 = smov 96   ;;  %vm1134_vm2 = vcmask 64512  }
  0x5e   :  { %v3208_v3 = vadd.f32 %v109_v1, %v107_v0  ;;  %v3210_v4 = vadd.f32 %v109_v1, %v108_v2  ;;  %v2854_v17 = vld [vmem:[%s3712_s4] sm:$0xff]   ;;  %2692 = vmatprep.mubr.msk.bf16.mxu0 %vm3054_vm1, %v3053_v18  ;;  %2698 = vmatprep.mubr.msk.bf16.mxu1 %vm3054_vm1, %v3053_v18  ;;  %v2590_v37 = vld [vmem:[#allocation5] ss:$0 sm:$0xff]  ;;  %v3059_v50 = vmov 1983009808   ;;  %v252_v54 = vshrl.u32 %v251_v52, 7 }
  0x5f   :  { %2689 = vmatpush3.bf16.msra.mxu0 %v2854_v17  ;;  %v2588_v28 = vld [vmem:[%s3710_s2] ss:$0 sm:$0xff]  ;;  %s3055_s2 = smov 112   ;;  %v249_v51 = vunpack.c.l.s4 %v3059_v50  ;;  %v3060_v55 = vmov 1934713408   ;;  %s3061_s8 = smov 64  }
  0x60   :  { %v115_v5 = vsel %vm114_vm0, %v3208_v3, 0.0  ;;  %v118_v6 = vsel %vm114_vm0, %v3210_v4, 0.0  ;;  %2690 = vmatprep.subr.bf16.mxu0 %v3053_v18  ;;  %v2589_v32 = vld [vmem:[%s3711_s3] ss:$0 sm:$0xff]  ;;  %s3057_s3 = smov 104   ;;  %v281_v56 = vunpack.c.l.s4 %v3060_v55  ;;  %vm1610_vm3 = vcmask 1043456  }
  0x61   :  { %116 = vadd.xlane.f32.xlu0 %v115_v5  ;;  %v250_v53 = vunpack.c.0.s8 %v249_v51  ;;  %s3062_s5 = smov 16   ;;  %s3064_s7 = smov 24   ;;  %vm2274_vm4 = vcmask 130048   ;;  %vm2277_vm5 = vcmask 195584   ;;  %vm2520_vm6 = vcmask 523264  }
  0x62   :  { %v282_v62 = vunpack.c.0.s8 %v281_v56  ;;  %s3065_s17 = smov [#allocation11]  }
  0x63   :  { %2691 = vmatpush3.bf16.msra.mxu0 %v2855_v19  ;;  %v3277_v59 = vsub.s32 %v250_v53, %v252_v54 }
  0x64   :  { %2702 = vmatprep.subr.bf16.mxu0 %v3053_v18  ;;  %v3287_v5 = vsub.s32 %v282_v62, %v252_v54 }
  0x65   :  { %119 = vadd.xlane.f32.xlu0 %v118_v6 }
  0xee   :  { %v117_v7 = vpop.xlane.xlu0 %116 }
  0xef   :  { %v122_v8 = vmul.f32 0.03125, %v117_v7 }
  0xf1   :  { %v124_v9 = vsub.f32 %v3208_v3, %v122_v8 }
  0xf2   :  { %v120_v10 = vpop.xlane.xlu0 %119 }
  0xf3   :  { %v123_v11 = vmul.f32 0.03125, %v120_v10  ;;  %v126_v12 = vmul.f32 %v124_v9, %v124_v9 }
  0xf5   :  { %v125_v13 = vsub.f32 %v3210_v4, %v123_v11  ;;  %v128_v14 = vsel %vm114_vm0, %v126_v12, 0.0 }
  0xf6   :  { %129 = vadd.xlane.f32.xlu1 %v128_v14 }
  0xf7   :  { %v127_v15 = vmul.f32 %v125_v13, %v125_v13 }
  0xf9   :  { %v131_v16 = vsel %vm114_vm0, %v127_v15, 0.0 }
  0xfa   :  { %132 = vadd.xlane.f32.xlu1 %v131_v16 }
 0x183   :  { %v130_v20 = vpop.xlane.xlu1 %129 }
 0x184   :  { %v134_v21 = vmul.f32 0.03125, %v130_v20 }
 0x186   :  { %v136_v22 = vadd.f32 1e-06, %v134_v21 }
 0x187   :  { %v133_v23 = vpop.xlane.xlu1 %132 }
 0x188   :  { %2864 = vrsqrt.f32 %v136_v22  ;;  %v135_v24 = vmul.f32 0.03125, %v133_v23 }
 0x18a   :  { %v137_v25 = vadd.f32 1e-06, %v135_v24 }
 0x18c   :  { %2866 = vrsqrt.f32 %v137_v25 }
 0x192   :  { %v2865_v26 = vpop.eup %2864 }
 0x193   :  { %v140_v27 = vmul.f32 %v2865_v26, %v124_v9 }
 0x195   :  { %v148_v31 = vmul.f32 %v2588_v28, %v140_v27 }
 0x196   :  { %v2867_v29 = vpop.eup %2866 }
 0x197   :  { %v141_v30 = vmul.f32 %v2867_v29, %v125_v13  ;;  %v156_v34 = vadd.f32 %v2589_v32, %v148_v31 }
 0x199   :  { %v149_v33 = vmul.f32 %v2588_v28, %v141_v30 }
 0x19b   :  { %v157_v35 = vadd.f32 %v2589_v32, %v149_v33 }
 0x19d   :  { %v158_v36 = vpack.c.bf16 %v157_v35, %v156_v34 }
 0x19f   :  { %2693 = vmatmul.mubr.msk.bf16.vlgmr.msra.gmra.mrb[0].mxu0 %vm114_vm0, %v158_v36 }
 0x1a0   :  { %2704 = vmatprep.mubr.msk.bf16.mxu0 %vm3054_vm1, %v3053_v18 }
 0x272   :  { %v219_v38 = vpop.f32.mrb[0].mxu0 }
 0x273   :  { %v3243_v39 = vadd.f32 %v2590_v37, %v219_v38  ;;  %v2694_v40 = vpop.f32.mrb[1].mxu0 }
 0x274   :  { %v222_v41 = vpop.f32.mrb[2].mxu0 }
 0x275   :  { %234 = vrot.lane.b32.xlu1 %v3243_v39, %s3055_s2  ;;  %228 = vrot.lane.b32.xlu0 %v3243_v39, %s3056_s18  ;;  %v2695_v42 = vpop.f32.mrb[3].mxu0  ;;  %v3247_v43 = vadd.f32 %v2590_v37, %v222_v41 }
 0x279   :  { %240 = vrot.lane.b32.xlu1 %v3243_v39, %s3057_s3  ;;  %236 = vrot.lane.b32.xlu0 %v3247_v43, %s3055_s2  ;;  %s2574_s2 = sshll.u32 %s3065_s17, 4  ;;  %s2575_s2 = int_to_ptr.vmem [resolvable:$true] %s2574_s2 }
 0x27a   :  { %p3023_p13 = scmp.lt.s32.totalorder %s2575_s2, %s2575_s2 }
 0x27d   :  { %526 = vrot.lane.b32.xlu0 %v3243_v39, %s3058_s19  ;;  %230 = vrot.lane.b32.xlu1 %v3247_v43, %s3056_s18  ;;  %s3018_s18 = scalar_lea.vmem %s2575_s2, 256 }
 0x27e   :  { %p3019_p12 = scmp.ne.s32.totalorder %s2575_s2, %s3018_s18  ;;  %p3024_p0 = scmp.lt.s32.totalorder %s3018_s18, %s3018_s18 }
 0x280   :  { %p3025_p1 = por %p3024_p0, %p3023_p13 }
 0x281   :  { %242 = vrot.lane.b32.xlu1 %v3247_v43, %s3057_s3 }
 0x282   :  { %p3026_p2 = pnand %p3025_p1, %p3019_p12 }
 0x2e7   :  { %v3254_v44 = vpop.permute.xlu1 %234  ;;  %v3256_v45 = vpop.permute.xlu0 %228 }
 0x2e8   :  { %534 = vrot.lane.b32.xlu0 %v3254_v44, %s3058_s19  ;;  %530 = vrot.lane.b32.xlu1 %v3256_v45, %s3058_s19  ;;  %v246_v60 = vcombine.low %v3243_v39, %v3254_v44  ;;  %v247_v61 = vcombine.high %v3243_v39, %v3254_v44 }
 0x2ea   :  { %v254_v1 = vrot.slane %v246_v60, %v3277_v59  ;;  %v261_v2 = vrot.slane %v247_v61, %v3277_v59 }
 0x2eb   :  { %v3260_v46 = vpop.permute.xlu1 %240  ;;  %v3264_v47 = vpop.permute.xlu0 %236 }
 0x2ec   :  { %528 = vrot.lane.b32.xlu0 %v3247_v43, %s3058_s19  ;;  %538 = vrot.lane.b32.xlu1 %v3260_v46, %s3058_s19  ;;  %v262_v57 = vcombine.low %v3256_v45, %v3260_v46  ;;  %v263_v58 = vcombine.high %v3256_v45, %v3260_v46  ;;  %v314_v22 = vcombine.low %v3247_v43, %v3264_v47 }
 0x2ed   :  { %v315_v23 = vcombine.high %v3247_v43, %v3264_v47 }
 0x2ee   :  { %v270_v63 = vrot.slane %v262_v57, %v3277_v59  ;;  %v277_v0 = vrot.slane %v263_v58, %v3277_v59  ;;  %v322_v36 = vrot.slane %v314_v22, %v3277_v59 }
 0x2ef   :  { %v3266_v48 = vpop.permute.xlu1 %230  ;;  %v527_v10 = vpop.permute.xlu0 %526  ;;  %v3315_v37 = vrot.slane %v315_v23, %v3277_v59 }
 0x2f0   :  { %536 = vrot.lane.b32.xlu0 %v3264_v47, %s3058_s19  ;;  %532 = vrot.lane.b32.xlu1 %v3266_v48, %s3058_s19  ;;  %v278_v6 = vcombine.low %v254_v1, %v270_v63  ;;  %v279_v7 = vcombine.high %v254_v1, %v270_v63  ;;  %v294_v8 = vcombine.low %v261_v2, %v277_v0 }
 0x2f1   :  { %v295_v9 = vcombine.high %v261_v2, %v277_v0 }
 0x2f2   :  { %v286_v11 = vrot.slane %v278_v6, %v3287_v5  ;;  %v293_v12 = vrot.slane %v279_v7, %v3287_v5  ;;  %v302_v13 = vrot.slane %v294_v8, %v3287_v5 }
 0x2f3   :  { %v3270_v49 = vpop.permute.xlu1 %242  ;;  %v309_v14 = vrot.slane %v295_v9, %v3287_v5 }
 0x2f4   :  { %540 = vrot.lane.b32.xlu1 %v3270_v49, %s3058_s19  ;;  %v382_v17 = vcombine.low %v286_v11, %v293_v12  ;;  %v2594_v19 = vcombine.high %v286_v11, %v293_v12  ;;  %v330_v24 = vcombine.low %v3266_v48, %v3270_v49  ;;  %v331_v25 = vcombine.high %v3266_v48, %v3270_v49 }
 0x2f5   :  { %v398_v20 = vcombine.low %v302_v13, %v309_v14  ;;  %v2595_v21 = vcombine.high %v302_v13, %v309_v14 }
 0x2f6   :  { %v3302_v30 = vrot.slane %v382_v17, %v3277_v59  ;;  %v3305_v31 = vrot.slane %v2594_v19, %v3277_v59  ;;  %v338_v38 = vrot.slane %v330_v24, %v3277_v59  ;;  %v3319_v40 = vrot.slane %v331_v25, %v3277_v59 }
 0x2f7   :  { %v3308_v32 = vrot.slane %v398_v20, %v3277_v59  ;;  %v3311_v33 = vrot.slane %v2595_v21, %v3277_v59 }
 0x2f8   :  { %v414_v53 = vcombine.low %v3302_v30, %v3305_v31  ;;  %v415_v54 = vcombine.high %v3302_v30, %v3305_v31  ;;  %v346_v63 = vcombine.low %v322_v36, %v338_v38  ;;  %v347_v0 = vcombine.high %v322_v36, %v338_v38 }
 0x2f9   :  { %v430_v55 = vcombine.low %v3308_v32, %v3311_v33  ;;  %v431_v56 = vcombine.high %v3308_v32, %v3311_v33  ;;  %v362_v1 = vcombine.low %v3315_v37, %v3319_v40  ;;  %v363_v2 = vcombine.high %v3315_v37, %v3319_v40 }
 0x2fa   :  { %v422_v13 = vrot.slane %v414_v53, %v3287_v5  ;;  %v3344_v20 = vrot.slane %v346_v63, %v3287_v5  ;;  %v3347_v21 = vrot.slane %v347_v0, %v3287_v5 }
 0x2fb   :  { %v438_v14 = vrot.slane %v430_v55, %v3287_v5  ;;  %v370_v63 = vrot.slane %v362_v1, %v3287_v5  ;;  %v377_v0 = vrot.slane %v363_v2, %v3287_v5 }
 0x35a   :  { %v535_v15 = vpop.permute.xlu0 %534  ;;  %v531_v16 = vpop.permute.xlu1 %530 }
 0x35b   :  { %v550_v26 = vcombine.low %v527_v10, %v535_v15  ;;  %v551_v27 = vcombine.high %v527_v10, %v535_v15 }
 0x35d   :  { %v558_v41 = vrot.slane %v550_v26, %v3277_v59  ;;  %v565_v42 = vrot.slane %v551_v27, %v3277_v59 }
 0x35e   :  { %v529_v28 = vpop.permute.xlu0 %528  ;;  %v539_v29 = vpop.permute.xlu1 %538 }
 0x35f   :  { %v566_v34 = vcombine.low %v531_v16, %v539_v29  ;;  %v567_v35 = vcombine.high %v531_v16, %v539_v29 }
 0x361   :  { %v574_v50 = vrot.slane %v566_v34, %v3277_v59  ;;  %v581_v51 = vrot.slane %v567_v35, %v3277_v59 }
 0x362   :  { %v533_v52 = vpop.permute.xlu1 %532  ;;  %v537_v62 = vpop.permute.xlu0 %536 }
 0x363   :  { %v582_v57 = vcombine.low %v558_v41, %v574_v50  ;;  %v583_v58 = vcombine.high %v558_v41, %v574_v50  ;;  %v598_v60 = vcombine.low %v565_v42, %v581_v51  ;;  %v599_v61 = vcombine.high %v565_v42, %v581_v51 }
 0x364   :  { %v618_v10 = vcombine.low %v529_v28, %v537_v62  ;;  %v619_v11 = vcombine.high %v529_v28, %v537_v62 }
 0x365   :  { %v590_v6 = vrot.slane %v582_v57, %v3287_v5  ;;  %v597_v7 = vrot.slane %v583_v58, %v3287_v5  ;;  %v606_v8 = vrot.slane %v598_v60, %v3287_v5  ;;  %v613_v9 = vrot.slane %v599_v61, %v3287_v5 }
 0x366   :  { %v541_v12 = vpop.permute.xlu1 %540  ;;  %v626_v28 = vrot.slane %v618_v10, %v3277_v59  ;;  %v633_v29 = vrot.slane %v619_v11, %v3277_v59 }
 0x367   :  { %v686_v15 = vcombine.low %v590_v6, %v597_v7  ;;  %v2598_v16 = vcombine.high %v590_v6, %v597_v7  ;;  %v702_v17 = vcombine.low %v606_v8, %v613_v9  ;;  %v2599_v19 = vcombine.high %v606_v8, %v613_v9 }
 0x368   :  { %v634_v22 = vcombine.low %v533_v52, %v541_v12  ;;  %v635_v23 = vcombine.high %v533_v52, %v541_v12 }
 0x369   :  { %v693_v24 = vrot.slane %v686_v15, %v3277_v59  ;;  %v701_v25 = vrot.slane %v2598_v16, %v3277_v59  ;;  %v709_v26 = vrot.slane %v702_v17, %v3277_v59  ;;  %v717_v27 = vrot.slane %v2599_v19, %v3277_v59 }
 0x36a   :  { %v642_v34 = vrot.slane %v634_v22, %v3277_v59  ;;  %v649_v35 = vrot.slane %v635_v23, %v3277_v59  ;;  %v446_v16 = vcombine.low %v422_v13, %v438_v14 }
 0x36b   :  { %v718_v36 = vcombine.low %v693_v24, %v701_v25  ;;  %v734_v37 = vcombine.low %v709_v26, %v717_v27  ;;  %v719_v38 = vcombine.high %v693_v24, %v701_v25  ;;  %v735_v40 = vcombine.high %v709_v26, %v717_v27 }
 0x36c   :  { %v650_v41 = vcombine.low %v626_v28, %v642_v34  ;;  %v651_v42 = vcombine.high %v626_v28, %v642_v34  ;;  %v666_v50 = vcombine.low %v633_v29, %v649_v35  ;;  %v667_v51 = vcombine.high %v633_v29, %v649_v35 }
 0x36d   :  { %v726_v52 = vrot.slane %v718_v36, %v3287_v5  ;;  %v742_v53 = vrot.slane %v734_v37, %v3287_v5  ;;  %v733_v55 = vrot.slane %v719_v38, %v3287_v5  ;;  %v749_v57 = vrot.slane %v735_v40, %v3287_v5 }
 0x36e   :  { %v658_v58 = vrot.slane %v650_v41, %v3287_v5  ;;  %v665_v60 = vrot.slane %v651_v42, %v3287_v5  ;;  %v674_v61 = vrot.slane %v666_v50, %v3287_v5  ;;  %v681_v62 = vrot.slane %v667_v51, %v3287_v5 }
 0x36f   :  { %v750_v6 = vcombine.low %v726_v52, %v742_v53  ;;  %v751_v7 = vcombine.high %v726_v52, %v742_v53  ;;  %v752_v17 = vcombine.low %v733_v55, %v749_v57  ;;  %v447_v25 = vcombine.high %v422_v13, %v438_v14 }
 0x370   :  { %v754_v8 = vcombine.low %v658_v58, %v665_v60  ;;  %v2600_v9 = vcombine.high %v658_v58, %v665_v60  ;;  %v770_v10 = vcombine.low %v674_v61, %v681_v62  ;;  %v2601_v11 = vcombine.high %v674_v61, %v681_v62 }
 0x371   :  { %v822_v12 = vpack.c.bf16 %v750_v6, %v750_v6  ;;  %v823_v15 = vpack.c.bf16 %v751_v7, %v751_v7  ;;  %v753_v26 = vcombine.high %v733_v55, %v749_v57  ;;  %v450_v27 = vcombine.low %v3344_v20, %v3347_v21 }
 0x372   :  { %v761_v19 = vrot.slane %v754_v8, %v3277_v59  ;;  %v769_v22 = vrot.slane %v2600_v9, %v3277_v59  ;;  %v777_v23 = vrot.slane %v770_v10, %v3277_v59  ;;  %v785_v1 = vrot.slane %v2601_v11, %v3277_v59 }
 0x373   :  { %v1139_v2 = vsel %vm1134_vm2, %v822_v12, 0  ;;  %v1185_v24 = vsel %vm1134_vm2, %v823_v15, 0  ;;  %v2596_v34 = vcombine.high %v3344_v20, %v3347_v21  ;;  %v466_v35 = vcombine.low %v370_v63, %v377_v0 }
 0x374   :  { %2697 = vmatpush3.bf16.xpose.msra.mxu1 %v1139_v2  ;;  %2703 = vmatpush3.bf16.xpose.msra.mxu0 %v1185_v24  ;;  %v786_v28 = vcombine.low %v761_v19, %v769_v22  ;;  %v802_v29 = vcombine.low %v777_v23, %v785_v1  ;;  %v2597_v36 = vcombine.high %v370_v63, %v377_v0 }
 0x375   :  { %2708 = vmatprep.subr.bf16.mxu1 %v3053_v18  ;;  %2714 = vmatprep.subr.bf16.mxu0 %v3053_v18  ;;  %v824_v37 = vpack.c.bf16 %v752_v17, %v752_v17  ;;  %v825_v38 = vpack.c.bf16 %v753_v26, %v753_v26  ;;  %v518_v40 = vpack.c.bf16 %v446_v16, %v446_v16 }
 0x376   :  { %v794_v13 = vrot.slane %v786_v28, %v3287_v5  ;;  %v810_v14 = vrot.slane %v802_v29, %v3287_v5  ;;  %v519_v41 = vpack.c.bf16 %v447_v25, %v447_v25  ;;  %v429_v42 = vrot.slane %v415_v54, %v3287_v5 }
 0x377   :  { %v445_v20 = vrot.slane %v431_v56, %v3287_v5  ;;  %v457_v21 = vrot.slane %v450_v27, %v3277_v59  ;;  %v465_v50 = vrot.slane %v2596_v34, %v3277_v59  ;;  %v473_v51 = vrot.slane %v466_v35, %v3277_v59 }
 0x378   :  { %v481_v52 = vrot.slane %v2597_v36, %v3277_v59  ;;  %v1231_v53 = vsel %vm1134_vm2, %v824_v37, 0  ;;  %v787_v55 = vcombine.high %v761_v19, %v769_v22  ;;  %v1277_v30 = vsel %vm1134_vm2, %v825_v38, 0 }
 0x379   :  { %v818_v31 = vcombine.low %v794_v13, %v810_v14  ;;  %v819_v32 = vcombine.high %v794_v13, %v810_v14  ;;  %v803_v33 = vcombine.high %v777_v23, %v785_v1  ;;  %v448_v54 = vcombine.low %v429_v42, %v445_v20 }
 0x37a   :  { %v449_v56 = vcombine.high %v429_v42, %v445_v20  ;;  %v482_v57 = vcombine.low %v457_v21, %v465_v50  ;;  %v498_v58 = vcombine.low %v473_v51, %v481_v52  ;;  %v801_v62 = vrot.slane %v787_v55, %v3287_v5 }
 0x37b   :  { %2699 = vmatmul.mubr.msk.bf16.vlgmr.msra.gmra.mrb[0].mxu1 %vm1134_vm2, %v518_v40  ;;  %2705 = vmatmul.mubr.msk.bf16.vlgmr.msra.gmra.mrb[4].mxu0 %vm1134_vm2, %v519_v41  ;;  %v826_v60 = vpack.c.bf16 %v818_v31, %v818_v31  ;;  %v827_v61 = vpack.c.bf16 %v819_v32, %v819_v32  ;;  %v817_v63 = vrot.slane %v803_v33, %v3287_v5 }
 0x37c   :  { %2709 = vmatpush3.bf16.xpose.msra.mxu1 %v1231_v53  ;;  %2715 = vmatpush3.bf16.xpose.msra.mxu0 %v1277_v30  ;;  %v520_v0 = vpack.c.bf16 %v448_v54, %v448_v54  ;;  %v521_v6 = vpack.c.bf16 %v449_v56, %v449_v56  ;;  %v490_v7 = vrot.slane %v482_v57, %v3287_v5 }
 0x37d   :  { %2710 = vmatprep.mubr.msk.bf16.mxu1 %vm3054_vm1, %v3053_v18  ;;  %2716 = vmatprep.mubr.msk.bf16.mxu0 %vm3054_vm1, %v3053_v18  ;;  %v506_v8 = vrot.slane %v498_v58, %v3287_v5  ;;  %v1323_v9 = vsel %vm1134_vm2, %v826_v60, 0  ;;  %v1369_v10 = vsel %vm1134_vm2, %v827_v61, 0  ;;  %v820_v11 = vcombine.low %v801_v62, %v817_v63 }
 0x37e   :  { %2720 = vmatprep.subr.bf16.mxu1 %v3053_v18  ;;  %2726 = vmatprep.subr.bf16.mxu0 %v3053_v18  ;;  %v821_v12 = vcombine.high %v801_v62, %v817_v63  ;;  %v483_v15 = vcombine.high %v457_v21, %v465_v50  ;;  %v499_v19 = vcombine.high %v473_v51, %v481_v52 }
 0x37f   :  { %v514_v16 = vcombine.low %v490_v7, %v506_v8  ;;  %v515_v17 = vcombine.high %v490_v7, %v506_v8  ;;  %v828_v22 = vpack.c.bf16 %v820_v11, %v820_v11 }
 0x380   :  { %v829_v23 = vpack.c.bf16 %v821_v12, %v821_v12  ;;  %v497_v24 = vrot.slane %v483_v15, %v3287_v5  ;;  %v513_v25 = vrot.slane %v499_v19, %v3287_v5 }
 0x381   :  { %v522_v1 = vpack.c.bf16 %v514_v16, %v514_v16  ;;  %v523_v2 = vpack.c.bf16 %v515_v17, %v515_v17  ;;  %v1415_v26 = vsel %vm1134_vm2, %v828_v22, 0 }
 0x382   :  { %v1461_v27 = vsel %vm1134_vm2, %v829_v23, 0  ;;  %v516_v28 = vcombine.low %v497_v24, %v513_v25  ;;  %v517_v29 = vcombine.high %v497_v24, %v513_v25 }
 0x383   :  { %2711 = vmatmul.mubr.msk.bf16.vlgmr.msra.gmra.mrb[4].mxu1 %vm1134_vm2, %v520_v0  ;;  %2717 = vmatmul.mubr.msk.bf16.vlgmr.msra.gmra.mrb[8].mxu0 %vm1134_vm2, %v521_v6 }
 0x384   :  { %2721 = vmatpush3.bf16.xpose.msra.mxu1 %v1323_v9  ;;  %2727 = vmatpush3.bf16.xpose.msra.mxu0 %v1369_v10  ;;  %v524_v34 = vpack.c.bf16 %v516_v28, %v516_v28  ;;  %v525_v35 = vpack.c.bf16 %v517_v29, %v517_v29 }
 0x385   :  { %2722 = vmatprep.mubr.msk.bf16.mxu1 %vm3054_vm1, %v3053_v18  ;;  %2728 = vmatprep.mubr.msk.bf16.mxu0 %vm3054_vm1, %v3053_v18 }
 0x386   :  { %2732 = vmatprep.subr.bf16.mxu1 %v3053_v18  ;;  %2738 = vmatprep.subr.bf16.mxu0 %v3053_v18 }
 0x38b   :  { %2723 = vmatmul.mubr.msk.bf16.vlgmr.msra.gmra.mrb[8].mxu1 %vm1134_vm2, %v522_v1  ;;  %2729 = vmatmul.mubr.msk.bf16.vlgmr.msra.gmra.mrb[12].mxu0 %vm1134_vm2, %v523_v2 }
 0x38c   :  { %2733 = vmatpush3.bf16.xpose.msra.mxu1 %v1415_v26  ;;  %2739 = vmatpush3.bf16.xpose.msra.mxu0 %v1461_v27 }
 0x38d   :  { %2734 = vmatprep.mubr.msk.bf16.mxu1 %vm3054_vm1, %v3053_v18  ;;  %2740 = vmatprep.mubr.msk.bf16.mxu0 %vm3054_vm1, %v3053_v18 }
 0x38e   :  { %2744 = vmatprep.subr.bf16.mxu1 %v3053_v18  ;;  %2750 = vmatprep.subr.bf16.mxu0 %v3053_v18 }
 0x393   :  { %2735 = vmatmul.mubr.msk.bf16.vlgmr.msra.gmra.mrb[12].mxu1 %vm1134_vm2, %v524_v34  ;;  %2741 = vmatmul.mubr.msk.bf16.vlgmr.msra.gmra.mrb[16].mxu0 %vm1134_vm2, %v525_v35 }
 0x394   :  { %2746 = vmatprep.mubr.msk.bf16.mxu1 %vm3054_vm1, %v3053_v18  ;;  %2752 = vmatprep.mubr.msk.bf16.mxu0 %vm3054_vm1, %v3053_v18 }
 0x44e   :  { %v1175_v36 = vpop.f32.mrb[0].mxu1  ;;  %v1221_v37 = vpop.f32.mrb[4].mxu0 }
 0x44f   :  { %v3435_v38 = vmul.f32 0.35355338, %v1175_v36  ;;  %v3437_v13 = vmul.f32 0.35355338, %v1221_v37  ;;  %v2700_v14 = vpop.f32.mrb[1].mxu1  ;;  %v2706_v40 = vpop.f32.mrb[5].mxu0 }
 0x450   :  { %v1178_v41 = vpop.f32.mrb[2].mxu1  ;;  %v1224_v42 = vpop.f32.mrb[6].mxu0 }
 0x451   :  { %v2701_v20 = vpop.f32.mrb[3].mxu1  ;;  %v2707_v21 = vpop.f32.mrb[7].mxu0  ;;  %v1511_v50 = vsel %vm1134_vm2, %v3435_v38, -inf  ;;  %v1514_v51 = vsel %vm1134_vm2, %v3437_v13, -inf }
 0x452   :  { %1512 = vmax.xlane.f32.xlu0 %v1511_v50  ;;  %1515 = vmax.xlane.f32.xlu1 %v1514_v51 }
 0x456   :  { %v1267_v52 = vpop.f32.mrb[4].mxu1  ;;  %v1313_v53 = vpop.f32.mrb[8].mxu0 }
 0x457   :  { %v1505_v55 = vmul.f32 0.35355338, %v1267_v52  ;;  %v2712_v30 = vpop.f32.mrb[5].mxu1  ;;  %v2718_v31 = vpop.f32.mrb[9].mxu0  ;;  %v1506_v54 = vmul.f32 0.35355338, %v1313_v53 }
 0x458   :  { %v1270_v32 = vpop.f32.mrb[6].mxu1  ;;  %v1316_v33 = vpop.f32.mrb[10].mxu0 }
 0x459   :  { %v2713_v56 = vpop.f32.mrb[7].mxu1  ;;  %v2719_v57 = vpop.f32.mrb[11].mxu0  ;;  %v1517_v58 = vsel %vm1134_vm2, %v1505_v55, -inf  ;;  %v1520_v60 = vsel %vm1134_vm2, %v1506_v54, -inf }
 0x45a   :  { %1518 = vmax.xlane.f32.xlu0 %v1517_v58 }
 0x45e   :  { %v1359_v61 = vpop.f32.mrb[8].mxu1  ;;  %1521 = vmax.xlane.f32.xlu0 %v1520_v60  ;;  %v1405_v62 = vpop.f32.mrb[12].mxu0 }
 0x45f   :  { %v1507_v63 = vmul.f32 0.35355338, %v1359_v61  ;;  %v1508_v0 = vmul.f32 0.35355338, %v1405_v62  ;;  %v2724_v6 = vpop.f32.mrb[9].mxu1  ;;  %v2730_v7 = vpop.f32.mrb[13].mxu0 }
 0x460   :  { %v1362_v8 = vpop.f32.mrb[10].mxu1  ;;  %v1408_v9 = vpop.f32.mrb[14].mxu0 }
 0x461   :  { %v2725_v10 = vpop.f32.mrb[11].mxu1  ;;  %v2731_v11 = vpop.f32.mrb[15].mxu0  ;;  %v1523_v12 = vsel %vm1134_vm2, %v1507_v63, -inf  ;;  %v1526_v15 = vsel %vm1134_vm2, %v1508_v0, -inf }
 0x462   :  { %1524 = vmax.xlane.f32.xlu0 %v1523_v12  ;;  %1527 = vmax.xlane.f32.xlu1 %v1526_v15 }
 0x466   :  { %v1451_v16 = vpop.f32.mrb[12].mxu1  ;;  %v1497_v17 = vpop.f32.mrb[16].mxu0 }
 0x467   :  { %v3447_v19 = vmul.f32 0.35355338, %v1451_v16  ;;  %v2736_v22 = vpop.f32.mrb[13].mxu1  ;;  %v2742_v23 = vpop.f32.mrb[17].mxu0  ;;  %v1510_v27 = vmul.f32 0.35355338, %v1497_v17 }
 0x468   :  { %v1454_v1 = vpop.f32.mrb[14].mxu1  ;;  %v1500_v2 = vpop.f32.mrb[18].mxu0 }
 0x469   :  { %v2737_v24 = vpop.f32.mrb[15].mxu1  ;;  %v2743_v25 = vpop.f32.mrb[19].mxu0  ;;  %v1529_v26 = vsel %vm1134_vm2, %v3447_v19, -inf  ;;  %v1532_v28 = vsel %vm1134_vm2, %v1510_v27, -inf }
 0x46a   :  { %1530 = vmax.xlane.f32.xlu0 %v1529_v26 }
 0x473   :  { %834 = vrot.lane.b32.xlu1 %v3256_v45, %s3061_s8 }
 0x477   :  { %838 = vrot.lane.b32.xlu1 %v3254_v44, %s3061_s8 }
 0x480   :  { %830 = vrot.lane.b32.xlu0 %v3243_v39, %s3061_s8 }
 0x49b   :  { %1533 = vmax.xlane.f32.xlu1 %v1532_v28 }
 0x4ac   :  { %842 = vrot.lane.b32.xlu1 %v3260_v46, %s3061_s8 }
 0x4df   :  { %v1513_v29 = vpop.xlane.xlu0 %1512  ;;  %v1516_v34 = vpop.xlane.xlu1 %1515 }
 0x4e0   :  { %v1535_v35 = vsub.f32 %v3435_v38, %v1513_v29  ;;  %v1536_v36 = vsub.f32 %v3437_v13, %v1516_v34 }
 0x4e2   :  { %v1543_v45 = vmul.f32 1.442695, %v1535_v35  ;;  %v1545_v37 = vmul.f32 1.442695, %v1536_v36 }
 0x4e4   :  { %2868 = vpow2.f32 %v1543_v45 }
 0x4e5   :  { %2870 = vpow2.f32 %v1545_v37 }
 0x4e7   :  { %v1519_v44 = vpop.xlane.xlu0 %1518 }
 0x4e8   :  { %v1537_v14 = vsub.f32 %v1505_v55, %v1519_v44 }
 0x4ea   :  { %v1547_v39 = vmul.f32 1.442695, %v1537_v14 }
 0x4eb   :  { %v1522_v40 = vpop.xlane.xlu0 %1521 }
 0x4ec   :  { %2872 = vpow2.f32 %v1547_v39  ;;  %v1538_v41 = vsub.f32 %v1506_v54, %v1522_v40 }
 0x4ee   :  { %v3462_v42 = vpop.eup %2868  ;;  %v1549_v20 = vmul.f32 1.442695, %v1538_v41 }
 0x4ef   :  { %v3464_v46 = vpop.eup %2870  ;;  %v1525_v21 = vpop.xlane.xlu0 %1524  ;;  %v1559_v38 = vsel %vm1134_vm2, %v3462_v42, 0.0 }
 0x4f0   :  { %v1528_v50 = vpop.xlane.xlu1 %1527  ;;  %2874 = vpow2.f32 %v1549_v20  ;;  %v1539_v13 = vsub.f32 %v1507_v63, %v1525_v21  ;;  %1560 = vadd.xlane.f32.xlu0 %v1559_v38  ;;  %v1562_v52 = vsel %vm1134_vm2, %v3464_v46, 0.0 }
 0x4f1   :  { %v1540_v51 = vsub.f32 %v1508_v0, %v1528_v50  ;;  %1563 = vadd.xlane.f32.xlu1 %v1562_v52 }
 0x4f2   :  { %v1551_v53 = vmul.f32 1.442695, %v1539_v13 }
 0x4f3   :  { %v1553_v55 = vmul.f32 1.442695, %v1540_v51 }
 0x4f4   :  { %2876 = vpow2.f32 %v1551_v53  ;;  %v835_v60 = vpop.permute.xlu1 %834 }
 0x4f5   :  { %2878 = vpow2.f32 %v1553_v55 }
 0x4f6   :  { %v3470_v30 = vpop.eup %2872 }
 0x4f7   :  { %v1565_v31 = vsel %vm1134_vm2, %v3470_v30, 0.0  ;;  %v1531_v61 = vpop.xlane.xlu0 %1530 }
 0x4f8   :  { %1566 = vadd.xlane.f32.xlu0 %v1565_v31  ;;  %v1541_v62 = vsub.f32 %v3447_v19, %v1531_v61  ;;  %v839_v63 = vpop.permute.xlu1 %838 }
 0x4fa   :  { %v3474_v32 = vpop.eup %2874  ;;  %v1555_v0 = vmul.f32 1.442695, %v1541_v62 }
 0x4fb   :  { %v1568_v33 = vsel %vm1134_vm2, %v3474_v32, 0.0  ;;  %v831_v6 = vpop.permute.xlu0 %830 }
 0x4fc   :  { %1569 = vadd.xlane.f32.xlu1 %v1568_v33  ;;  %2880 = vpow2.f32 %v1555_v0  ;;  %v855_v9 = vcombine.high %v831_v6, %v839_v63 }
 0x4fe   :  { %v3478_v54 = vpop.eup %2876 }
 0x4ff   :  { %v1571_v56 = vsel %vm1134_vm2, %v3478_v54, 0.0  ;;  %v3482_v57 = vpop.eup %2878 }
 0x500   :  { %1572 = vadd.xlane.f32.xlu0 %v1571_v56  ;;  %v1574_v58 = vsel %vm1134_vm2, %v3482_v57, 0.0 }
 0x504   :  { %1575 = vadd.xlane.f32.xlu0 %v1574_v58 }
 0x506   :  { %v3503_v26 = vpop.eup %2880 }
 0x507   :  { %v1577_v14 = vsel %vm1134_vm2, %v3503_v26, 0.0 }
 0x50d   :  { %836 = vrot.lane.b32.xlu1 %v3266_v48, %s3061_s8  ;;  %v854_v48 = vcombine.low %v831_v6, %v839_v63 }
 0x50f   :  { %v862_v12 = vrot.slane %v854_v48, %v3277_v59 }
 0x511   :  { %840 = vrot.lane.b32.xlu1 %v3264_v47, %s3061_s8 }
 0x515   :  { %844 = vrot.lane.b32.xlu1 %v3270_v49, %s3061_s8 }
 0x51a   :  { %832 = vrot.lane.b32.xlu0 %v3247_v43, %s3061_s8  ;;  %v869_v43 = vrot.slane %v855_v9, %v3277_v59 }
 0x528   :  { %v1534_v7 = vpop.xlane.xlu1 %1533 }
 0x529   :  { %v1542_v8 = vsub.f32 %v1510_v27, %v1534_v7 }
 0x52b   :  { %v1557_v10 = vmul.f32 1.442695, %v1542_v8 }
 0x52c   :  { %v843_v47 = vpop.permute.xlu1 %842 }
 0x52d   :  { %2882 = vpow2.f32 %v1557_v10  ;;  %v870_v11 = vcombine.low %v835_v60, %v843_v47  ;;  %v871_v49 = vcombine.high %v835_v60, %v843_v47 }
 0x52f   :  { %v878_v15 = vrot.slane %v870_v11, %v3277_v59  ;;  %v885_v16 = vrot.slane %v871_v49, %v3277_v59 }
 0x531   :  { %v886_v17 = vcombine.low %v862_v12, %v878_v15  ;;  %v887_v19 = vcombine.high %v862_v12, %v878_v15  ;;  %v902_v22 = vcombine.low %v869_v43, %v885_v16  ;;  %v903_v23 = vcombine.high %v869_v43, %v885_v16 }
 0x533   :  { %v894_v1 = vrot.slane %v886_v17, %v3287_v5  ;;  %v901_v2 = vrot.slane %v887_v19, %v3287_v5  ;;  %v910_v24 = vrot.slane %v902_v22, %v3287_v5  ;;  %v917_v25 = vrot.slane %v903_v23, %v3287_v5 }
 0x535   :  { %v990_v27 = vcombine.low %v894_v1, %v901_v2  ;;  %v2602_v28 = vcombine.high %v894_v1, %v901_v2  ;;  %v1006_v29 = vcombine.low %v910_v24, %v917_v25  ;;  %v2603_v34 = vcombine.high %v910_v24, %v917_v25 }
 0x537   :  { %v3505_v35 = vpop.eup %2882  ;;  %v997_v36 = vrot.slane %v990_v27, %v3277_v59  ;;  %v1005_v45 = vrot.slane %v2602_v28, %v3277_v59  ;;  %v1013_v37 = vrot.slane %v1006_v29, %v3277_v59  ;;  %v1021_v44 = vrot.slane %v2603_v34, %v3277_v59 }
 0x538   :  { %v1580_v39 = vsel %vm1134_vm2, %v3505_v35, 0.0 }
 0x539   :  { %1578 = vadd.xlane.f32.xlu0 %v1577_v14  ;;  %1581 = vadd.xlane.f32.xlu1 %v1580_v39  ;;  %v1022_v40 = vcombine.low %v997_v36, %v1005_v45  ;;  %v1038_v41 = vcombine.low %v1013_v37, %v1021_v44  ;;  %v1023_v20 = vcombine.high %v997_v36, %v1005_v45 }
 0x53a   :  { %v1039_v21 = vcombine.high %v1013_v37, %v1021_v44 }
 0x53b   :  { %v1030_v50 = vrot.slane %v1022_v40, %v3287_v5  ;;  %v1046_v38 = vrot.slane %v1038_v41, %v3287_v5  ;;  %v1037_v13 = vrot.slane %v1023_v20, %v3287_v5 }
 0x53c   :  { %v1053_v51 = vrot.slane %v1039_v21, %v3287_v5 }
 0x53d   :  { %v1054_v52 = vcombine.low %v1030_v50, %v1046_v38  ;;  %v1055_v53 = vcombine.high %v1030_v50, %v1046_v38 }
 0x53e   :  { %v1056_v55 = vcombine.low %v1037_v13, %v1053_v51  ;;  %v1057_v31 = vcombine.high %v1037_v13, %v1053_v51 }
 0x53f   :  { %v1126_v33 = vpack.c.bf16 %v1054_v52, %v1054_v52  ;;  %v1127_v56 = vpack.c.bf16 %v1055_v53, %v1055_v53 }
 0x540   :  { %v1128_v48 = vpack.c.bf16 %v1056_v55, %v1056_v55  ;;  %v1129_v10 = vpack.c.bf16 %v1057_v31, %v1057_v31 }
 0x541   :  { %v1612_v58 = vsel %vm1610_vm3, %v1126_v33, 0  ;;  %v1658_v60 = vsel %vm1610_vm3, %v1127_v56, 0 }
 0x542   :  { %2745 = vmatpush3.bf16.msra.mxu1 %v1612_v58  ;;  %2751 = vmatpush3.bf16.msra.mxu0 %v1658_v60  ;;  %v1704_v12 = vsel %vm1610_vm3, %v1128_v48, 0  ;;  %v1750_v15 = vsel %vm1610_vm3, %v1129_v10, 0 }
 0x543   :  { %2756 = vmatprep.subr.bf16.mxu1 %v3053_v18  ;;  %2762 = vmatprep.subr.bf16.mxu0 %v3053_v18 }
 0x57d   :  { %v1561_v61 = vpop.xlane.xlu0 %1560 }
 0x57e   :  { %2884 = vrcp.f32 %v1561_v61  ;;  %v1564_v62 = vpop.xlane.xlu1 %1563 }
 0x57f   :  { %2886 = vrcp.f32 %v1564_v62 }
 0x585   :  { %v1567_v63 = vpop.xlane.xlu0 %1566 }
 0x586   :  { %2888 = vrcp.f32 %v1567_v63 }
 0x588   :  { %v2885_v0 = vpop.eup %2884 }
 0x589   :  { %v2887_v6 = vpop.eup %2886  ;;  %v1591_v7 = vmul.f32 %v2885_v0, %v3462_v42  ;;  %v1570_v8 = vpop.xlane.xlu1 %1569 }
 0x58a   :  { %v1592_v9 = vmul.f32 %v2887_v6, %v3464_v46  ;;  %2890 = vrcp.f32 %v1570_v8 }
 0x58b   :  { %v1599_v47 = vpack.c.bf16 %v1591_v7, %v1591_v7 }
 0x58c   :  { %v1600_v11 = vpack.c.bf16 %v1592_v9, %v1592_v9 }
 0x58d   :  { %v1573_v49 = vpop.xlane.xlu0 %1572  ;;  %2747 = vmatmul.mubr.msk.bf16.vlgmr.msra.gmra.mrb[16].mxu1 %vm1134_vm2, %v1599_v47  ;;  %v837_v43 = vpop.permute.xlu1 %836 }
 0x58e   :  { %2753 = vmatmul.mubr.msk.bf16.vlgmr.msra.gmra.mrb[20].mxu0 %vm1134_vm2, %v1600_v11  ;;  %2757 = vmatpush3.bf16.msra.mxu1 %v1704_v12  ;;  %2892 = vrcp.f32 %v1573_v49 }
 0x58f   :  { %2763 = vmatpush3.bf16.msra.mxu0 %v1750_v15  ;;  %2758 = vmatprep.mubr.msk.bf16.mxu1 %vm3054_vm1, %v3053_v18 }
 0x590   :  { %v2889_v42 = vpop.eup %2888  ;;  %2764 = vmatprep.mubr.msk.bf16.mxu0 %vm3054_vm1, %v3053_v18  ;;  %2768 = vmatprep.subr.bf16.mxu1 %v3053_v18 }
 0x591   :  { %v1593_v46 = vmul.f32 %v2889_v42, %v3470_v30  ;;  %v1576_v16 = vpop.xlane.xlu0 %1575  ;;  %v841_v17 = vpop.permute.xlu1 %840  ;;  %2774 = vmatprep.subr.bf16.mxu0 %v3053_v18 }
 0x592   :  { %2894 = vrcp.f32 %v1576_v16 }
 0x593   :  { %v1601_v19 = vpack.c.bf16 %v1593_v46, %v1593_v46 }
 0x594   :  { %v2891_v22 = vpop.eup %2890 }
 0x595   :  { %v1594_v23 = vmul.f32 %v2891_v22, %v3474_v32  ;;  %v833_v1 = vpop.permute.xlu0 %832  ;;  %2759 = vmatmul.mubr.msk.bf16.vlgmr.msra.gmra.mrb[20].mxu1 %vm1134_vm2, %v1601_v19  ;;  %v845_v2 = vpop.permute.xlu1 %844 }
 0x596   :  { %v922_v24 = vcombine.low %v833_v1, %v841_v17  ;;  %v923_v25 = vcombine.high %v833_v1, %v841_v17  ;;  %v938_v27 = vcombine.low %v837_v43, %v845_v2  ;;  %v939_v28 = vcombine.high %v837_v43, %v845_v2  ;;  %2770 = vmatprep.mubr.msk.bf16.mxu1 %vm3054_vm1, %v3053_v18 }
 0x597   :  { %v1602_v30 = vpack.c.bf16 %v1594_v23, %v1594_v23 }
 0x598   :  { %v930_v29 = vrot.slane %v922_v24, %v3277_v59  ;;  %v937_v34 = vrot.slane %v923_v25, %v3277_v59  ;;  %v946_v36 = vrot.slane %v938_v27, %v3277_v59  ;;  %v953_v32 = vrot.slane %v939_v28, %v3277_v59  ;;  %v2893_v60 = vpop.eup %2892 }
 0x599   :  { %2765 = vmatmul.mubr.msk.bf16.vlgmr.msra.gmra.mrb[24].mxu0 %vm1134_vm2, %v1602_v30  ;;  %v1595_v10 = vmul.f32 %v2893_v60, %v3478_v54 }
 0x59a   :  { %v954_v45 = vcombine.low %v930_v29, %v946_v36  ;;  %v955_v37 = vcombine.high %v930_v29, %v946_v36  ;;  %v970_v44 = vcombine.low %v937_v34, %v953_v32  ;;  %v971_v14 = vcombine.high %v937_v34, %v953_v32  ;;  %2776 = vmatprep.mubr.msk.bf16.mxu0 %vm3054_vm1, %v3053_v18 }
 0x59b   :  { %v1603_v46 = vpack.c.bf16 %v1595_v10, %v1595_v10 }
 0x59c   :  { %v962_v39 = vrot.slane %v954_v45, %v3287_v5  ;;  %v969_v40 = vrot.slane %v955_v37, %v3287_v5  ;;  %v978_v41 = vrot.slane %v970_v44, %v3287_v5  ;;  %v985_v20 = vrot.slane %v971_v14, %v3287_v5  ;;  %v2895_v6 = vpop.eup %2894 }
 0x59d   :  { %v1596_v47 = vmul.f32 %v2895_v6, %v3482_v57 }
 0x59e   :  { %v1058_v21 = vcombine.low %v962_v39, %v969_v40  ;;  %v2604_v50 = vcombine.high %v962_v39, %v969_v40  ;;  %v1074_v38 = vcombine.low %v978_v41, %v985_v20  ;;  %v2605_v13 = vcombine.high %v978_v41, %v985_v20 }
 0x59f   :  { %v1604_v16 = vpack.c.bf16 %v1596_v47, %v1596_v47 }
 0x5a0   :  { %v1065_v51 = vrot.slane %v1058_v21, %v3277_v59  ;;  %v1073_v52 = vrot.slane %v2604_v50, %v3277_v59  ;;  %v1081_v53 = vrot.slane %v1074_v38, %v3277_v59  ;;  %v1089_v55 = vrot.slane %v2605_v13, %v3277_v59 }
 0x5a2   :  { %v1090_v31 = vcombine.low %v1065_v51, %v1073_v52  ;;  %v1106_v33 = vcombine.low %v1081_v53, %v1089_v55  ;;  %v1091_v56 = vcombine.high %v1065_v51, %v1073_v52  ;;  %v1107_v58 = vcombine.high %v1081_v53, %v1089_v55 }
 0x5a4   :  { %v1098_v61 = vrot.slane %v1090_v31, %v3287_v5  ;;  %v1114_v62 = vrot.slane %v1106_v33, %v3287_v5  ;;  %v1105_v63 = vrot.slane %v1091_v56, %v3287_v5  ;;  %v1121_v0 = vrot.slane %v1107_v58, %v3287_v5 }
 0x5a6   :  { %v1122_v7 = vcombine.low %v1098_v61, %v1114_v62  ;;  %v1123_v8 = vcombine.high %v1098_v61, %v1114_v62  ;;  %v1124_v48 = vcombine.low %v1105_v63, %v1121_v0  ;;  %v1125_v9 = vcombine.high %v1105_v63, %v1121_v0 }
 0x5a8   :  { %v1130_v11 = vpack.c.bf16 %v1122_v7, %v1122_v7  ;;  %v1131_v49 = vpack.c.bf16 %v1123_v8, %v1123_v8  ;;  %v1132_v15 = vpack.c.bf16 %v1124_v48, %v1124_v48  ;;  %v1133_v42 = vpack.c.bf16 %v1125_v9, %v1125_v9 }
 0x5aa   :  { %v1796_v12 = vsel %vm1610_vm3, %v1130_v11, 0  ;;  %v1842_v43 = vsel %vm1610_vm3, %v1131_v49, 0  ;;  %v1888_v54 = vsel %vm1610_vm3, %v1132_v15, 0  ;;  %v1934_v57 = vsel %vm1610_vm3, %v1133_v42, 0 }
 0x5ab   :  { %2769 = vmatpush3.bf16.msra.mxu1 %v1796_v12  ;;  %2775 = vmatpush3.bf16.msra.mxu0 %v1842_v43 }
 0x5ac   :  { %2780 = vmatprep.subr.bf16.mxu1 %v3053_v18  ;;  %2786 = vmatprep.subr.bf16.mxu0 %v3053_v18 }
 0x5ae   :  { %2771 = vmatmul.mubr.msk.bf16.vlgmr.msra.gmra.mrb[24].mxu1 %vm1134_vm2, %v1603_v46  ;;  %2777 = vmatmul.mubr.msk.bf16.vlgmr.msra.gmra.mrb[28].mxu0 %vm1134_vm2, %v1604_v16 }
 0x5af   :  { %2781 = vmatpush3.bf16.msra.mxu1 %v1888_v54  ;;  %2787 = vmatpush3.bf16.msra.mxu0 %v1934_v57 }
 0x5b0   :  { %2782 = vmatprep.mubr.msk.bf16.mxu1 %vm3054_vm1, %v3053_v18  ;;  %2788 = vmatprep.mubr.msk.bf16.mxu0 %vm3054_vm1, %v3053_v18 }
 0x5b1   :  { %2792 = vmatprep.subr.bf16.mxu1 %v3053_v18  ;;  %2800 = vmatprep.subr.bf16.mxu0 %v3053_v18 }
 0x5c6   :  { %v1579_v17 = vpop.xlane.xlu0 %1578  ;;  %v1582_v19 = vpop.xlane.xlu1 %1581 }
 0x5c7   :  { %2896 = vrcp.f32 %v1579_v17 }
 0x5c8   :  { %2898 = vrcp.f32 %v1582_v19 }
 0x5d1   :  { %v2897_v22 = vpop.eup %2896 }
 0x5d2   :  { %v2899_v23 = vpop.eup %2898  ;;  %v1597_v1 = vmul.f32 %v2897_v22, %v3503_v26 }
 0x5d3   :  { %v1598_v2 = vmul.f32 %v2899_v23, %v3505_v35 }
 0x5d4   :  { %v1605_v24 = vpack.c.bf16 %v1597_v1, %v1597_v1 }
 0x5d5   :  { %v1606_v25 = vpack.c.bf16 %v1598_v2, %v1598_v2 }
 0x5d6   :  { %2783 = vmatmul.mubr.msk.bf16.vlgmr.msra.gmra.mrb[28].mxu1 %vm1134_vm2, %v1605_v24 }
 0x5d7   :  { %2789 = vmatmul.mubr.msk.bf16.vlgmr.msra.gmra.mrb[32].mxu0 %vm1134_vm2, %v1606_v25  ;;  %2796 = vmatprep.mubr.msk.bf16.mxu1 %vm3054_vm1, %v3053_v18 }
 0x5d8   :  { %2804 = vmatprep.mubr.msk.bf16.mxu0 %vm3054_vm1, %v3053_v18 }
 0x660   :  { %v1648_v27 = vpop.f32.mrb[16].mxu1 }
 0x661   :  { %v1694_v28 = vpop.f32.mrb[20].mxu0  ;;  %v2748_v30 = vpop.f32.mrb[17].mxu1 }
 0x662   :  { %v2754_v29 = vpop.f32.mrb[21].mxu0  ;;  %v1651_v34 = vpop.f32.mrb[18].mxu1 }
 0x663   :  { %v1697_v26 = vpop.f32.mrb[22].mxu0  ;;  %v2749_v36 = vpop.f32.mrb[19].mxu1 }
 0x664   :  { %v2755_v35 = vpop.f32.mrb[23].mxu0 }
 0x668   :  { %v1740_v32 = vpop.f32.mrb[20].mxu1 }
 0x669   :  { %v1976_v45 = vcombine.low %v1648_v27, %v1740_v32  ;;  %v1977_v37 = vcombine.high %v1648_v27, %v1740_v32  ;;  %v2760_v44 = vpop.f32.mrb[21].mxu1 }
 0x66a   :  { %v1743_v14 = vpop.f32.mrb[22].mxu1 }
 0x66b   :  { %v2761_v39 = vpop.f32.mrb[23].mxu1  ;;  %v1984_v38 = vrot.slane %v1976_v45, %v3277_v59  ;;  %v1991_v13 = vrot.slane %v1977_v37, %v3277_v59 }
 0x66c   :  { %v1786_v40 = vpop.f32.mrb[24].mxu0 }
 0x66d   :  { %v1992_v41 = vcombine.low %v1694_v28, %v1786_v40  ;;  %v1993_v20 = vcombine.high %v1694_v28, %v1786_v40  ;;  %v2766_v21 = vpop.f32.mrb[25].mxu0 }
 0x66e   :  { %v1789_v50 = vpop.f32.mrb[26].mxu0 }
 0x66f   :  { %v2000_v51 = vrot.slane %v1992_v41, %v3277_v59  ;;  %v2007_v52 = vrot.slane %v1993_v20, %v3277_v59  ;;  %v2767_v53 = vpop.f32.mrb[27].mxu0 }
 0x671   :  { %v2008_v55 = vcombine.low %v1984_v38, %v2000_v51  ;;  %v2009_v31 = vcombine.high %v1984_v38, %v2000_v51  ;;  %v2024_v33 = vcombine.low %v1991_v13, %v2007_v52  ;;  %v2025_v56 = vcombine.high %v1991_v13, %v2007_v52 }
 0x673   :  { %v2016_v58 = vrot.slane %v2008_v55, %v3287_v5  ;;  %v2023_v60 = vrot.slane %v2009_v31, %v3287_v5  ;;  %v2032_v61 = vrot.slane %v2024_v33, %v3287_v5  ;;  %v2039_v62 = vrot.slane %v2025_v56, %v3287_v5 }
 0x675   :  { %v2112_v63 = vcombine.low %v2016_v58, %v2023_v60  ;;  %v2622_v0 = vcombine.high %v2016_v58, %v2023_v60  ;;  %v2128_v6 = vcombine.low %v2032_v61, %v2039_v62  ;;  %v2623_v7 = vcombine.high %v2032_v61, %v2039_v62  ;;  %v2856_v60 = vld [vmem:[%s3714_s6] sm:$0xff]  }
 0x676   :  { %2793 = vmatpush3.bf16.msra.mxu1 %v2856_v60 }
 0x677   :  { %v2119_v8 = vrot.slane %v2112_v63, %v3277_v59  ;;  %v2127_v48 = vrot.slane %v2622_v0, %v3277_v59  ;;  %v2135_v9 = vrot.slane %v2128_v6, %v3277_v59  ;;  %v2143_v10 = vrot.slane %v2623_v7, %v3277_v59  ;;  %2794 = vmatprep.subr.bf16.mxu1 %v3053_v18 }
 0x679   :  { %v2145_v47 = vcombine.high %v2119_v8, %v2127_v48  ;;  %v2161_v11 = vcombine.high %v2135_v9, %v2143_v10  ;;  %v2144_v49 = vcombine.low %v2119_v8, %v2127_v48  ;;  %v2160_v12 = vcombine.low %v2135_v9, %v2143_v10  ;;  %v2857_v9 = vld [vmem:[%s3714_s6 + $0x8] sm:$0xff]   ;;  %s3063_s6 = smov 8  }
 0x67a   :  { %2795 = vmatpush3.bf16.msra.mxu1 %v2857_v9  ;;  %v2631_v9 = vld [vmem:[#allocation10] ss:$0 sm:$0xff] }
 0x67b   :  { %v3596_v43 = vrot.slane %v2145_v47, %v3287_v5  ;;  %v3599_v15 = vrot.slane %v2161_v11, %v3287_v5  ;;  %v3602_v42 = vrot.slane %v2144_v49, %v3287_v5  ;;  %v3605_v46 = vrot.slane %v2160_v12, %v3287_v5  ;;  %2808 = vmatprep.subr.bf16.mxu1 %v3053_v18 }
 0x67d   :  { %v2178_v16 = vcombine.low %v3596_v43, %v3599_v15  ;;  %v2176_v54 = vcombine.low %v3602_v42, %v3605_v46  ;;  %v2177_v57 = vcombine.high %v3602_v42, %v3605_v46  ;;  %v2179_v17 = vcombine.high %v3596_v43, %v3599_v15  ;;  %v2626_v42 = vld [vmem:[#allocation7] ss:$0 sm:$0xff] }
 0x681   :  { %v1832_v19 = vpop.f32.mrb[24].mxu1  ;;  %v1878_v22 = vpop.f32.mrb[28].mxu0 }
 0x682   :  { %v2772_v23 = vpop.f32.mrb[25].mxu1  ;;  %v2778_v1 = vpop.f32.mrb[29].mxu0 }
 0x683   :  { %v1835_v2 = vpop.f32.mrb[26].mxu1  ;;  %v1881_v24 = vpop.f32.mrb[30].mxu0 }
 0x684   :  { %v2773_v25 = vpop.f32.mrb[27].mxu1  ;;  %v2779_v27 = vpop.f32.mrb[31].mxu0 }
 0x6a9   :  { %v1924_v28 = vpop.f32.mrb[28].mxu1 }
 0x6aa   :  { %v2044_v30 = vcombine.low %v1832_v19, %v1924_v28  ;;  %v2045_v29 = vcombine.high %v1832_v19, %v1924_v28  ;;  %v1970_v34 = vpop.f32.mrb[32].mxu0  ;;  %v2784_v26 = vpop.f32.mrb[29].mxu1 }
 0x6ab   :  { %v2060_v36 = vcombine.low %v1878_v22, %v1970_v34  ;;  %v2061_v35 = vcombine.high %v1878_v22, %v1970_v34  ;;  %v2790_v32 = vpop.f32.mrb[33].mxu0  ;;  %v1927_v45 = vpop.f32.mrb[30].mxu1 }
 0x6ac   :  { %v2052_v37 = vrot.slane %v2044_v30, %v3277_v59  ;;  %v2059_v44 = vrot.slane %v2045_v29, %v3277_v59  ;;  %v1973_v14 = vpop.f32.mrb[34].mxu0  ;;  %v2785_v39 = vpop.f32.mrb[31].mxu1 }
 0x6ad   :  { %v2068_v40 = vrot.slane %v2060_v36, %v3277_v59  ;;  %v2075_v41 = vrot.slane %v2061_v35, %v3277_v59  ;;  %v2791_v20 = vpop.f32.mrb[35].mxu0 }
 0x6af   :  { %v2076_v21 = vcombine.low %v2052_v37, %v2068_v40  ;;  %v2077_v50 = vcombine.high %v2052_v37, %v2068_v40  ;;  %v2092_v38 = vcombine.low %v2059_v44, %v2075_v41  ;;  %v2093_v13 = vcombine.high %v2059_v44, %v2075_v41 }
 0x6b1   :  { %v2084_v51 = vrot.slane %v2076_v21, %v3287_v5  ;;  %v2091_v52 = vrot.slane %v2077_v50, %v3287_v5  ;;  %v2100_v53 = vrot.slane %v2092_v38, %v3287_v5  ;;  %v2107_v55 = vrot.slane %v2093_v13, %v3287_v5 }
 0x6b3   :  { %v2180_v31 = vcombine.low %v2084_v51, %v2091_v52  ;;  %v2624_v33 = vcombine.high %v2084_v51, %v2091_v52  ;;  %v2196_v56 = vcombine.low %v2100_v53, %v2107_v55  ;;  %v2625_v58 = vcombine.high %v2100_v53, %v2107_v55  ;;  %v2858_v55 = vld [vmem:[%s3718_s10] sm:$0xff]  }
 0x6b4   :  { %2801 = vmatpush3.bf16.msra.mxu0 %v2858_v55 }
 0x6b5   :  { %v2187_v61 = vrot.slane %v2180_v31, %v3277_v59  ;;  %v2195_v62 = vrot.slane %v2624_v33, %v3277_v59  ;;  %v2203_v63 = vrot.slane %v2196_v56, %v3277_v59  ;;  %v2211_v0 = vrot.slane %v2625_v58, %v3277_v59  ;;  %v2859_v31 = vld [vmem:[%s3718_s10 + $0x8] sm:$0xff]   ;;  %2802 = vmatprep.subr.bf16.mxu0 %v3053_v18 }
 0x6b7   :  { %v2213_v6 = vcombine.high %v2187_v61, %v2195_v62  ;;  %v2229_v7 = vcombine.high %v2203_v63, %v2211_v0  ;;  %v2212_v8 = vcombine.low %v2187_v61, %v2195_v62  ;;  %v2228_v48 = vcombine.low %v2203_v63, %v2211_v0 }
 0x6b8   :  { %2803 = vmatpush3.bf16.msra.mxu0 %v2859_v31 }
 0x6b9   :  { %v2227_v10 = vrot.slane %v2213_v6, %v3287_v5  ;;  %v2243_v47 = vrot.slane %v2229_v7, %v3287_v5  ;;  %v2220_v11 = vrot.slane %v2212_v8, %v3287_v5  ;;  %v2236_v49 = vrot.slane %v2228_v48, %v3287_v5  ;;  %v2630_v6 = vld [vmem:[#allocation8] ss:$0 sm:$0xff] }
 0x6bb   :  { %v2246_v59 = vcombine.low %v2227_v10, %v2243_v47  ;;  %v2245_v12 = vcombine.high %v2220_v11, %v2236_v49  ;;  %v2244_v43 = vcombine.low %v2220_v11, %v2236_v49  ;;  %v2247_v15 = vcombine.high %v2227_v10, %v2243_v47 }
 0x6bd   :  { %v2844_v19 = vpack.i.bf16 %v2246_v59, %v2178_v16  ;;  %v2839_v22 = vpack.i.bf16 %v2245_v12, %v2177_v57  ;;  %v2849_v23 = vpack.i.bf16 %v2247_v15, %v2179_v17  ;;  %v2860_v59 = vld [vmem:[%s3720_s12] sm:$0xff]   ;;  %v2861_v12 = vld [vmem:[%s3720_s12 + $0x8] sm:$0xff]   ;;  %v2863_v15 = vld [vmem:[%s3720_s12 + $0x18] sm:$0xff]  }
 0x6bf   :  { %2845 = vrot.lane.b32.xlu1 %v2844_v19, %s3062_s5  ;;  %2840 = vrot.lane.b32.xlu0 %v2839_v22, %s3063_s6  ;;  %v2632_v19 = vld [vmem:[%s3719_s11] ss:$0 sm:$0xff] }
 0x6c3   :  { %2850 = vrot.lane.b32.xlu0 %v2849_v23, %s3064_s7 }
 0x731   :  { %v2846_v1 = vpop.permute.xlu1 %2845  ;;  %v2841_v2 = vpop.permute.xlu0 %2840 }
 0x732   :  { %v2843_v5 = vunpack.i.h.bf16 %v2841_v2  ;;  %v2842_v24 = vunpack.i.l.bf16 %v2841_v2  ;;  %v2848_v25 = vunpack.i.h.bf16 %v2846_v1  ;;  %v2847_v27 = vunpack.i.l.bf16 %v2846_v1 }
 0x734   :  { %v2272_v16 = vsel %vm1134_vm2, %v2176_v54, %v2842_v24  ;;  %v2273_v57 = vsel %vm1134_vm2, %v2244_v43, %v2843_v5  ;;  %v2862_v43 = vld [vmem:[%s3720_s12 + $0x10] sm:$0xff]  }
 0x735   :  { %v2851_v17 = vpop.permute.xlu0 %2850  ;;  %v2275_v29 = vsel %vm2274_vm4, %v2272_v16, %v2847_v27  ;;  %v2276_v34 = vsel %vm2274_vm4, %v2273_v57, %v2848_v25 }
 0x736   :  { %v2853_v28 = vunpack.i.h.bf16 %v2851_v17  ;;  %v2852_v30 = vunpack.i.l.bf16 %v2851_v17 }
 0x738   :  { %v2278_v26 = vsel %vm2277_vm5, %v2275_v29, %v2852_v30  ;;  %v2279_v36 = vsel %vm2277_vm5, %v2276_v34, %v2853_v28 }
 0x739   :  { %v2280_v35 = vpack.c.bf16 %v2279_v36, %v2278_v26 }
 0x73b   :  { %2797 = vmatmul.mubr.msk.bf16.vlgmr.msra.gmra.mrb[32].mxu1 %vm114_vm0, %v2280_v35 }
 0x73c   :  { %2816 = vmatprep.mubr.msk.bf16.mxu1 %vm3054_vm1, %v3053_v18  ;;  %2809 = vmatpush3.bf16.msra.mxu1 %v2860_v59 }
 0x73d   :  { %2810 = vmatprep.subr.bf16.mxu1 %v3053_v18 }
 0x740   :  { %2811 = vmatpush3.bf16.msra.mxu1 %v2861_v12 }
 0x741   :  { %2812 = vmatprep.subr.bf16.mxu1 %v3053_v18 }
 0x744   :  { %2813 = vmatpush3.bf16.msra.mxu1 %v2862_v43 }
 0x745   :  { %2814 = vmatprep.subr.bf16.mxu1 %v3053_v18 }
 0x748   :  { %2815 = vmatpush3.bf16.msra.mxu1 %v2863_v15 }
 0x80e   :  { %v2341_v46 = vpop.f32.mrb[32].mxu1 }
 0x80f   :  { %v2342_v54 = vadd.f32 %v2626_v42, %v2341_v46  ;;  %v2798_v32 = vpop.f32.mrb[33].mxu1 }
 0x810   :  { %v2344_v45 = vpop.f32.mrb[34].mxu1 }
 0x811   :  { %v3649_v37 = vadd.f32 %v2342_v54, %v3208_v3  ;;  %v2345_v44 = vadd.f32 %v2626_v42, %v2344_v45  ;;  %v2799_v14 = vpop.f32.mrb[35].mxu1 }
 0x812   :  { %v2636_v14 = vld [vmem:[%s3721_s13] ss:$0 sm:$0xff] }
 0x813   :  { %v3652_v39 = vadd.f32 %v2345_v44, %v3210_v4  ;;  %v2352_v40 = vsel %vm114_vm0, %v3649_v37, 0.0 }
 0x814   :  { %2353 = vadd.xlane.f32.xlu1 %v2352_v40 }
 0x815   :  { %v2355_v41 = vsel %vm114_vm0, %v3652_v39, 0.0 }
 0x816   :  { %2356 = vadd.xlane.f32.xlu0 %v2355_v41 }
 0x8a1   :  { %v2354_v20 = vpop.xlane.xlu1 %2353 }
 0x8a2   :  { %v2358_v21 = vmul.f32 0.03125, %v2354_v20 }
 0x8a3   :  { %v2357_v50 = vpop.xlane.xlu0 %2356 }
 0x8a4   :  { %v2360_v38 = vsub.f32 %v3649_v37, %v2358_v21  ;;  %v2359_v3 = vmul.f32 0.03125, %v2357_v50 }
 0x8a6   :  { %v2361_v13 = vsub.f32 %v3652_v39, %v2359_v3  ;;  %v2362_v51 = vmul.f32 %v2360_v38, %v2360_v38 }
 0x8a8   :  { %v2364_v4 = vsel %vm114_vm0, %v2362_v51, 0.0  ;;  %v2363_v52 = vmul.f32 %v2361_v13, %v2361_v13 }
 0x8a9   :  { %2365 = vadd.xlane.f32.xlu0 %v2364_v4 }
 0x8aa   :  { %v2367_v53 = vsel %vm114_vm0, %v2363_v52, 0.0 }
 0x8ad   :  { %2368 = vadd.xlane.f32.xlu0 %v2367_v53 }
 0x936   :  { %v2366_v33 = vpop.xlane.xlu0 %2365 }
 0x937   :  { %v2370_v56 = vmul.f32 0.03125, %v2366_v33 }
 0x939   :  { %v2372_v58 = vadd.f32 1e-06, %v2370_v56 }
 0x93a   :  { %v2369_v60 = vpop.xlane.xlu0 %2368 }
 0x93b   :  { %2900 = vrsqrt.f32 %v2372_v58  ;;  %v2371_v61 = vmul.f32 0.03125, %v2369_v60 }
 0x93d   :  { %v2373_v62 = vadd.f32 1e-06, %v2371_v61 }
 0x93f   :  { %2902 = vrsqrt.f32 %v2373_v62 }
 0x945   :  { %v2901_v63 = vpop.eup %2900 }
 0x946   :  { %v2376_v0 = vmul.f32 %v2901_v63, %v2360_v38 }
 0x948   :  { %v2384_v8 = vmul.f32 %v2630_v6, %v2376_v0 }
 0x949   :  { %v2903_v7 = vpop.eup %2902 }
 0x94a   :  { %v2377_v48 = vmul.f32 %v2903_v7, %v2361_v13  ;;  %v2392_v47 = vadd.f32 %v2631_v9, %v2384_v8 }
 0x94c   :  { %v2385_v10 = vmul.f32 %v2630_v6, %v2377_v48 }
 0x94e   :  { %v2393_v11 = vadd.f32 %v2631_v9, %v2385_v10 }
 0x950   :  { %v2394_v49 = vpack.c.bf16 %v2393_v11, %v2392_v47 }
 0x952   :  { %2805 = vmatmul.mubr.msk.bf16.vlgmr.msra.gmra.mrb[36].mxu0 %vm114_vm0, %v2394_v49 }
 0xa25   :  { %v2455_v22 = vpop.f32.mrb[36].mxu0 }
 0xa26   :  { %v2456_v23 = vadd.f32 %v2632_v19, %v2455_v22  ;;  %v2806_v1 = vpop.f32.mrb[37].mxu0 }
 0xa27   :  { %v2458_v2 = vpop.f32.mrb[38].mxu0 }
 0xa28   :  { %v2462_v5 = vmul.f32 %v2456_v23, %v2456_v23  ;;  %v2459_v24 = vadd.f32 %v2632_v19, %v2458_v2  ;;  %v2807_v25 = vpop.f32.mrb[39].mxu0 }
 0xa2a   :  { %v2464_v27 = vmul.f32 %v2462_v5, %v2456_v23  ;;  %v2463_v16 = vmul.f32 %v2459_v24, %v2459_v24 }
 0xa2c   :  { %v2466_v57 = vmul.f32 0.044715, %v2464_v27  ;;  %v2465_v18 = vmul.f32 %v2463_v16, %v2459_v24 }
 0xa2e   :  { %v2468_v17 = vadd.f32 %v2466_v57, %v2456_v23  ;;  %v2467_v28 = vmul.f32 0.044715, %v2465_v18 }
 0xa30   :  { %v2470_v30 = vmul.f32 0.7978846, %v2468_v17  ;;  %v2469_v29 = vadd.f32 %v2467_v28, %v2459_v24 }
 0xa32   :  { %2904 = vtanh.f32 %v2470_v30  ;;  %v2471_v34 = vmul.f32 0.7978846, %v2469_v29 }
 0xa34   :  { %2906 = vtanh.f32 %v2471_v34 }
 0xa3c   :  { %v2905_v26 = vpop.eup %2904 }
 0xa3d   :  { %v2474_v36 = vadd.f32 1.0, %v2905_v26 }
 0xa3e   :  { %v2907_v35 = vpop.eup %2906 }
 0xa3f   :  { %v2476_v42 = vmul.f32 0.5, %v2474_v36  ;;  %v2475_v46 = vadd.f32 1.0, %v2907_v35 }
 0xa41   :  { %v2477_v54 = vmul.f32 0.5, %v2475_v46  ;;  %v2478_v32 = vmul.f32 %v2476_v42, %v2456_v23 }
 0xa43   :  { %v2479_v45 = vmul.f32 %v2477_v54, %v2459_v24 }
 0xa45   :  { %v2480_v44 = vpack.c.bf16 %v2479_v45, %v2478_v32 }
 0xa47   :  { %2817 = vmatmul.mubr.msk.bf16.vlgmr.msra.gmra.mrb[36].mxu1 %vm2520_vm6, %v2480_v44 }
 0xb1a   :  { %v2558_v40 = vpop.f32.mrb[36].mxu1 }
 0xb1b   :  { %v2559_v41 = vadd.f32 %v2636_v14, %v2558_v40  ;;  %v2818_v20 = vpop.f32.mrb[37].mxu1 }
 0xb1c   :  { %v2561_v21 = vpop.f32.mrb[38].mxu1 }
 0xb1d   :  { %v2565_v50 = vadd.f32 %v2559_v41, %v3649_v37  ;;  %v2562_v38 = vadd.f32 %v2636_v14, %v2561_v21  ;;  %v2819_v3 = vpop.f32.mrb[39].mxu1 }
 0xb1f   :  { %2567 = vst.msk [vmem:[#allocation11] sm:$0xff] %vm114_vm0, %v2565_v50  ;;  %v2566_v13 = vadd.f32 %v2562_v38, %v3652_v39 }
 0xb21   :  { %2568 = vst.msk [vmem:[#allocation11 + $0x8] sm:$0xff] %vm114_vm0, %v2566_v13 }
 0xb22   :  { %3029 = shalt.err (!%p3026_p2)
}
 0xb23   :  { %s3030_s19 = scalar_lea.hbm %s3722_s14, 256 }
 0xb24   :  { %p3031_p3 = scmp.ne.s32.totalorder %s3722_s14, %s3030_s19  ;;  %p3034_p4 = scmp.lt.u32.totalorder %s3030_s19, %s3722_s14 }
 0xb26   :  { %p3036_p5 = pnand %p3034_p4, %p3031_p3 }
 0xb28   :  { %3039 = shalt.err (!%p3036_p5)
}
 0xb29   :  { %s3066_s22 = smov 128  }
 0xb2a   :  { %2580 = dma.vmem_to_hbm [thread:$0]  %s2575_s2, 256, %s3722_s14, [#allocation4], %s3066_s22, %s3066_s22, %s3063_s6  }
 0xb2b   :  { %3046 = dma.done.wait [#allocation4], 256  }
 0xb2c   :  { %3047 = vsyncadd [#allocation4], 4294967040 }
 0xb2d   :  { %2584 = vsyncpa [#allocation3], 1 }
 0xb2e   :  { %2585 = vsyncpa [#allocation6], 1 }
 0xb2f   :  { %2586 = vsyncpa [#allocation9], 1 }
 0xb30   :  { %2587 = vsyncpa [#allocation4], 1 }

// kernel: tpu_custom_call.1
= control target key start
LH: loop header
LB: loop body
LE: loop exit
PB: predicated region body
PF: predicated region fallthrough
CT: control target
= control target key end

     0   :  { %19 = vsyncpa [#allocation3], 0  ;;  %s3708_s0 = inlined_call_operand.vmem [shape: f32[2,8,32], index: 0, kind: input, shape index: {}]   ;;  %s3709_s1 = inlined_call_operand.hbm [shape: f32[8,32], index: 1, kind: input, shape index: {}]   ;;  %s3710_s2 = inlined_call_operand.vmem [shape: f32[1,32], index: 2, kind: input, shape index: {}]   ;;  %s3711_s3 = inlined_call_operand.vmem [shape: f32[1,32], index: 3, kind: input, shape index: {}]   ;;  %s3712_s4 = inlined_call_operand.vmem [shape: bf16[32,96], index: 4, kind: input, shape index: {}]   ;;  %s3713_s5 = inlined_call_operand.hbm [shape: f32[1,96], index: 5, kind: input, shape index: {}]   ;;  %s3714_s6 = inlined_call_operand.vmem [shape: bf16[32,32], index: 6, kind: input, shape index: {}]   ;;  %s3715_s7 = inlined_call_operand.hbm [shape: f32[1,32], index: 7, kind: input, shape index: {}]   ;;  %s3716_s8 = inlined_call_operand.hbm [shape: f32[1,32], index: 8, kind: input, shape index: {}]   ;;  %s3717_s9 = inlined_call_operand.hbm [shape: f32[1,32], index: 9, kind: input, shape index: {}]   ;;  %s3718_s10 = inlined_call_operand.vmem [shape: bf16[32,64], index: 10, kind: input, shape index: {}]   ;;  %s3719_s11 = inlined_call_operand.vmem [shape: f32[1,64], index: 11, kind: input, shape index: {}]   ;;  %s3720_s12 = inlined_call_operand.vmem [shape: bf16[64,32], index: 12, kind: input, shape index: {}]   ;;  %s3721_s13 = inlined_call_operand.vmem [shape: f32[1,32], index: 13, kind: input, shape index: {}]   ;;  %s3722_s14 = inlined_call_operand.hbm [shape: f32[2,8,32], index: 14, kind: output, shape index: {}]  }
   0x1   :  { %20 = vsyncpa [#allocation6], 0 }
   0x2   :  { %21 = vsyncpa [#allocation9], 0 }
   0x3   :  { %22 = vsyncpa [#allocation4], 0  ;;  %s3048_s29 = smov [#allocation5]   ;;  %s3049_s15 = smov [#allocation8]  }
   0x4   :  { %s47_s30 = sshll.u32 %s3048_s29, 4  ;;  %s69_s16 = sshll.u32 %s3049_s15, 4  ;;  %s48_s30 = int_to_ptr.vmem [resolvable:$true] %s47_s30  ;;  %s70_s16 = int_to_ptr.vmem [resolvable:$true] %s69_s16 }
   0x5   :  { %s2908_s19 = scalar_lea.hbm %s3713_s5, 16 }
   0x6   :  { %p2909_p0 = scmp.ne.s32.totalorder %s3713_s5, %s2908_s19  ;;  %p2912_p1 = scmp.lt.u32.totalorder %s2908_s19, %s3713_s5 }
   0x8   :  { %p2914_p2 = pnand %p2912_p1, %p2909_p0 }
   0xa   :  { %2917 = shalt.err (!%p2914_p2)
}
   0xb   :  { %s2918_s24 = scalar_lea.vmem %s48_s30, 16  ;;  %s2922_s25 = scalar_lea.vmem %s48_s30, 32 }
   0xc   :  { %p2919_p3 = scmp.ne.s32.totalorder %s48_s30, %s2918_s24  ;;  %p2923_p4 = scmp.lt.s32.totalorder %s48_s30, %s48_s30 }
   0xd   :  { %p2924_p5 = scmp.lt.s32.totalorder %s2922_s25, %s2918_s24 }
   0xf   :  { %p2925_p6 = por %p2924_p5, %p2923_p4 }
  0x11   :  { %p2926_p7 = pnand %p2925_p6, %p2919_p3 }
  0x13   :  { %2929 = shalt.err (!%p2926_p7)
}
  0x14   :  { %50 = dma.hbm_to_vmem [thread:$0]  %s3713_s5, 16, %s48_s30, [#allocation6]  }
  0x15   :  { %s2930_s15 = scalar_lea.hbm %s3716_s8, 16 }
  0x16   :  { %p2931_p8 = scmp.ne.s32.totalorder %s3716_s8, %s2930_s15  ;;  %p2934_p9 = scmp.lt.u32.totalorder %s2930_s15, %s3716_s8 }
  0x18   :  { %p2936_p10 = pnand %p2934_p9, %p2931_p8 }
  0x1a   :  { %2939 = shalt.err (!%p2936_p10)
}
  0x1b   :  { %s2940_s21 = scalar_lea.vmem %s70_s16, 16  ;;  %s2944_s22 = scalar_lea.vmem %s70_s16, 32 }
  0x1c   :  { %p2941_p11 = scmp.ne.s32.totalorder %s70_s16, %s2940_s21  ;;  %p2945_p12 = scmp.lt.s32.totalorder %s70_s16, %s70_s16 }
  0x1d   :  { %p2946_p13 = scmp.lt.s32.totalorder %s2944_s22, %s2940_s21 }
  0x1f   :  { %p2947_p0 = por %p2946_p13, %p2945_p12 }
  0x21   :  { %p2948_p1 = pnand %p2947_p0, %p2941_p11 }
  0x23   :  { %2951 = shalt.err (!%p2948_p1)
}
  0x24   :  { %72 = dma.hbm_to_vmem [thread:$0]  %s3716_s8, 16, %s70_s16, [#allocation9]  }
  0x25   :  { %s3050_s23 = smov [#allocation2]   ;;  %s3051_s25 = smov [#allocation7]  }
  0x26   :  { %s31_s24 = sshll.u32 %s3050_s23, 4  ;;  %s59_s26 = sshll.u32 %s3051_s25, 4  ;;  %s32_s24 = int_to_ptr.vmem [resolvable:$true] %s31_s24  ;;  %s60_s26 = int_to_ptr.vmem [resolvable:$true] %s59_s26 }
  0x27   :  { %s2952_s29 = scalar_lea.hbm %s3709_s1, 128 }
  0x28   :  { %p2953_p2 = scmp.ne.s32.totalorder %s3709_s1, %s2952_s29  ;;  %p2956_p3 = scmp.lt.u32.totalorder %s2952_s29, %s3709_s1 }
  0x2a   :  { %p2958_p4 = pnand %p2956_p3, %p2953_p2 }
  0x2c   :  { %2961 = shalt.err (!%p2958_p4)
}
  0x2d   :  { %s2962_s8 = scalar_lea.vmem %s32_s24, 128  ;;  %p2967_p6 = scmp.lt.s32.totalorder %s32_s24, %s32_s24 }
  0x2e   :  { %p2963_p5 = scmp.ne.s32.totalorder %s32_s24, %s2962_s8  ;;  %p2968_p7 = scmp.lt.s32.totalorder %s2962_s8, %s2962_s8 }
  0x30   :  { %p2969_p8 = por %p2968_p7, %p2967_p6 }
  0x32   :  { %p2970_p9 = pnand %p2969_p8, %p2963_p5 }
  0x34   :  { %2973 = shalt.err (!%p2970_p9)
}
  0x35   :  { %34 = dma.hbm_to_vmem [thread:$0]  %s3709_s1, 128, %s32_s24, [#allocation3]  }
  0x36   :  { %s2974_s5 = scalar_lea.hbm %s3715_s7, 16 }
  0x37   :  { %p2975_p10 = scmp.ne.s32.totalorder %s3715_s7, %s2974_s5  ;;  %p2978_p11 = scmp.lt.u32.totalorder %s2974_s5, %s3715_s7 }
  0x39   :  { %p2980_p12 = pnand %p2978_p11, %p2975_p10 }
  0x3b   :  { %2983 = shalt.err (!%p2980_p12)
}
  0x3c   :  { %s2984_s28 = scalar_lea.vmem %s60_s26, 16  ;;  %s2988_s29 = scalar_lea.vmem %s60_s26, 32 }
  0x3d   :  { %p2985_p13 = scmp.ne.s32.totalorder %s60_s26, %s2984_s28  ;;  %p2989_p0 = scmp.lt.s32.totalorder %s60_s26, %s60_s26 }
  0x3e   :  { %p2990_p1 = scmp.lt.s32.totalorder %s2988_s29, %s2984_s28 }
  0x40   :  { %p2991_p2 = por %p2990_p1, %p2989_p0 }
  0x42   :  { %p2992_p3 = pnand %p2991_p2, %p2985_p13 }
  0x44   :  { %2995 = shalt.err (!%p2992_p3)
}
  0x45   :  { %62 = dma.hbm_to_vmem [thread:$0]  %s3715_s7, 16, %s60_s26, [#allocation6]  }
  0x46   :  { %s3052_s15 = smov [#allocation10]   ;;  %s2996_s8 = scalar_lea.hbm %s3717_s9, 16 }
  0x47   :  { %s79_s17 = sshll.u32 %s3052_s15, 4  ;;  %p2997_p4 = scmp.ne.s32.totalorder %s3717_s9, %s2996_s8  ;;  %s80_s17 = int_to_ptr.vmem [resolvable:$true] %s79_s17 }
  0x48   :  { %p3000_p5 = scmp.lt.u32.totalorder %s2996_s8, %s3717_s9 }
  0x4a   :  { %p3002_p6 = pnand %p3000_p5, %p2997_p4 }
  0x4c   :  { %3005 = shalt.err (!%p3002_p6)
}
  0x4d   :  { %s3006_s5 = scalar_lea.vmem %s80_s17, 16  ;;  %s3010_s7 = scalar_lea.vmem %s80_s17, 32 }
  0x4e   :  { %p3007_p7 = scmp.ne.s32.totalorder %s80_s17, %s3006_s5  ;;  %p3011_p8 = scmp.lt.s32.totalorder %s80_s17, %s80_s17 }
  0x4f   :  { %p3012_p9 = scmp.lt.s32.totalorder %s3010_s7, %s3006_s5 }
  0x51   :  { %p3013_p10 = por %p3012_p9, %p3011_p8 }
  0x53   :  { %p3014_p11 = pnand %p3013_p10, %p3007_p7 }
  0x55   :  { %3017 = shalt.err (!%p3014_p11)
}
  0x56   :  { %82 = dma.hbm_to_vmem [thread:$0]  %s3717_s9, 16, %s80_s17, [#allocation9]  }
  0x57   :  { %3040 = dma.done.wait [#allocation3], 128  }
  0x58   :  { %3041 = vsyncadd [#allocation3], 4294967168 }
  0x59   :  { %3042 = dma.done.wait [#allocation6], 32  }
  0x5a   :  { %3043 = vsyncadd [#allocation6], 4294967264 }
  0x5b   :  { %3044 = dma.done.wait [#allocation9], 32  }
  0x5c   :  { %3045 = vsyncadd [#allocation9], 4294967264  ;;  %v107_v0 = vld [vmem:[%s3708_s0] sm:$0xff]  ;;  %vm114_vm0 = vcmask 261120   ;;  %v108_v2 = vld [vmem:[%s3708_s0 + $0x8] sm:$0xff]  ;;  %v3053_v18 = vmov 0.0   ;;  %v251_v52 = vlaneseq }
  0x5d   :  { %v109_v1 = vld [vmem:[#allocation2] sm:$0xff]  ;;  %2688 = vmatprep.subr.bf16.mxu0 %v3053_v18  ;;  %2696 = vmatprep.subr.bf16.mxu1 %v3053_v18  ;;  %v2855_v19 = vld [vmem:[%s3712_s4 + $0x8] sm:$0xff]   ;;  %vm3054_vm1 = vmmov 0   ;;  %s3056_s18 = smov 120   ;;  %s3058_s19 = smov 96   ;;  %vm1134_vm2 = vcmask 64512  }
  0x5e   :  { %v3208_v3 = vadd.f32 %v109_v1, %v107_v0  ;;  %v3210_v4 = vadd.f32 %v109_v1, %v108_v2  ;;  %v2854_v17 = vld [vmem:[%s3712_s4] sm:$0xff]   ;;  %2692 = vmatprep.mubr.msk.bf16.mxu0 %vm3054_vm1, %v3053_v18  ;;  %2698 = vmatprep.mubr.msk.bf16.mxu1 %vm3054_vm1, %v3053_v18  ;;  %v2590_v37 = vld [vmem:[#allocation5] ss:$0 sm:$0xff]  ;;  %v3059_v50 = vmov 1983009808   ;;  %v252_v54 = vshrl.u32 %v251_v52, 7 }
  0x5f   :  { %2689 = vmatpush3.bf16.msra.mxu0 %v2854_v17  ;;  %v2588_v28 = vld [vmem:[%s3710_s2] ss:$0 sm:$0xff]  ;;  %s3055_s2 = smov 112   ;;  %v249_v51 = vunpack.c.l.s4 %v3059_v50  ;;  %v3060_v55 = vmov 1934713408   ;;  %s3061_s8 = smov 64  }
  0x60   :  { %v115_v5 = vsel %vm114_vm0, %v3208_v3, 0.0  ;;  %v118_v6 = vsel %vm114_vm0, %v3210_v4, 0.0  ;;  %2690 = vmatprep.subr.bf16.mxu0 %v3053_v18  ;;  %v2589_v32 = vld [vmem:[%s3711_s3] ss:$0 sm:$0xff]  ;;  %s3057_s3 = smov 104   ;;  %v281_v56 = vunpack.c.l.s4 %v3060_v55  ;;  %vm1610_vm3 = vcmask 1043456  }
  0x61   :  { %116 = vadd.xlane.f32.xlu0 %v115_v5  ;;  %v250_v53 = vunpack.c.0.s8 %v249_v51  ;;  %s3062_s5 = smov 16   ;;  %s3064_s7 = smov 24   ;;  %vm2274_vm4 = vcmask 130048   ;;  %vm2277_vm5 = vcmask 195584   ;;  %vm2520_vm6 = vcmask 523264  }
  0x62   :  { %v282_v62 = vunpack.c.0.s8 %v281_v56  ;;  %s3065_s17 = smov [#allocation11]  }
  0x63   :  { %2691 = vmatpush3.bf16.msra.mxu0 %v2855_v19  ;;  %v3277_v59 = vsub.s32 %v250_v53, %v252_v54 }
  0x64   :  { %2702 = vmatprep.subr.bf16.mxu0 %v3053_v18  ;;  %v3287_v5 = vsub.s32 %v282_v62, %v252_v54 }
  0x65   :  { %119 = vadd.xlane.f32.xlu0 %v118_v6 }
  0xee   :  { %v117_v7 = vpop.xlane.xlu0 %116 }
  0xef   :  { %v122_v8 = vmul.f32 0.03125, %v117_v7 }
  0xf1   :  { %v124_v9 = vsub.f32 %v3208_v3, %v122_v8 }
  0xf2   :  { %v120_v10 = vpop.xlane.xlu0 %119 }
  0xf3   :  { %v123_v11 = vmul.f32 0.03125, %v120_v10  ;;  %v126_v12 = vmul.f32 %v124_v9, %v124_v9 }
  0xf5   :  { %v125_v13 = vsub.f32 %v3210_v4, %v123_v11  ;;  %v128_v14 = vsel %vm114_vm0, %v126_v12, 0.0 }
  0xf6   :  { %129 = vadd.xlane.f32.xlu1 %v128_v14 }
  0xf7   :  { %v127_v15 = vmul.f32 %v125_v13, %v125_v13 }
  0xf9   :  { %v131_v16 = vsel %vm114_vm0, %v127_v15, 0.0 }
  0xfa   :  { %132 = vadd.xlane.f32.xlu1 %v131_v16 }
 0x183   :  { %v130_v20 = vpop.xlane.xlu1 %129 }
 0x184   :  { %v134_v21 = vmul.f32 0.03125, %v130_v20 }
 0x186   :  { %v136_v22 = vadd.f32 1e-06, %v134_v21 }
 0x187   :  { %v133_v23 = vpop.xlane.xlu1 %132 }
 0x188   :  { %2864 = vrsqrt.f32 %v136_v22  ;;  %v135_v24 = vmul.f32 0.03125, %v133_v23 }
 0x18a   :  { %v137_v25 = vadd.f32 1e-06, %v135_v24 }
 0x18c   :  { %2866 = vrsqrt.f32 %v137_v25 }
 0x192   :  { %v2865_v26 = vpop.eup %2864 }
 0x193   :  { %v140_v27 = vmul.f32 %v2865_v26, %v124_v9 }
 0x195   :  { %v148_v31 = vmul.f32 %v2588_v28, %v140_v27 }
 0x196   :  { %v2867_v29 = vpop.eup %2866 }
 0x197   :  { %v141_v30 = vmul.f32 %v2867_v29, %v125_v13  ;;  %v156_v34 = vadd.f32 %v2589_v32, %v148_v31 }
 0x199   :  { %v149_v33 = vmul.f32 %v2588_v28, %v141_v30 }
 0x19b   :  { %v157_v35 = vadd.f32 %v2589_v32, %v149_v33 }
 0x19d   :  { %v158_v36 = vpack.c.bf16 %v157_v35, %v156_v34 }
 0x19f   :  { %2693 = vmatmul.mubr.msk.bf16.vlgmr.msra.gmra.mrb[0].mxu0 %vm114_vm0, %v158_v36 }
 0x1a0   :  { %2704 = vmatprep.mubr.msk.bf16.mxu0 %vm3054_vm1, %v3053_v18 }
 0x272   :  { %v219_v38 = vpop.f32.mrb[0].mxu0 }
 0x273   :  { %v3243_v39 = vadd.f32 %v2590_v37, %v219_v38  ;;  %v2694_v40 = vpop.f32.mrb[1].mxu0 }
 0x274   :  { %v222_v41 = vpop.f32.mrb[2].mxu0 }
 0x275   :  { %234 = vrot.lane.b32.xlu1 %v3243_v39, %s3055_s2  ;;  %228 = vrot.lane.b32.xlu0 %v3243_v39, %s3056_s18  ;;  %v2695_v42 = vpop.f32.mrb[3].mxu0  ;;  %v3247_v43 = vadd.f32 %v2590_v37, %v222_v41 }
 0x279   :  { %240 = vrot.lane.b32.xlu1 %v3243_v39, %s3057_s3  ;;  %236 = vrot.lane.b32.xlu0 %v3247_v43, %s3055_s2  ;;  %s2574_s2 = sshll.u32 %s3065_s17, 4  ;;  %s2575_s2 = int_to_ptr.vmem [resolvable:$true] %s2574_s2 }
 0x27a   :  { %p3023_p13 = scmp.lt.s32.totalorder %s2575_s2, %s2575_s2 }
 0x27d   :  { %526 = vrot.lane.b32.xlu0 %v3243_v39, %s3058_s19  ;;  %230 = vrot.lane.b32.xlu1 %v3247_v43, %s3056_s18  ;;  %s3018_s18 = scalar_lea.vmem %s2575_s2, 256 }
 0x27e   :  { %p3019_p12 = scmp.ne.s32.totalorder %s2575_s2, %s3018_s18  ;;  %p3024_p0 = scmp.lt.s32.totalorder %s3018_s18, %s3018_s18 }
 0x280   :  { %p3025_p1 = por %p3024_p0, %p3023_p13 }
 0x281   :  { %242 = vrot.lane.b32.xlu1 %v3247_v43, %s3057_s3 }
 0x282   :  { %p3026_p2 = pnand %p3025_p1, %p3019_p12 }
 0x2e7   :  { %v3254_v44 = vpop.permute.xlu1 %234  ;;  %v3256_v45 = vpop.permute.xlu0 %228 }
 0x2e8   :  { %534 = vrot.lane.b32.xlu0 %v3254_v44, %s3058_s19  ;;  %530 = vrot.lane.b32.xlu1 %v3256_v45, %s3058_s19  ;;  %v246_v60 = vcombine.low %v3243_v39, %v3254_v44  ;;  %v247_v61 = vcombine.high %v3243_v39, %v3254_v44 }
 0x2ea   :  { %v254_v1 = vrot.slane %v246_v60, %v3277_v59  ;;  %v261_v2 = vrot.slane %v247_v61, %v3277_v59 }
 0x2eb   :  { %v3260_v46 = vpop.permute.xlu1 %240  ;;  %v3264_v47 = vpop.permute.xlu0 %236 }
 0x2ec   :  { %528 = vrot.lane.b32.xlu0 %v3247_v43, %s3058_s19  ;;  %538 = vrot.lane.b32.xlu1 %v3260_v46, %s3058_s19  ;;  %v262_v57 = vcombine.low %v3256_v45, %v3260_v46  ;;  %v263_v58 = vcombine.high %v3256_v45, %v3260_v46  ;;  %v314_v22 = vcombine.low %v3247_v43, %v3264_v47 }
 0x2ed   :  { %v315_v23 = vcombine.high %v3247_v43, %v3264_v47 }
 0x2ee   :  { %v270_v63 = vrot.slane %v262_v57, %v3277_v59  ;;  %v277_v0 = vrot.slane %v263_v58, %v3277_v59  ;;  %v322_v36 = vrot.slane %v314_v22, %v3277_v59 }
 0x2ef   :  { %v3266_v48 = vpop.permute.xlu1 %230  ;;  %v527_v10 = vpop.permute.xlu0 %526  ;;  %v3315_v37 = vrot.slane %v315_v23, %v3277_v59 }
 0x2f0   :  { %536 = vrot.lane.b32.xlu0 %v3264_v47, %s3058_s19  ;;  %532 = vrot.lane.b32.xlu1 %v3266_v48, %s3058_s19  ;;  %v278_v6 = vcombine.low %v254_v1, %v270_v63  ;;  %v279_v7 = vcombine.high %v254_v1, %v270_v63  ;;  %v294_v8 = vcombine.low %v261_v2, %v277_v0 }
 0x2f1   :  { %v295_v9 = vcombine.high %v261_v2, %v277_v0 }
 0x2f2   :  { %v286_v11 = vrot.slane %v278_v6, %v3287_v5  ;;  %v293_v12 = vrot.slane %v279_v7, %v3287_v5  ;;  %v302_v13 = vrot.slane %v294_v8, %v3287_v5 }
 0x2f3   :  { %v3270_v49 = vpop.permute.xlu1 %242  ;;  %v309_v14 = vrot.slane %v295_v9, %v3287_v5 }
 0x2f4   :  { %540 = vrot.lane.b32.xlu1 %v3270_v49, %s3058_s19  ;;  %v382_v17 = vcombine.low %v286_v11, %v293_v12  ;;  %v2594_v19 = vcombine.high %v286_v11, %v293_v12  ;;  %v330_v24 = vcombine.low %v3266_v48, %v3270_v49  ;;  %v331_v25 = vcombine.high %v3266_v48, %v3270_v49 }
 0x2f5   :  { %v398_v20 = vcombine.low %v302_v13, %v309_v14  ;;  %v2595_v21 = vcombine.high %v302_v13, %v309_v14 }
 0x2f6   :  { %v3302_v30 = vrot.slane %v382_v17, %v3277_v59  ;;  %v3305_v31 = vrot.slane %v2594_v19, %v3277_v59  ;;  %v338_v38 = vrot.slane %v330_v24, %v3277_v59  ;;  %v3319_v40 = vrot.slane %v331_v25, %v3277_v59 }
 0x2f7   :  { %v3308_v32 = vrot.slane %v398_v20, %v3277_v59  ;;  %v3311_v33 = vrot.slane %v2595_v21, %v3277_v59 }
 0x2f8   :  { %v414_v53 = vcombine.low %v3302_v30, %v3305_v31  ;;  %v415_v54 = vcombine.high %v3302_v30, %v3305_v31  ;;  %v346_v63 = vcombine.low %v322_v36, %v338_v38  ;;  %v347_v0 = vcombine.high %v322_v36, %v338_v38 }
 0x2f9   :  { %v430_v55 = vcombine.low %v3308_v32, %v3311_v33  ;;  %v431_v56 = vcombine.high %v3308_v32, %v3311_v33  ;;  %v362_v1 = vcombine.low %v3315_v37, %v3319_v40  ;;  %v363_v2 = vcombine.high %v3315_v37, %v3319_v40 }
 0x2fa   :  { %v422_v13 = vrot.slane %v414_v53, %v3287_v5  ;;  %v3344_v20 = vrot.slane %v346_v63, %v3287_v5  ;;  %v3347_v21 = vrot.slane %v347_v0, %v3287_v5 }
 0x2fb   :  { %v438_v14 = vrot.slane %v430_v55, %v3287_v5  ;;  %v370_v63 = vrot.slane %v362_v1, %v3287_v5  ;;  %v377_v0 = vrot.slane %v363_v2, %v3287_v5 }
 0x35a   :  { %v535_v15 = vpop.permute.xlu0 %534  ;;  %v531_v16 = vpop.permute.xlu1 %530 }
 0x35b   :  { %v550_v26 = vcombine.low %v527_v10, %v535_v15  ;;  %v551_v27 = vcombine.high %v527_v10, %v535_v15 }
 0x35d   :  { %v558_v41 = vrot.slane %v550_v26, %v3277_v59  ;;  %v565_v42 = vrot.slane %v551_v27, %v3277_v59 }
 0x35e   :  { %v529_v28 = vpop.permute.xlu0 %528  ;;  %v539_v29 = vpop.permute.xlu1 %538 }
 0x35f   :  { %v566_v34 = vcombine.low %v531_v16, %v539_v29  ;;  %v567_v35 = vcombine.high %v531_v16, %v539_v29 }
 0x361   :  { %v574_v50 = vrot.slane %v566_v34, %v3277_v59  ;;  %v581_v51 = vrot.slane %v567_v35, %v3277_v59 }
 0x362   :  { %v533_v52 = vpop.permute.xlu1 %532  ;;  %v537_v62 = vpop.permute.xlu0 %536 }
 0x363   :  { %v582_v57 = vcombine.low %v558_v41, %v574_v50  ;;  %v583_v58 = vcombine.high %v558_v41, %v574_v50  ;;  %v598_v60 = vcombine.low %v565_v42, %v581_v51  ;;  %v599_v61 = vcombine.high %v565_v42, %v581_v51 }
 0x364   :  { %v618_v10 = vcombine.low %v529_v28, %v537_v62  ;;  %v619_v11 = vcombine.high %v529_v28, %v537_v62 }
 0x365   :  { %v590_v6 = vrot.slane %v582_v57, %v3287_v5  ;;  %v597_v7 = vrot.slane %v583_v58, %v3287_v5  ;;  %v606_v8 = vrot.slane %v598_v60, %v3287_v5  ;;  %v613_v9 = vrot.slane %v599_v61, %v3287_v5 }
 0x366   :  { %v541_v12 = vpop.permute.xlu1 %540  ;;  %v626_v28 = vrot.slane %v618_v10, %v3277_v59  ;;  %v633_v29 = vrot.slane %v619_v11, %v3277_v59 }
 0x367   :  { %v686_v15 = vcombine.low %v590_v6, %v597_v7  ;;  %v2598_v16 = vcombine.high %v590_v6, %v597_v7  ;;  %v702_v17 = vcombine.low %v606_v8, %v613_v9  ;;  %v2599_v19 = vcombine.high %v606_v8, %v613_v9 }
 0x368   :  { %v634_v22 = vcombine.low %v533_v52, %v541_v12  ;;  %v635_v23 = vcombine.high %v533_v52, %v541_v12 }
 0x369   :  { %v693_v24 = vrot.slane %v686_v15, %v3277_v59  ;;  %v701_v25 = vrot.slane %v2598_v16, %v3277_v59  ;;  %v709_v26 = vrot.slane %v702_v17, %v3277_v59  ;;  %v717_v27 = vrot.slane %v2599_v19, %v3277_v59 }
 0x36a   :  { %v642_v34 = vrot.slane %v634_v22, %v3277_v59  ;;  %v649_v35 = vrot.slane %v635_v23, %v3277_v59  ;;  %v446_v16 = vcombine.low %v422_v13, %v438_v14 }
 0x36b   :  { %v718_v36 = vcombine.low %v693_v24, %v701_v25  ;;  %v734_v37 = vcombine.low %v709_v26, %v717_v27  ;;  %v719_v38 = vcombine.high %v693_v24, %v701_v25  ;;  %v735_v40 = vcombine.high %v709_v26, %v717_v27 }
 0x36c   :  { %v650_v41 = vcombine.low %v626_v28, %v642_v34  ;;  %v651_v42 = vcombine.high %v626_v28, %v642_v34  ;;  %v666_v50 = vcombine.low %v633_v29, %v649_v35  ;;  %v667_v51 = vcombine.high %v633_v29, %v649_v35 }
 0x36d   :  { %v726_v52 = vrot.slane %v718_v36, %v3287_v5  ;;  %v742_v53 = vrot.slane %v734_v37, %v3287_v5  ;;  %v733_v55 = vrot.slane %v719_v38, %v3287_v5  ;;  %v749_v57 = vrot.slane %v735_v40, %v3287_v5 }
 0x36e   :  { %v658_v58 = vrot.slane %v650_v41, %v3287_v5  ;;  %v665_v60 = vrot.slane %v651_v42, %v3287_v5  ;;  %v674_v61 = vrot.slane %v666_v50, %v3287_v5  ;;  %v681_v62 = vrot.slane %v667_v51, %v3287_v5 }
 0x36f   :  { %v750_v6 = vcombine.low %v726_v52, %v742_v53  ;;  %v751_v7 = vcombine.high %v726_v52, %v742_v53  ;;  %v752_v17 = vcombine.low %v733_v55, %v749_v57  ;;  %v447_v25 = vcombine.high %v422_v13, %v438_v14 }
 0x370   :  { %v754_v8 = vcombine.low %v658_v58, %v665_v60  ;;  %v2600_v9 = vcombine.high %v658_v58, %v665_v60  ;;  %v770_v10 = vcombine.low %v674_v61, %v681_v62  ;;  %v2601_v11 = vcombine.high %v674_v61, %v681_v62 }
 0x371   :  { %v822_v12 = vpack.c.bf16 %v750_v6, %v750_v6  ;;  %v823_v15 = vpack.c.bf16 %v751_v7, %v751_v7  ;;  %v753_v26 = vcombine.high %v733_v55, %v749_v57  ;;  %v450_v27 = vcombine.low %v3344_v20, %v3347_v21 }
 0x372   :  { %v761_v19 = vrot.slane %v754_v8, %v3277_v59  ;;  %v769_v22 = vrot.slane %v2600_v9, %v3277_v59  ;;  %v777_v23 = vrot.slane %v770_v10, %v3277_v59  ;;  %v785_v1 = vrot.slane %v2601_v11, %v3277_v59 }
 0x373   :  { %v1139_v2 = vsel %vm1134_vm2, %v822_v12, 0  ;;  %v1185_v24 = vsel %vm1134_vm2, %v823_v15, 0  ;;  %v2596_v34 = vcombine.high %v3344_v20, %v3347_v21  ;;  %v466_v35 = vcombine.low %v370_v63, %v377_v0 }
 0x374   :  { %2697 = vmatpush3.bf16.xpose.msra.mxu1 %v1139_v2  ;;  %2703 = vmatpush3.bf16.xpose.msra.mxu0 %v1185_v24  ;;  %v786_v28 = vcombine.low %v761_v19, %v769_v22  ;;  %v802_v29 = vcombine.low %v777_v23, %v785_v1  ;;  %v2597_v36 = vcombine.high %v370_v63, %v377_v0 }
 0x375   :  { %2708 = vmatprep.subr.bf16.mxu1 %v3053_v18  ;;  %2714 = vmatprep.subr.bf16.mxu0 %v3053_v18  ;;  %v824_v37 = vpack.c.bf16 %v752_v17, %v752_v17  ;;  %v825_v38 = vpack.c.bf16 %v753_v26, %v753_v26  ;;  %v518_v40 = vpack.c.bf16 %v446_v16, %v446_v16 }
 0x376   :  { %v794_v13 = vrot.slane %v786_v28, %v3287_v5  ;;  %v810_v14 = vrot.slane %v802_v29, %v3287_v5  ;;  %v519_v41 = vpack.c.bf16 %v447_v25, %v447_v25  ;;  %v429_v42 = vrot.slane %v415_v54, %v3287_v5 }
 0x377   :  { %v445_v20 = vrot.slane %v431_v56, %v3287_v5  ;;  %v457_v21 = vrot.slane %v450_v27, %v3277_v59  ;;  %v465_v50 = vrot.slane %v2596_v34, %v3277_v59  ;;  %v473_v51 = vrot.slane %v466_v35, %v3277_v59 }
 0x378   :  { %v481_v52 = vrot.slane %v2597_v36, %v3277_v59  ;;  %v1231_v53 = vsel %vm1134_vm2, %v824_v37, 0  ;;  %v787_v55 = vcombine.high %v761_v19, %v769_v22  ;;  %v1277_v30 = vsel %vm1134_vm2, %v825_v38, 0 }
 0x379   :  { %v818_v31 = vcombine.low %v794_v13, %v810_v14  ;;  %v819_v32 = vcombine.high %v794_v13, %v810_v14  ;;  %v803_v33 = vcombine.high %v777_v23, %v785_v1  ;;  %v448_v54 = vcombine.low %v429_v42, %v445_v20 }
 0x37a   :  { %v449_v56 = vcombine.high %v429_v42, %v445_v20  ;;  %v482_v57 = vcombine.low %v457_v21, %v465_v50  ;;  %v498_v58 = vcombine.low %v473_v51, %v481_v52  ;;  %v801_v62 = vrot.slane %v787_v55, %v3287_v5 }
 0x37b   :  { %2699 = vmatmul.mubr.msk.bf16.vlgmr.msra.gmra.mrb[0].mxu1 %vm1134_vm2, %v518_v40  ;;  %2705 = vmatmul.mubr.msk.bf16.vlgmr.msra.gmra.mrb[4].mxu0 %vm1134_vm2, %v519_v41  ;;  %v826_v60 = vpack.c.bf16 %v818_v31, %v818_v31  ;;  %v827_v61 = vpack.c.bf16 %v819_v32, %v819_v32  ;;  %v817_v63 = vrot.slane %v803_v33, %v3287_v5 }
 0x37c   :  { %2709 = vmatpush3.bf16.xpose.msra.mxu1 %v1231_v53  ;;  %2715 = vmatpush3.bf16.xpose.msra.mxu0 %v1277_v30  ;;  %v520_v0 = vpack.c.bf16 %v448_v54, %v448_v54  ;;  %v521_v6 = vpack.c.bf16 %v449_v56, %v449_v56  ;;  %v490_v7 = vrot.slane %v482_v57, %v3287_v5 }
 0x37d   :  { %2710 = vmatprep.mubr.msk.bf16.mxu1 %vm3054_vm1, %v3053_v18  ;;  %2716 = vmatprep.mubr.msk.bf16.mxu0 %vm3054_vm1, %v3053_v18  ;;  %v506_v8 = vrot.slane %v498_v58, %v3287_v5  ;;  %v1323_v9 = vsel %vm1134_vm2, %v826_v60, 0  ;;  %v1369_v10 = vsel %vm1134_vm2, %v827_v61, 0  ;;  %v820_v11 = vcombine.low %v801_v62, %v817_v63 }
 0x37e   :  { %2720 = vmatprep.subr.bf16.mxu1 %v3053_v18  ;;  %2726 = vmatprep.subr.bf16.mxu0 %v3053_v18  ;;  %v821_v12 = vcombine.high %v801_v62, %v817_v63  ;;  %v483_v15 = vcombine.high %v457_v21, %v465_v50  ;;  %v499_v19 = vcombine.high %v473_v51, %v481_v52 }
 0x37f   :  { %v514_v16 = vcombine.low %v490_v7, %v506_v8  ;;  %v515_v17 = vcombine.high %v490_v7, %v506_v8  ;;  %v828_v22 = vpack.c.bf16 %v820_v11, %v820_v11 }
 0x380   :  { %v829_v23 = vpack.c.bf16 %v821_v12, %v821_v12  ;;  %v497_v24 = vrot.slane %v483_v15, %v3287_v5  ;;  %v513_v25 = vrot.slane %v499_v19, %v3287_v5 }
 0x381   :  { %v522_v1 = vpack.c.bf16 %v514_v16, %v514_v16  ;;  %v523_v2 = vpack.c.bf16 %v515_v17, %v515_v17  ;;  %v1415_v26 = vsel %vm1134_vm2, %v828_v22, 0 }
 0x382   :  { %v1461_v27 = vsel %vm1134_vm2, %v829_v23, 0  ;;  %v516_v28 = vcombine.low %v497_v24, %v513_v25  ;;  %v517_v29 = vcombine.high %v497_v24, %v513_v25 }
 0x383   :  { %2711 = vmatmul.mubr.msk.bf16.vlgmr.msra.gmra.mrb[4].mxu1 %vm1134_vm2, %v520_v0  ;;  %2717 = vmatmul.mubr.msk.bf16.vlgmr.msra.gmra.mrb[8].mxu0 %vm1134_vm2, %v521_v6 }
 0x384   :  { %2721 = vmatpush3.bf16.xpose.msra.mxu1 %v1323_v9  ;;  %2727 = vmatpush3.bf16.xpose.msra.mxu0 %v1369_v10  ;;  %v524_v34 = vpack.c.bf16 %v516_v28, %v516_v28  ;;  %v525_v35 = vpack.c.bf16 %v517_v29, %v517_v29 }
 0x385   :  { %2722 = vmatprep.mubr.msk.bf16.mxu1 %vm3054_vm1, %v3053_v18  ;;  %2728 = vmatprep.mubr.msk.bf16.mxu0 %vm3054_vm1, %v3053_v18 }
 0x386   :  { %2732 = vmatprep.subr.bf16.mxu1 %v3053_v18  ;;  %2738 = vmatprep.subr.bf16.mxu0 %v3053_v18 }
 0x38b   :  { %2723 = vmatmul.mubr.msk.bf16.vlgmr.msra.gmra.mrb[8].mxu1 %vm1134_vm2, %v522_v1  ;;  %2729 = vmatmul.mubr.msk.bf16.vlgmr.msra.gmra.mrb[12].mxu0 %vm1134_vm2, %v523_v2 }
 0x38c   :  { %2733 = vmatpush3.bf16.xpose.msra.mxu1 %v1415_v26  ;;  %2739 = vmatpush3.bf16.xpose.msra.mxu0 %v1461_v27 }
 0x38d   :  { %2734 = vmatprep.mubr.msk.bf16.mxu1 %vm3054_vm1, %v3053_v18  ;;  %2740 = vmatprep.mubr.msk.bf16.mxu0 %vm3054_vm1, %v3053_v18 }
 0x38e   :  { %2744 = vmatprep.subr.bf16.mxu1 %v3053_v18  ;;  %2750 = vmatprep.subr.bf16.mxu0 %v3053_v18 }
 0x393   :  { %2735 = vmatmul.mubr.msk.bf16.vlgmr.msra.gmra.mrb[12].mxu1 %vm1134_vm2, %v524_v34  ;;  %2741 = vmatmul.mubr.msk.bf16.vlgmr.msra.gmra.mrb[16].mxu0 %vm1134_vm2, %v525_v35 }
 0x394   :  { %2746 = vmatprep.mubr.msk.bf16.mxu1 %vm3054_vm1, %v3053_v18  ;;  %2752 = vmatprep.mubr.msk.bf16.mxu0 %vm3054_vm1, %v3053_v18 }
 0x44e   :  { %v1175_v36 = vpop.f32.mrb[0].mxu1  ;;  %v1221_v37 = vpop.f32.mrb[4].mxu0 }
 0x44f   :  { %v3435_v38 = vmul.f32 0.35355338, %v1175_v36  ;;  %v3437_v13 = vmul.f32 0.35355338, %v1221_v37  ;;  %v2700_v14 = vpop.f32.mrb[1].mxu1  ;;  %v2706_v40 = vpop.f32.mrb[5].mxu0 }
 0x450   :  { %v1178_v41 = vpop.f32.mrb[2].mxu1  ;;  %v1224_v42 = vpop.f32.mrb[6].mxu0 }
 0x451   :  { %v2701_v20 = vpop.f32.mrb[3].mxu1  ;;  %v2707_v21 = vpop.f32.mrb[7].mxu0  ;;  %v1511_v50 = vsel %vm1134_vm2, %v3435_v38, -inf  ;;  %v1514_v51 = vsel %vm1134_vm2, %v3437_v13, -inf }
 0x452   :  { %1512 = vmax.xlane.f32.xlu0 %v1511_v50  ;;  %1515 = vmax.xlane.f32.xlu1 %v1514_v51 }
 0x456   :  { %v1267_v52 = vpop.f32.mrb[4].mxu1  ;;  %v1313_v53 = vpop.f32.mrb[8].mxu0 }
 0x457   :  { %v1505_v55 = vmul.f32 0.35355338, %v1267_v52  ;;  %v2712_v30 = vpop.f32.mrb[5].mxu1  ;;  %v2718_v31 = vpop.f32.mrb[9].mxu0  ;;  %v1506_v54 = vmul.f32 0.35355338, %v1313_v53 }
 0x458   :  { %v1270_v32 = vpop.f32.mrb[6].mxu1  ;;  %v1316_v33 = vpop.f32.mrb[10].mxu0 }
 0x459   :  { %v2713_v56 = vpop.f32.mrb[7].mxu1  ;;  %v2719_v57 = vpop.f32.mrb[11].mxu0  ;;  %v1517_v58 = vsel %vm1134_vm2, %v1505_v55, -inf  ;;  %v1520_v60 = vsel %vm1134_vm2, %v1506_v54, -inf }
 0x45a   :  { %1518 = vmax.xlane.f32.xlu0 %v1517_v58 }
 0x45e   :  { %v1359_v61 = vpop.f32.mrb[8].mxu1  ;;  %1521 = vmax.xlane.f32.xlu0 %v1520_v60  ;;  %v1405_v62 = vpop.f32.mrb[12].mxu0 }
 0x45f   :  { %v1507_v63 = vmul.f32 0.35355338, %v1359_v61  ;;  %v1508_v0 = vmul.f32 0.35355338, %v1405_v62  ;;  %v2724_v6 = vpop.f32.mrb[9].mxu1  ;;  %v2730_v7 = vpop.f32.mrb[13].mxu0 }
 0x460   :  { %v1362_v8 = vpop.f32.mrb[10].mxu1  ;;  %v1408_v9 = vpop.f32.mrb[14].mxu0 }
 0x461   :  { %v2725_v10 = vpop.f32.mrb[11].mxu1  ;;  %v2731_v11 = vpop.f32.mrb[15].mxu0  ;;  %v1523_v12 = vsel %vm1134_vm2, %v1507_v63, -inf  ;;  %v1526_v15 = vsel %vm1134_vm2, %v1508_v0, -inf }
 0x462   :  { %1524 = vmax.xlane.f32.xlu0 %v1523_v12  ;;  %1527 = vmax.xlane.f32.xlu1 %v1526_v15 }
 0x466   :  { %v1451_v16 = vpop.f32.mrb[12].mxu1  ;;  %v1497_v17 = vpop.f32.mrb[16].mxu0 }
 0x467   :  { %v3447_v19 = vmul.f32 0.35355338, %v1451_v16  ;;  %v2736_v22 = vpop.f32.mrb[13].mxu1  ;;  %v2742_v23 = vpop.f32.mrb[17].mxu0  ;;  %v1510_v27 = vmul.f32 0.35355338, %v1497_v17 }
 0x468   :  { %v1454_v1 = vpop.f32.mrb[14].mxu1  ;;  %v1500_v2 = vpop.f32.mrb[18].mxu0 }
 0x469   :  { %v2737_v24 = vpop.f32.mrb[15].mxu1  ;;  %v2743_v25 = vpop.f32.mrb[19].mxu0  ;;  %v1529_v26 = vsel %vm1134_vm2, %v3447_v19, -inf  ;;  %v1532_v28 = vsel %vm1134_vm2, %v1510_v27, -inf }
 0x46a   :  { %1530 = vmax.xlane.f32.xlu0 %v1529_v26 }
 0x473   :  { %834 = vrot.lane.b32.xlu1 %v3256_v45, %s3061_s8 }
 0x477   :  { %838 = vrot.lane.b32.xlu1 %v3254_v44, %s3061_s8 }
 0x480   :  { %830 = vrot.lane.b32.xlu0 %v3243_v39, %s3061_s8 }
 0x49b   :  { %1533 = vmax.xlane.f32.xlu1 %v1532_v28 }
 0x4ac   :  { %842 = vrot.lane.b32.xlu1 %v3260_v46, %s3061_s8 }
 0x4df   :  { %v1513_v29 = vpop.xlane.xlu0 %1512  ;;  %v1516_v34 = vpop.xlane.xlu1 %1515 }
 0x4e0   :  { %v1535_v35 = vsub.f32 %v3435_v38, %v1513_v29  ;;  %v1536_v36 = vsub.f32 %v3437_v13, %v1516_v34 }
 0x4e2   :  { %v1543_v45 = vmul.f32 1.442695, %v1535_v35  ;;  %v1545_v37 = vmul.f32 1.442695, %v1536_v36 }
 0x4e4   :  { %2868 = vpow2.f32 %v1543_v45 }
 0x4e5   :  { %2870 = vpow2.f32 %v1545_v37 }
 0x4e7   :  { %v1519_v44 = vpop.xlane.xlu0 %1518 }
 0x4e8   :  { %v1537_v14 = vsub.f32 %v1505_v55, %v1519_v44 }
 0x4ea   :  { %v1547_v39 = vmul.f32 1.442695, %v1537_v14 }
 0x4eb   :  { %v1522_v40 = vpop.xlane.xlu0 %1521 }
 0x4ec   :  { %2872 = vpow2.f32 %v1547_v39  ;;  %v1538_v41 = vsub.f32 %v1506_v54, %v1522_v40 }
 0x4ee   :  { %v3462_v42 = vpop.eup %2868  ;;  %v1549_v20 = vmul.f32 1.442695, %v1538_v41 }
 0x4ef   :  { %v3464_v46 = vpop.eup %2870  ;;  %v1525_v21 = vpop.xlane.xlu0 %1524  ;;  %v1559_v38 = vsel %vm1134_vm2, %v3462_v42, 0.0 }
 0x4f0   :  { %v1528_v50 = vpop.xlane.xlu1 %1527  ;;  %2874 = vpow2.f32 %v1549_v20  ;;  %v1539_v13 = vsub.f32 %v1507_v63, %v1525_v21  ;;  %1560 = vadd.xlane.f32.xlu0 %v1559_v38  ;;  %v1562_v52 = vsel %vm1134_vm2, %v3464_v46, 0.0 }
 0x4f1   :  { %v1540_v51 = vsub.f32 %v1508_v0, %v1528_v50  ;;  %1563 = vadd.xlane.f32.xlu1 %v1562_v52 }
 0x4f2   :  { %v1551_v53 = vmul.f32 1.442695, %v1539_v13 }
 0x4f3   :  { %v1553_v55 = vmul.f32 1.442695, %v1540_v51 }
 0x4f4   :  { %2876 = vpow2.f32 %v1551_v53  ;;  %v835_v60 = vpop.permute.xlu1 %834 }
 0x4f5   :  { %2878 = vpow2.f32 %v1553_v55 }
 0x4f6   :  { %v3470_v30 = vpop.eup %2872 }
 0x4f7   :  { %v1565_v31 = vsel %vm1134_vm2, %v3470_v30, 0.0  ;;  %v1531_v61 = vpop.xlane.xlu0 %1530 }
 0x4f8   :  { %1566 = vadd.xlane.f32.xlu0 %v1565_v31  ;;  %v1541_v62 = vsub.f32 %v3447_v19, %v1531_v61  ;;  %v839_v63 = vpop.permute.xlu1 %838 }
 0x4fa   :  { %v3474_v32 = vpop.eup %2874  ;;  %v1555_v0 = vmul.f32 1.442695, %v1541_v62 }
 0x4fb   :  { %v1568_v33 = vsel %vm1134_vm2, %v3474_v32, 0.0  ;;  %v831_v6 = vpop.permute.xlu0 %830 }
 0x4fc   :  { %1569 = vadd.xlane.f32.xlu1 %v1568_v33  ;;  %2880 = vpow2.f32 %v1555_v0  ;;  %v855_v9 = vcombine.high %v831_v6, %v839_v63 }
 0x4fe   :  { %v3478_v54 = vpop.eup %2876 }
 0x4ff   :  { %v1571_v56 = vsel %vm1134_vm2, %v3478_v54, 0.0  ;;  %v3482_v57 = vpop.eup %2878 }
 0x500   :  { %1572 = vadd.xlane.f32.xlu0 %v1571_v56  ;;  %v1574_v58 = vsel %vm1134_vm2, %v3482_v57, 0.0 }
 0x504   :  { %1575 = vadd.xlane.f32.xlu0 %v1574_v58 }
 0x506   :  { %v3503_v26 = vpop.eup %2880 }
 0x507   :  { %v1577_v14 = vsel %vm1134_vm2, %v3503_v26, 0.0 }
 0x50d   :  { %836 = vrot.lane.b32.xlu1 %v3266_v48, %s3061_s8  ;;  %v854_v48 = vcombine.low %v831_v6, %v839_v63 }
 0x50f   :  { %v862_v12 = vrot.slane %v854_v48, %v3277_v59 }
 0x511   :  { %840 = vrot.lane.b32.xlu1 %v3264_v47, %s3061_s8 }
 0x515   :  { %844 = vrot.lane.b32.xlu1 %v3270_v49, %s3061_s8 }
 0x51a   :  { %832 = vrot.lane.b32.xlu0 %v3247_v43, %s3061_s8  ;;  %v869_v43 = vrot.slane %v855_v9, %v3277_v59 }
 0x528   :  { %v1534_v7 = vpop.xlane.xlu1 %1533 }
 0x529   :  { %v1542_v8 = vsub.f32 %v1510_v27, %v1534_v7 }
 0x52b   :  { %v1557_v10 = vmul.f32 1.442695, %v1542_v8 }
 0x52c   :  { %v843_v47 = vpop.permute.xlu1 %842 }
 0x52d   :  { %2882 = vpow2.f32 %v1557_v10  ;;  %v870_v11 = vcombine.low %v835_v60, %v843_v47  ;;  %v871_v49 = vcombine.high %v835_v60, %v843_v47 }
 0x52f   :  { %v878_v15 = vrot.slane %v870_v11, %v3277_v59  ;;  %v885_v16 = vrot.slane %v871_v49, %v3277_v59 }
 0x531   :  { %v886_v17 = vcombine.low %v862_v12, %v878_v15  ;;  %v887_v19 = vcombine.high %v862_v12, %v878_v15  ;;  %v902_v22 = vcombine.low %v869_v43, %v885_v16  ;;  %v903_v23 = vcombine.high %v869_v43, %v885_v16 }
 0x533   :  { %v894_v1 = vrot.slane %v886_v17, %v3287_v5  ;;  %v901_v2 = vrot.slane %v887_v19, %v3287_v5  ;;  %v910_v24 = vrot.slane %v902_v22, %v3287_v5  ;;  %v917_v25 = vrot.slane %v903_v23, %v3287_v5 }
 0x535   :  { %v990_v27 = vcombine.low %v894_v1, %v901_v2  ;;  %v2602_v28 = vcombine.high %v894_v1, %v901_v2  ;;  %v1006_v29 = vcombine.low %v910_v24, %v917_v25  ;;  %v2603_v34 = vcombine.high %v910_v24, %v917_v25 }
 0x537   :  { %v3505_v35 = vpop.eup %2882  ;;  %v997_v36 = vrot.slane %v990_v27, %v3277_v59  ;;  %v1005_v45 = vrot.slane %v2602_v28, %v3277_v59  ;;  %v1013_v37 = vrot.slane %v1006_v29, %v3277_v59  ;;  %v1021_v44 = vrot.slane %v2603_v34, %v3277_v59 }
 0x538   :  { %v1580_v39 = vsel %vm1134_vm2, %v3505_v35, 0.0 }
 0x539   :  { %1578 = vadd.xlane.f32.xlu0 %v1577_v14  ;;  %1581 = vadd.xlane.f32.xlu1 %v1580_v39  ;;  %v1022_v40 = vcombine.low %v997_v36, %v1005_v45  ;;  %v1038_v41 = vcombine.low %v1013_v37, %v1021_v44  ;;  %v1023_v20 = vcombine.high %v997_v36, %v1005_v45 }
 0x53a   :  { %v1039_v21 = vcombine.high %v1013_v37, %v1021_v44 }
 0x53b   :  { %v1030_v50 = vrot.slane %v1022_v40, %v3287_v5  ;;  %v1046_v38 = vrot.slane %v1038_v41, %v3287_v5  ;;  %v1037_v13 = vrot.slane %v1023_v20, %v3287_v5 }
 0x53c   :  { %v1053_v51 = vrot.slane %v1039_v21, %v3287_v5 }
 0x53d   :  { %v1054_v52 = vcombine.low %v1030_v50, %v1046_v38  ;;  %v1055_v53 = vcombine.high %v1030_v50, %v1046_v38 }
 0x53e   :  { %v1056_v55 = vcombine.low %v1037_v13, %v1053_v51  ;;  %v1057_v31 = vcombine.high %v1037_v13, %v1053_v51 }
 0x53f   :  { %v1126_v33 = vpack.c.bf16 %v1054_v52, %v1054_v52  ;;  %v1127_v56 = vpack.c.bf16 %v1055_v53, %v1055_v53 }
 0x540   :  { %v1128_v48 = vpack.c.bf16 %v1056_v55, %v1056_v55  ;;  %v1129_v10 = vpack.c.bf16 %v1057_v31, %v1057_v31 }
 0x541   :  { %v1612_v58 = vsel %vm1610_vm3, %v1126_v33, 0  ;;  %v1658_v60 = vsel %vm1610_vm3, %v1127_v56, 0 }
 0x542   :  { %2745 = vmatpush3.bf16.msra.mxu1 %v1612_v58  ;;  %2751 = vmatpush3.bf16.msra.mxu0 %v1658_v60  ;;  %v1704_v12 = vsel %vm1610_vm3, %v1128_v48, 0  ;;  %v1750_v15 = vsel %vm1610_vm3, %v1129_v10, 0 }
 0x543   :  { %2756 = vmatprep.subr.bf16.mxu1 %v3053_v18  ;;  %2762 = vmatprep.subr.bf16.mxu0 %v3053_v18 }
 0x57d   :  { %v1561_v61 = vpop.xlane.xlu0 %1560 }
 0x57e   :  { %2884 = vrcp.f32 %v1561_v61  ;;  %v1564_v62 = vpop.xlane.xlu1 %1563 }
 0x57f   :  { %2886 = vrcp.f32 %v1564_v62 }
 0x585   :  { %v1567_v63 = vpop.xlane.xlu0 %1566 }
 0x586   :  { %2888 = vrcp.f32 %v1567_v63 }
 0x588   :  { %v2885_v0 = vpop.eup %2884 }
 0x589   :  { %v2887_v6 = vpop.eup %2886  ;;  %v1591_v7 = vmul.f32 %v2885_v0, %v3462_v42  ;;  %v1570_v8 = vpop.xlane.xlu1 %1569 }
 0x58a   :  { %v1592_v9 = vmul.f32 %v2887_v6, %v3464_v46  ;;  %2890 = vrcp.f32 %v1570_v8 }
 0x58b   :  { %v1599_v47 = vpack.c.bf16 %v1591_v7, %v1591_v7 }
 0x58c   :  { %v1600_v11 = vpack.c.bf16 %v1592_v9, %v1592_v9 }
 0x58d   :  { %v1573_v49 = vpop.xlane.xlu0 %1572  ;;  %2747 = vmatmul.mubr.msk.bf16.vlgmr.msra.gmra.mrb[16].mxu1 %vm1134_vm2, %v1599_v47  ;;  %v837_v43 = vpop.permute.xlu1 %836 }
 0x58e   :  { %2753 = vmatmul.mubr.msk.bf16.vlgmr.msra.gmra.mrb[20].mxu0 %vm1134_vm2, %v1600_v11  ;;  %2757 = vmatpush3.bf16.msra.mxu1 %v1704_v12  ;;  %2892 = vrcp.f32 %v1573_v49 }
 0x58f   :  { %2763 = vmatpush3.bf16.msra.mxu0 %v1750_v15  ;;  %2758 = vmatprep.mubr.msk.bf16.mxu1 %vm3054_vm1, %v3053_v18 }
 0x590   :  { %v2889_v42 = vpop.eup %2888  ;;  %2764 = vmatprep.mubr.msk.bf16.mxu0 %vm3054_vm1, %v3053_v18  ;;  %2768 = vmatprep.subr.bf16.mxu1 %v3053_v18 }
 0x591   :  { %v1593_v46 = vmul.f32 %v2889_v42, %v3470_v30  ;;  %v1576_v16 = vpop.xlane.xlu0 %1575  ;;  %v841_v17 = vpop.permute.xlu1 %840  ;;  %2774 = vmatprep.subr.bf16.mxu0 %v3053_v18 }
 0x592   :  { %2894 = vrcp.f32 %v1576_v16 }
 0x593   :  { %v1601_v19 = vpack.c.bf16 %v1593_v46, %v1593_v46 }
 0x594   :  { %v2891_v22 = vpop.eup %2890 }
 0x595   :  { %v1594_v23 = vmul.f32 %v2891_v22, %v3474_v32  ;;  %v833_v1 = vpop.permute.xlu0 %832  ;;  %2759 = vmatmul.mubr.msk.bf16.vlgmr.msra.gmra.mrb[20].mxu1 %vm1134_vm2, %v1601_v19  ;;  %v845_v2 = vpop.permute.xlu1 %844 }
 0x596   :  { %v922_v24 = vcombine.low %v833_v1, %v841_v17  ;;  %v923_v25 = vcombine.high %v833_v1, %v841_v17  ;;  %v938_v27 = vcombine.low %v837_v43, %v845_v2  ;;  %v939_v28 = vcombine.high %v837_v43, %v845_v2  ;;  %2770 = vmatprep.mubr.msk.bf16.mxu1 %vm3054_vm1, %v3053_v18 }
 0x597   :  { %v1602_v30 = vpack.c.bf16 %v1594_v23, %v1594_v23 }
 0x598   :  { %v930_v29 = vrot.slane %v922_v24, %v3277_v59  ;;  %v937_v34 = vrot.slane %v923_v25, %v3277_v59  ;;  %v946_v36 = vrot.slane %v938_v27, %v3277_v59  ;;  %v953_v32 = vrot.slane %v939_v28, %v3277_v59  ;;  %v2893_v60 = vpop.eup %2892 }
 0x599   :  { %2765 = vmatmul.mubr.msk.bf16.vlgmr.msra.gmra.mrb[24].mxu0 %vm1134_vm2, %v1602_v30  ;;  %v1595_v10 = vmul.f32 %v2893_v60, %v3478_v54 }
 0x59a   :  { %v954_v45 = vcombine.low %v930_v29, %v946_v36  ;;  %v955_v37 = vcombine.high %v930_v29, %v946_v36  ;;  %v970_v44 = vcombine.low %v937_v34, %v953_v32  ;;  %v971_v14 = vcombine.high %v937_v34, %v953_v32  ;;  %2776 = vmatprep.mubr.msk.bf16.mxu0 %vm3054_vm1, %v3053_v18 }
 0x59b   :  { %v1603_v46 = vpack.c.bf16 %v1595_v10, %v1595_v10 }
 0x59c   :  { %v962_v39 = vrot.slane %v954_v45, %v3287_v5  ;;  %v969_v40 = vrot.slane %v955_v37, %v3287_v5  ;;  %v978_v41 = vrot.slane %v970_v44, %v3287_v5  ;;  %v985_v20 = vrot.slane %v971_v14, %v3287_v5  ;;  %v2895_v6 = vpop.eup %2894 }
 0x59d   :  { %v1596_v47 = vmul.f32 %v2895_v6, %v3482_v57 }
 0x59e   :  { %v1058_v21 = vcombine.low %v962_v39, %v969_v40  ;;  %v2604_v50 = vcombine.high %v962_v39, %v969_v40  ;;  %v1074_v38 = vcombine.low %v978_v41, %v985_v20  ;;  %v2605_v13 = vcombine.high %v978_v41, %v985_v20 }
 0x59f   :  { %v1604_v16 = vpack.c.bf16 %v1596_v47, %v1596_v47 }
 0x5a0   :  { %v1065_v51 = vrot.slane %v1058_v21, %v3277_v59  ;;  %v1073_v52 = vrot.slane %v2604_v50, %v3277_v59  ;;  %v1081_v53 = vrot.slane %v1074_v38, %v3277_v59  ;;  %v1089_v55 = vrot.slane %v2605_v13, %v3277_v59 }
 0x5a2   :  { %v1090_v31 = vcombine.low %v1065_v51, %v1073_v52  ;;  %v1106_v33 = vcombine.low %v1081_v53, %v1089_v55  ;;  %v1091_v56 = vcombine.high %v1065_v51, %v1073_v52  ;;  %v1107_v58 = vcombine.high %v1081_v53, %v1089_v55 }
 0x5a4   :  { %v1098_v61 = vrot.slane %v1090_v31, %v3287_v5  ;;  %v1114_v62 = vrot.slane %v1106_v33, %v3287_v5  ;;  %v1105_v63 = vrot.slane %v1091_v56, %v3287_v5  ;;  %v1121_v0 = vrot.slane %v1107_v58, %v3287_v5 }
 0x5a6   :  { %v1122_v7 = vcombine.low %v1098_v61, %v1114_v62  ;;  %v1123_v8 = vcombine.high %v1098_v61, %v1114_v62  ;;  %v1124_v48 = vcombine.low %v1105_v63, %v1121_v0  ;;  %v1125_v9 = vcombine.high %v1105_v63, %v1121_v0 }
 0x5a8   :  { %v1130_v11 = vpack.c.bf16 %v1122_v7, %v1122_v7  ;;  %v1131_v49 = vpack.c.bf16 %v1123_v8, %v1123_v8  ;;  %v1132_v15 = vpack.c.bf16 %v1124_v48, %v1124_v48  ;;  %v1133_v42 = vpack.c.bf16 %v1125_v9, %v1125_v9 }
 0x5aa   :  { %v1796_v12 = vsel %vm1610_vm3, %v1130_v11, 0  ;;  %v1842_v43 = vsel %vm1610_vm3, %v1131_v49, 0  ;;  %v1888_v54 = vsel %vm1610_vm3, %v1132_v15, 0  ;;  %v1934_v57 = vsel %vm1610_vm3, %v1133_v42, 0 }
 0x5ab   :  { %2769 = vmatpush3.bf16.msra.mxu1 %v1796_v12  ;;  %2775 = vmatpush3.bf16.msra.mxu0 %v1842_v43 }
 0x5ac   :  { %2780 = vmatprep.subr.bf16.mxu1 %v3053_v18  ;;  %2786 = vmatprep.subr.bf16.mxu0 %v3053_v18 }
 0x5ae   :  { %2771 = vmatmul.mubr.msk.bf16.vlgmr.msra.gmra.mrb[24].mxu1 %vm1134_vm2, %v1603_v46  ;;  %2777 = vmatmul.mubr.msk.bf16.vlgmr.msra.gmra.mrb[28].mxu0 %vm1134_vm2, %v1604_v16 }
 0x5af   :  { %2781 = vmatpush3.bf16.msra.mxu1 %v1888_v54  ;;  %2787 = vmatpush3.bf16.msra.mxu0 %v1934_v57 }
 0x5b0   :  { %2782 = vmatprep.mubr.msk.bf16.mxu1 %vm3054_vm1, %v3053_v18  ;;  %2788 = vmatprep.mubr.msk.bf16.mxu0 %vm3054_vm1, %v3053_v18 }
 0x5b1   :  { %2792 = vmatprep.subr.bf16.mxu1 %v3053_v18  ;;  %2800 = vmatprep.subr.bf16.mxu0 %v3053_v18 }
 0x5c6   :  { %v1579_v17 = vpop.xlane.xlu0 %1578  ;;  %v1582_v19 = vpop.xlane.xlu1 %1581 }
 0x5c7   :  { %2896 = vrcp.f32 %v1579_v17 }
 0x5c8   :  { %2898 = vrcp.f32 %v1582_v19 }
 0x5d1   :  { %v2897_v22 = vpop.eup %2896 }
 0x5d2   :  { %v2899_v23 = vpop.eup %2898  ;;  %v1597_v1 = vmul.f32 %v2897_v22, %v3503_v26 }
 0x5d3   :  { %v1598_v2 = vmul.f32 %v2899_v23, %v3505_v35 }
 0x5d4   :  { %v1605_v24 = vpack.c.bf16 %v1597_v1, %v1597_v1 }
 0x5d5   :  { %v1606_v25 = vpack.c.bf16 %v1598_v2, %v1598_v2 }
 0x5d6   :  { %2783 = vmatmul.mubr.msk.bf16.vlgmr.msra.gmra.mrb[28].mxu1 %vm1134_vm2, %v1605_v24 }
 0x5d7   :  { %2789 = vmatmul.mubr.msk.bf16.vlgmr.msra.gmra.mrb[32].mxu0 %vm1134_vm2, %v1606_v25  ;;  %2796 = vmatprep.mubr.msk.bf16.mxu1 %vm3054_vm1, %v3053_v18 }
 0x5d8   :  { %2804 = vmatprep.mubr.msk.bf16.mxu0 %vm3054_vm1, %v3053_v18 }
 0x660   :  { %v1648_v27 = vpop.f32.mrb[16].mxu1 }
 0x661   :  { %v1694_v28 = vpop.f32.mrb[20].mxu0  ;;  %v2748_v30 = vpop.f32.mrb[17].mxu1 }
 0x662   :  { %v2754_v29 = vpop.f32.mrb[21].mxu0  ;;  %v1651_v34 = vpop.f32.mrb[18].mxu1 }
 0x663   :  { %v1697_v26 = vpop.f32.mrb[22].mxu0  ;;  %v2749_v36 = vpop.f32.mrb[19].mxu1 }
 0x664   :  { %v2755_v35 = vpop.f32.mrb[23].mxu0 }
 0x668   :  { %v1740_v32 = vpop.f32.mrb[20].mxu1 }
 0x669   :  { %v1976_v45 = vcombine.low %v1648_v27, %v1740_v32  ;;  %v1977_v37 = vcombine.high %v1648_v27, %v1740_v32  ;;  %v2760_v44 = vpop.f32.mrb[21].mxu1 }
 0x66a   :  { %v1743_v14 = vpop.f32.mrb[22].mxu1 }
 0x66b   :  { %v2761_v39 = vpop.f32.mrb[23].mxu1  ;;  %v1984_v38 = vrot.slane %v1976_v45, %v3277_v59  ;;  %v1991_v13 = vrot.slane %v1977_v37, %v3277_v59 }
 0x66c   :  { %v1786_v40 = vpop.f32.mrb[24].mxu0 }
 0x66d   :  { %v1992_v41 = vcombine.low %v1694_v28, %v1786_v40  ;;  %v1993_v20 = vcombine.high %v1694_v28, %v1786_v40  ;;  %v2766_v21 = vpop.f32.mrb[25].mxu0 }
 0x66e   :  { %v1789_v50 = vpop.f32.mrb[26].mxu0 }
 0x66f   :  { %v2000_v51 = vrot.slane %v1992_v41, %v3277_v59  ;;  %v2007_v52 = vrot.slane %v1993_v20, %v3277_v59  ;;  %v2767_v53 = vpop.f32.mrb[27].mxu0 }
 0x671   :  { %v2008_v55 = vcombine.low %v1984_v38, %v2000_v51  ;;  %v2009_v31 = vcombine.high %v1984_v38, %v2000_v51  ;;  %v2024_v33 = vcombine.low %v1991_v13, %v2007_v52  ;;  %v2025_v56 = vcombine.high %v1991_v13, %v2007_v52 }
 0x673   :  { %v2016_v58 = vrot.slane %v2008_v55, %v3287_v5  ;;  %v2023_v60 = vrot.slane %v2009_v31, %v3287_v5  ;;  %v2032_v61 = vrot.slane %v2024_v33, %v3287_v5  ;;  %v2039_v62 = vrot.slane %v2025_v56, %v3287_v5 }
 0x675   :  { %v2112_v63 = vcombine.low %v2016_v58, %v2023_v60  ;;  %v2622_v0 = vcombine.high %v2016_v58, %v2023_v60  ;;  %v2128_v6 = vcombine.low %v2032_v61, %v2039_v62  ;;  %v2623_v7 = vcombine.high %v2032_v61, %v2039_v62  ;;  %v2856_v60 = vld [vmem:[%s3714_s6] sm:$0xff]  }
 0x676   :  { %2793 = vmatpush3.bf16.msra.mxu1 %v2856_v60 }
 0x677   :  { %v2119_v8 = vrot.slane %v2112_v63, %v3277_v59  ;;  %v2127_v48 = vrot.slane %v2622_v0, %v3277_v59  ;;  %v2135_v9 = vrot.slane %v2128_v6, %v3277_v59  ;;  %v2143_v10 = vrot.slane %v2623_v7, %v3277_v59  ;;  %2794 = vmatprep.subr.bf16.mxu1 %v3053_v18 }
 0x679   :  { %v2145_v47 = vcombine.high %v2119_v8, %v2127_v48  ;;  %v2161_v11 = vcombine.high %v2135_v9, %v2143_v10  ;;  %v2144_v49 = vcombine.low %v2119_v8, %v2127_v48  ;;  %v2160_v12 = vcombine.low %v2135_v9, %v2143_v10  ;;  %v2857_v9 = vld [vmem:[%s3714_s6 + $0x8] sm:$0xff]   ;;  %s3063_s6 = smov 8  }
 0x67a   :  { %2795 = vmatpush3.bf16.msra.mxu1 %v2857_v9  ;;  %v2631_v9 = vld [vmem:[#allocation10] ss:$0 sm:$0xff] }
 0x67b   :  { %v3596_v43 = vrot.slane %v2145_v47, %v3287_v5  ;;  %v3599_v15 = vrot.slane %v2161_v11, %v3287_v5  ;;  %v3602_v42 = vrot.slane %v2144_v49, %v3287_v5  ;;  %v3605_v46 = vrot.slane %v2160_v12, %v3287_v5  ;;  %2808 = vmatprep.subr.bf16.mxu1 %v3053_v18 }
 0x67d   :  { %v2178_v16 = vcombine.low %v3596_v43, %v3599_v15  ;;  %v2176_v54 = vcombine.low %v3602_v42, %v3605_v46  ;;  %v2177_v57 = vcombine.high %v3602_v42, %v3605_v46  ;;  %v2179_v17 = vcombine.high %v3596_v43, %v3599_v15  ;;  %v2626_v42 = vld [vmem:[#allocation7] ss:$0 sm:$0xff] }
 0x681   :  { %v1832_v19 = vpop.f32.mrb[24].mxu1  ;;  %v1878_v22 = vpop.f32.mrb[28].mxu0 }
 0x682   :  { %v2772_v23 = vpop.f32.mrb[25].mxu1  ;;  %v2778_v1 = vpop.f32.mrb[29].mxu0 }
 0x683   :  { %v1835_v2 = vpop.f32.mrb[26].mxu1  ;;  %v1881_v24 = vpop.f32.mrb[30].mxu0 }
 0x684   :  { %v2773_v25 = vpop.f32.mrb[27].mxu1  ;;  %v2779_v27 = vpop.f32.mrb[31].mxu0 }
 0x6a9   :  { %v1924_v28 = vpop.f32.mrb[28].mxu1 }
 0x6aa   :  { %v2044_v30 = vcombine.low %v1832_v19, %v1924_v28  ;;  %v2045_v29 = vcombine.high %v1832_v19, %v1924_v28  ;;  %v1970_v34 = vpop.f32.mrb[32].mxu0  ;;  %v2784_v26 = vpop.f32.mrb[29].mxu1 }
 0x6ab   :  { %v2060_v36 = vcombine.low %v1878_v22, %v1970_v34  ;;  %v2061_v35 = vcombine.high %v1878_v22, %v1970_v34  ;;  %v2790_v32 = vpop.f32.mrb[33].mxu0  ;;  %v1927_v45 = vpop.f32.mrb[30].mxu1 }
 0x6ac   :  { %v2052_v37 = vrot.slane %v2044_v30, %v3277_v59  ;;  %v2059_v44 = vrot.slane %v2045_v29, %v3277_v59  ;;  %v1973_v14 = vpop.f32.mrb[34].mxu0  ;;  %v2785_v39 = vpop.f32.mrb[31].mxu1 }
 0x6ad   :  { %v2068_v40 = vrot.slane %v2060_v36, %v3277_v59  ;;  %v2075_v41 = vrot.slane %v2061_v35, %v3277_v59  ;;  %v2791_v20 = vpop.f32.mrb[35].mxu0 }
 0x6af   :  { %v2076_v21 = vcombine.low %v2052_v37, %v2068_v40  ;;  %v2077_v50 = vcombine.high %v2052_v37, %v2068_v40  ;;  %v2092_v38 = vcombine.low %v2059_v44, %v2075_v41  ;;  %v2093_v13 = vcombine.high %v2059_v44, %v2075_v41 }
 0x6b1   :  { %v2084_v51 = vrot.slane %v2076_v21, %v3287_v5  ;;  %v2091_v52 = vrot.slane %v2077_v50, %v3287_v5  ;;  %v2100_v53 = vrot.slane %v2092_v38, %v3287_v5  ;;  %v2107_v55 = vrot.slane %v2093_v13, %v3287_v5 }
 0x6b3   :  { %v2180_v31 = vcombine.low %v2084_v51, %v2091_v52  ;;  %v2624_v33 = vcombine.high %v2084_v51, %v2091_v52  ;;  %v2196_v56 = vcombine.low %v2100_v53, %v2107_v55  ;;  %v2625_v58 = vcombine.high %v2100_v53, %v2107_v55  ;;  %v2858_v55 = vld [vmem:[%s3718_s10] sm:$0xff]  }
 0x6b4   :  { %2801 = vmatpush3.bf16.msra.mxu0 %v2858_v55 }
 0x6b5   :  { %v2187_v61 = vrot.slane %v2180_v31, %v3277_v59  ;;  %v2195_v62 = vrot.slane %v2624_v33, %v3277_v59  ;;  %v2203_v63 = vrot.slane %v2196_v56, %v3277_v59  ;;  %v2211_v0 = vrot.slane %v2625_v58, %v3277_v59  ;;  %v2859_v31 = vld [vmem:[%s3718_s10 + $0x8] sm:$0xff]   ;;  %2802 = vmatprep.subr.bf16.mxu0 %v3053_v18 }
 0x6b7   :  { %v2213_v6 = vcombine.high %v2187_v61, %v2195_v62  ;;  %v2229_v7 = vcombine.high %v2203_v63, %v2211_v0  ;;  %v2212_v8 = vcombine.low %v2187_v61, %v2195_v62  ;;  %v2228_v48 = vcombine.low %v2203_v63, %v2211_v0 }
 0x6b8   :  { %2803 = vmatpush3.bf16.msra.mxu0 %v2859_v31 }
 0x6b9   :  { %v2227_v10 = vrot.slane %v2213_v6, %v3287_v5  ;;  %v2243_v47 = vrot.slane %v2229_v7, %v3287_v5  ;;  %v2220_v11 = vrot.slane %v2212_v8, %v3287_v5  ;;  %v2236_v49 = vrot.slane %v2228_v48, %v3287_v5  ;;  %v2630_v6 = vld [vmem:[#allocation8] ss:$0 sm:$0xff] }
 0x6bb   :  { %v2246_v59 = vcombine.low %v2227_v10, %v2243_v47  ;;  %v2245_v12 = vcombine.high %v2220_v11, %v2236_v49  ;;  %v2244_v43 = vcombine.low %v2220_v11, %v2236_v49  ;;  %v2247_v15 = vcombine.high %v2227_v10, %v2243_v47 }
 0x6bd   :  { %v2844_v19 = vpack.i.bf16 %v2246_v59, %v2178_v16  ;;  %v2839_v22 = vpack.i.bf16 %v2245_v12, %v2177_v57  ;;  %v2849_v23 = vpack.i.bf16 %v2247_v15, %v2179_v17  ;;  %v2860_v59 = vld [vmem:[%s3720_s12] sm:$0xff]   ;;  %v2861_v12 = vld [vmem:[%s3720_s12 + $0x8] sm:$0xff]   ;;  %v2863_v15 = vld [vmem:[%s3720_s12 + $0x18] sm:$0xff]  }
 0x6bf   :  { %2845 = vrot.lane.b32.xlu1 %v2844_v19, %s3062_s5  ;;  %2840 = vrot.lane.b32.xlu0 %v2839_v22, %s3063_s6  ;;  %v2632_v19 = vld [vmem:[%s3719_s11] ss:$0 sm:$0xff] }
 0x6c3   :  { %2850 = vrot.lane.b32.xlu0 %v2849_v23, %s3064_s7 }
 0x731   :  { %v2846_v1 = vpop.permute.xlu1 %2845  ;;  %v2841_v2 = vpop.permute.xlu0 %2840 }
 0x732   :  { %v2843_v5 = vunpack.i.h.bf16 %v2841_v2  ;;  %v2842_v24 = vunpack.i.l.bf16 %v2841_v2  ;;  %v2848_v25 = vunpack.i.h.bf16 %v2846_v1  ;;  %v2847_v27 = vunpack.i.l.bf16 %v2846_v1 }
 0x734   :  { %v2272_v16 = vsel %vm1134_vm2, %v2176_v54, %v2842_v24  ;;  %v2273_v57 = vsel %vm1134_vm2, %v2244_v43, %v2843_v5  ;;  %v2862_v43 = vld [vmem:[%s3720_s12 + $0x10] sm:$0xff]  }
 0x735   :  { %v2851_v17 = vpop.permute.xlu0 %2850  ;;  %v2275_v29 = vsel %vm2274_vm4, %v2272_v16, %v2847_v27  ;;  %v2276_v34 = vsel %vm2274_vm4, %v2273_v57, %v2848_v25 }
 0x736   :  { %v2853_v28 = vunpack.i.h.bf16 %v2851_v17  ;;  %v2852_v30 = vunpack.i.l.bf16 %v2851_v17 }
 0x738   :  { %v2278_v26 = vsel %vm2277_vm5, %v2275_v29, %v2852_v30  ;;  %v2279_v36 = vsel %vm2277_vm5, %v2276_v34, %v2853_v28 }
 0x739   :  { %v2280_v35 = vpack.c.bf16 %v2279_v36, %v2278_v26 }
 0x73b   :  { %2797 = vmatmul.mubr.msk.bf16.vlgmr.msra.gmra.mrb[32].mxu1 %vm114_vm0, %v2280_v35 }
 0x73c   :  { %2816 = vmatprep.mubr.msk.bf16.mxu1 %vm3054_vm1, %v3053_v18  ;;  %2809 = vmatpush3.bf16.msra.mxu1 %v2860_v59 }
 0x73d   :  { %2810 = vmatprep.subr.bf16.mxu1 %v3053_v18 }
 0x740   :  { %2811 = vmatpush3.bf16.msra.mxu1 %v2861_v12 }
 0x741   :  { %2812 = vmatprep.subr.bf16.mxu1 %v3053_v18 }
 0x744   :  { %2813 = vmatpush3.bf16.msra.mxu1 %v2862_v43 }
 0x745   :  { %2814 = vmatprep.subr.bf16.mxu1 %v3053_v18 }
 0x748   :  { %2815 = vmatpush3.bf16.msra.mxu1 %v2863_v15 }
 0x80e   :  { %v2341_v46 = vpop.f32.mrb[32].mxu1 }
 0x80f   :  { %v2342_v54 = vadd.f32 %v2626_v42, %v2341_v46  ;;  %v2798_v32 = vpop.f32.mrb[33].mxu1 }
 0x810   :  { %v2344_v45 = vpop.f32.mrb[34].mxu1 }
 0x811   :  { %v3649_v37 = vadd.f32 %v2342_v54, %v3208_v3  ;;  %v2345_v44 = vadd.f32 %v2626_v42, %v2344_v45  ;;  %v2799_v14 = vpop.f32.mrb[35].mxu1 }
 0x812   :  { %v2636_v14 = vld [vmem:[%s3721_s13] ss:$0 sm:$0xff] }
 0x813   :  { %v3652_v39 = vadd.f32 %v2345_v44, %v3210_v4  ;;  %v2352_v40 = vsel %vm114_vm0, %v3649_v37, 0.0 }
 0x814   :  { %2353 = vadd.xlane.f32.xlu1 %v2352_v40 }
 0x815   :  { %v2355_v41 = vsel %vm114_vm0, %v3652_v39, 0.0 }
 0x816   :  { %2356 = vadd.xlane.f32.xlu0 %v2355_v41 }
 0x8a1   :  { %v2354_v20 = vpop.xlane.xlu1 %2353 }
 0x8a2   :  { %v2358_v21 = vmul.f32 0.03125, %v2354_v20 }
 0x8a3   :  { %v2357_v50 = vpop.xlane.xlu0 %2356 }
 0x8a4   :  { %v2360_v38 = vsub.f32 %v3649_v37, %v2358_v21  ;;  %v2359_v3 = vmul.f32 0.03125, %v2357_v50 }
 0x8a6   :  { %v2361_v13 = vsub.f32 %v3652_v39, %v2359_v3  ;;  %v2362_v51 = vmul.f32 %v2360_v38, %v2360_v38 }
 0x8a8   :  { %v2364_v4 = vsel %vm114_vm0, %v2362_v51, 0.0  ;;  %v2363_v52 = vmul.f32 %v2361_v13, %v2361_v13 }
 0x8a9   :  { %2365 = vadd.xlane.f32.xlu0 %v2364_v4 }
 0x8aa   :  { %v2367_v53 = vsel %vm114_vm0, %v2363_v52, 0.0 }
 0x8ad   :  { %2368 = vadd.xlane.f32.xlu0 %v2367_v53 }
 0x936   :  { %v2366_v33 = vpop.xlane.xlu0 %2365 }
 0x937   :  { %v2370_v56 = vmul.f32 0.03125, %v2366_v33 }
 0x939   :  { %v2372_v58 = vadd.f32 1e-06, %v2370_v56 }
 0x93a   :  { %v2369_v60 = vpop.xlane.xlu0 %2368 }
 0x93b   :  { %2900 = vrsqrt.f32 %v2372_v58  ;;  %v2371_v61 = vmul.f32 0.03125, %v2369_v60 }
 0x93d   :  { %v2373_v62 = vadd.f32 1e-06, %v2371_v61 }
 0x93f   :  { %2902 = vrsqrt.f32 %v2373_v62 }
 0x945   :  { %v2901_v63 = vpop.eup %2900 }
 0x946   :  { %v2376_v0 = vmul.f32 %v2901_v63, %v2360_v38 }
 0x948   :  { %v2384_v8 = vmul.f32 %v2630_v6, %v2376_v0 }
 0x949   :  { %v2903_v7 = vpop.eup %2902 }
 0x94a   :  { %v2377_v48 = vmul.f32 %v2903_v7, %v2361_v13  ;;  %v2392_v47 = vadd.f32 %v2631_v9, %v2384_v8 }
 0x94c   :  { %v2385_v10 = vmul.f32 %v2630_v6, %v2377_v48 }
 0x94e   :  { %v2393_v11 = vadd.f32 %v2631_v9, %v2385_v10 }
 0x950   :  { %v2394_v49 = vpack.c.bf16 %v2393_v11, %v2392_v47 }
 0x952   :  { %2805 = vmatmul.mubr.msk.bf16.vlgmr.msra.gmra.mrb[36].mxu0 %vm114_vm0, %v2394_v49 }
 0xa25   :  { %v2455_v22 = vpop.f32.mrb[36].mxu0 }
 0xa26   :  { %v2456_v23 = vadd.f32 %v2632_v19, %v2455_v22  ;;  %v2806_v1 = vpop.f32.mrb[37].mxu0 }
 0xa27   :  { %v2458_v2 = vpop.f32.mrb[38].mxu0 }
 0xa28   :  { %v2462_v5 = vmul.f32 %v2456_v23, %v2456_v23  ;;  %v2459_v24 = vadd.f32 %v2632_v19, %v2458_v2  ;;  %v2807_v25 = vpop.f32.mrb[39].mxu0 }
 0xa2a   :  { %v2464_v27 = vmul.f32 %v2462_v5, %v2456_v23  ;;  %v2463_v16 = vmul.f32 %v2459_v24, %v2459_v24 }
 0xa2c   :  { %v2466_v57 = vmul.f32 0.044715, %v2464_v27  ;;  %v2465_v18 = vmul.f32 %v2463_v16, %v2459_v24 }
 0xa2e   :  { %v2468_v17 = vadd.f32 %v2466_v57, %v2456_v23  ;;  %v2467_v28 = vmul.f32 0.044715, %v2465_v18 }
 0xa30   :  { %v2470_v30 = vmul.f32 0.7978846, %v2468_v17  ;;  %v2469_v29 = vadd.f32 %v2467_v28, %v2459_v24 }
 0xa32   :  { %2904 = vtanh.f32 %v2470_v30  ;;  %v2471_v34 = vmul.f32 0.7978846, %v2469_v29 }
 0xa34   :  { %2906 = vtanh.f32 %v2471_v34 }
 0xa3c   :  { %v2905_v26 = vpop.eup %2904 }
 0xa3d   :  { %v2474_v36 = vadd.f32 1.0, %v2905_v26 }
 0xa3e   :  { %v2907_v35 = vpop.eup %2906 }
 0xa3f   :  { %v2476_v42 = vmul.f32 0.5, %v2474_v36  ;;  %v2475_v46 = vadd.f32 1.0, %v2907_v35 }
 0xa41   :  { %v2477_v54 = vmul.f32 0.5, %v2475_v46  ;;  %v2478_v32 = vmul.f32 %v2476_v42, %v2456_v23 }
 0xa43   :  { %v2479_v45 = vmul.f32 %v2477_v54, %v2459_v24 }
 0xa45   :  { %v2480_v44 = vpack.c.bf16 %v2479_v45, %v2478_v32 }
 0xa47   :  { %2817 = vmatmul.mubr.msk.bf16.vlgmr.msra.gmra.mrb[36].mxu1 %vm2520_vm6, %v2480_v44 }
 0xb1a   :  { %v2558_v40 = vpop.f32.mrb[36].mxu1 }
 0xb1b   :  { %v2559_v41 = vadd.f32 %v2636_v14, %v2558_v40  ;;  %v2818_v20 = vpop.f32.mrb[37].mxu1 }
 0xb1c   :  { %v2561_v21 = vpop.f32.mrb[38].mxu1 }
 0xb1d   :  { %v2565_v50 = vadd.f32 %v2559_v41, %v3649_v37  ;;  %v2562_v38 = vadd.f32 %v2636_v14, %v2561_v21  ;;  %v2819_v3 = vpop.f32.mrb[39].mxu1 }
 0xb1f   :  { %2567 = vst.msk [vmem:[#allocation11] sm:$0xff] %vm114_vm0, %v2565_v50  ;;  %v2566_v13 = vadd.f32 %v2562_v38, %v3652_v39 }
 0xb21   :  { %2568 = vst.msk [vmem:[#allocation11 + $0x8] sm:$0xff] %vm114_vm0, %v2566_v13 }
 0xb22   :  { %3029 = shalt.err (!%p3026_p2)
}
 0xb23   :  { %s3030_s19 = scalar_lea.hbm %s3722_s14, 256 }
 0xb24   :  { %p3031_p3 = scmp.ne.s32.totalorder %s3722_s14, %s3030_s19  ;;  %p3034_p4 = scmp.lt.u32.totalorder %s3030_s19, %s3722_s14 }
 0xb26   :  { %p3036_p5 = pnand %p3034_p4, %p3031_p3 }
 0xb28   :  { %3039 = shalt.err (!%p3036_p5)
}
 0xb29   :  { %s3066_s22 = smov 128  }
 0xb2a   :  { %2580 = dma.vmem_to_hbm [thread:$0]  %s2575_s2, 256, %s3722_s14, [#allocation4], %s3066_s22, %s3066_s22, %s3063_s6  }
 0xb2b   :  { %3046 = dma.done.wait [#allocation4], 256  }
 0xb2c   :  { %3047 = vsyncadd [#allocation4], 4294967040 }
 0xb2d   :  { %2584 = vsyncpa [#allocation3], 1 }
 0xb2e   :  { %2585 = vsyncpa [#allocation6], 1 }
 0xb2f   :  { %2586 = vsyncpa [#allocation9], 1 }
 0xb30   :  { %2587 = vsyncpa [#allocation4], 1 }

</bundles_post_ra>
